<compile_context>
chip_gen: v6e
topology: v6e:2x2x1
jax: 0.10.0
libtpu: 0.0.40
codegen_flags: <defaults>
</compile_context>

<pallas_src>
import functools
import math

import jax
import jax.numpy as jnp
from jax import lax
from jax.experimental import pallas as pl
from jax.experimental.pallas import tpu as pltpu

# ----------------------------- configuration --------------------------------
B = 2            # batch
S = 8            # context_length / sequence
E = 32           # embedding_dim
BS = B * S       # flattened rows
NUM_BLOCKS = 2
NUM_HEADS = 4
PROJ_FACTOR = 2
ROUND_TO = 64
CONV_K = 4

# get_mlstm_inner_dim (round_proj_up_dim_up=True)
INNER = int(math.ceil(PROJ_FACTOR * E / ROUND_TO) * ROUND_TO)   # 64
DH = INNER // NUM_HEADS                                          # 16

LN_EPS = 1e-5
CELL_EPS = 1e-6
NEG_MASK = -1e30   # finite "-inf" so masked rows can never produce NaNs

F32 = jnp.float32
BF16 = jnp.bfloat16

PARAM_NAMES = (
    "ln_w", "w_up_x", "w_up_z", "conv_w", "conv_b",
    "wq", "wk", "wv",
    "wi_q", "wi_k", "wi_v", "bi",
    "wf_q", "wf_k", "wf_v", "bf",
    "skip", "mh_w", "w_down",
)


# ------------------------- pltpu.roll availability probe ---------------------
_USE_ROLL = None


def _probe_roll_kernel(a_ref, o_ref):
    o_ref[...] = pltpu.roll(a_ref[...], 1, 0)


def _roll_supported():
    """Check pltpu.roll lowers on this backend and matches jnp.roll semantics."""
    global _USE_ROLL
    if _USE_ROLL is not None:
        return _USE_ROLL
    ok = True
    try:
        for n in (NUM_HEADS, INNER):
            a = jnp.arange(BS * n, dtype=F32).reshape(BS, n)
            out = pl.pallas_call(
                _probe_roll_kernel,
                out_shape=jax.ShapeDtypeStruct((BS, n), F32),
            )(a)
            out = jax.block_until_ready(out)
            if not bool(jnp.allclose(out, jnp.roll(a, 1, axis=0))):
                ok = False
                break
    except Exception:
        ok = False
    _USE_ROLL = ok
    return ok


# ------------------------------ kernel helpers --------------------------------
def _shift_rows(x, d, pos, use_roll):
    """y[r] = x[r - d] if row r-d lies in the same sequence, else 0 (causal pad)."""
    if use_roll:
        # XLU sublane rotation: rolled[r] = x[r - d] (wrap-around rows masked below)
        y = pltpu.roll(x, d, 0)
    else:
        # Fallback: shift matrix on the MXU (known-good lowering path)
        row = lax.broadcasted_iota(jnp.int32, (BS, BS), 0)
        col = lax.broadcasted_iota(jnp.int32, (BS, BS), 1)
        m = (row - col == d).astype(F32)
        y = jnp.dot(m, x, preferred_element_type=F32)
    return jnp.where(pos >= float(d), y, jnp.zeros_like(y))


def _mlstm_block_body(x, pos, negmask, prm, blk, use_roll):
    """One mLSTM block (pre-LN residual) over the flattened (B*S, E) activations."""
    # ---- pre LayerNorm (weight only, bias=False) ----
    mu = jnp.mean(x, axis=-1, keepdims=True)
    var = jnp.mean((x - mu) ** 2, axis=-1, keepdims=True)
    xn = (x - mu) * lax.rsqrt(var + LN_EPS) * prm["ln_w"][blk]

    # ---- up projections (split w_up -> no lane-slicing of a wide matmul result) ----
    xn_b = xn.astype(BF16)
    x_m = jnp.dot(xn_b, prm["w_up_x"][blk], preferred_element_type=F32)   # (BS, INNER)
    z = jnp.dot(xn_b, prm["w_up_z"][blk], preferred_element_type=F32)     # (BS, INNER)

    # ---- causal depthwise conv1d (zero left padding) + SiLU, via sublane shifts ----
    conv_w = prm["conv_w"][blk]                                           # (CONV_K, INNER)
    conv = x_m * conv_w[CONV_K - 1:CONV_K, :]
    for j in range(CONV_K - 1):
        shift = CONV_K - 1 - j
        conv = conv + _shift_rows(x_m, shift, pos, use_roll) * conv_w[j:j + 1, :]
    conv = conv + prm["conv_b"][blk]
    x_conv = conv * jax.nn.sigmoid(conv)                                  # SiLU

    # ---- q / k / v projections (bf16 operands, f32 accumulation) ----
    x_conv_b = x_conv.astype(BF16)
    q = jnp.dot(x_conv_b, prm["wq"][blk], preferred_element_type=F32)     # (BS, INNER)
    k = jnp.dot(x_conv_b, prm["wk"][blk], preferred_element_type=F32)
    v = jnp.dot(x_m.astype(BF16), prm["wv"][blk], preferred_element_type=F32)

    # ---- gate pre-activations: split weights, no concat(q, k, v) relayout ----
    q_b, k_b, v_b = q.astype(BF16), k.astype(BF16), v.astype(BF16)
    ig = (jnp.dot(q_b, prm["wi_q"][blk], preferred_element_type=F32)
          + jnp.dot(k_b, prm["wi_k"][blk], preferred_element_type=F32)
          + jnp.dot(v_b, prm["wi_v"][blk], preferred_element_type=F32)
          + prm["bi"][blk])                                               # (BS, NH)
    fg = (jnp.dot(q_b, prm["wf_q"][blk], preferred_element_type=F32)
          + jnp.dot(k_b, prm["wf_k"][blk], preferred_element_type=F32)
          + jnp.dot(v_b, prm["wf_v"][blk], preferred_element_type=F32)
          + prm["bf"][blk])                                               # (BS, NH)

    # ---- per-sequence inclusive cumsum of log forget gates (Hillis-Steele scan) ----
    logf = jax.nn.log_sigmoid(fg)                                         # (BS, NH)
    cs = logf
    d = 1
    while d < S:
        cs = cs + _shift_rows(cs, d, pos, use_roll)
        d *= 2
    igmcs_T = (ig - cs).T                                                 # (NH, BS)

    inv_sqrt_dh = 1.0 / math.sqrt(DH)
    mh_w = prm["mh_w"][blk]                                               # (1, INNER)
    heads = []
    for h in range(NUM_HEADS):
        sl = slice(h * DH, (h + 1) * DH)
        qh, kh, vh = q[:, sl], k[:, sl], v[:, sl]

        # stabilized parallel mLSTM cell, both batch elements at once;
        # negmask (0 / -1e30) enforces the block-diagonal causal structure.
        logD = cs[:, h:h + 1] + igmcs_T[h:h + 1, :] + negmask             # (BS, BS)
        maxD = jnp.max(logD, axis=-1, keepdims=True)
        Dm = jnp.exp(logD - maxD)
        qk = lax.dot_general(qh, kh, (((1,), (1,)), ((), ())),
                             preferred_element_type=F32) * inv_sqrt_dh
        C = qk * Dm
        normz = jnp.maximum(jnp.abs(jnp.sum(C, axis=-1, keepdims=True)),
                            jnp.exp(-maxD))
        Cn = C / (normz + CELL_EPS)
        hh = jnp.dot(Cn, vh, preferred_element_type=F32)                  # (BS, DH)

        # per-head LayerNorm (MultiHeadLayerNorm semantics, bias=False)
        hmu = jnp.mean(hh, axis=-1, keepdims=True)
        hvar = jnp.mean((hh - hmu) ** 2, axis=-1, keepdims=True)
        hn = (hh - hmu) * lax.rsqrt(hvar + LN_EPS) * mh_w[:, sl]
        heads.append(hn)
    h_state = jnp.concatenate(heads, axis=-1)                             # (BS, INNER)

    # learnable skip of the conv activation, output gate SiLU(z), down projection
    h_skip = h_state + prm["skip"][blk] * x_conv
    h_out = h_skip * (z * jax.nn.sigmoid(z))
    y = jnp.dot(h_out.astype(BF16), prm["w_down"][blk],
                preferred_element_type=F32)                               # (BS, E)

    return x + y                                                          # residual


def _fused_stack_kernel(*refs, use_roll):
    """pos-emb add + NUM_BLOCKS mLSTM blocks + post-blocks LayerNorm, fully fused."""
    x_ref, emb_ref, pos_ref, negmask_ref = refs[:4]
    prm = dict(zip(PARAM_NAMES, refs[4:4 + len(PARAM_NAMES)]))
    final_w_ref = refs[4 + len(PARAM_NAMES)]
    o_ref = refs[5 + len(PARAM_NAMES)]

    pos = pos_ref[...]            # (BS, 1)  position within its sequence (f32)
    negmask = negmask_ref[...]    # (BS, BS) 0 / -1e30 block-diagonal causal mask

    # s_position_embeddings=True -> additive scaled sinusoidal embedding
    x = x_ref[...] + emb_ref[...]                                         # (BS, E)

    # all blocks are mLSTM blocks (slstm_at=[]); unrolled, weights stay VMEM-resident
    for blk in range(NUM_BLOCKS):
        x = _mlstm_block_body(x, pos, negmask, prm, blk, use_roll)

    # add_post_blocks_norm=True -> LayerNorm(E, bias=False)
    mu = jnp.mean(x, axis=-1, keepdims=True)
    var = jnp.mean((x - mu) ** 2, axis=-1, keepdims=True)
    o_ref[...] = (x - mu) * lax.rsqrt(var + LN_EPS) * final_w_ref[...]


# ------------------------------ plain-JAX glue --------------------------------
def scaled_sinusoidal_embedding(seq_len, dim, theta=100000.0):
    # ScaledSinusoidalEmbedding.forward with default pos (scale param at init value)
    half = dim // 2
    inv_freq = theta ** (-(jnp.arange(half, dtype=F32) / half))
    pos = jnp.arange(seq_len, dtype=F32)
    emb = pos[:, None] * inv_freq[None, :]
    emb = jnp.concatenate([jnp.sin(emb), jnp.cos(emb)], axis=-1)
    return (emb * dim ** (-0.5)).astype(F32)


def init_block_params(key):
    ks = jax.random.split(key, 13)

    def nrm(k, shape, scale=0.02, dtype=BF16):
        return (scale * jax.random.normal(k, shape)).astype(dtype)

    return dict(
        ln_w=jnp.ones((1, E), F32),
        w_up_x=nrm(ks[0], (E, INNER)),
        w_up_z=nrm(ks[1], (E, INNER)),
        conv_w=nrm(ks[2], (CONV_K, INNER), 0.1, F32),
        conv_b=jnp.zeros((1, INNER), F32),
        wq=nrm(ks[3], (INNER, INNER)),
        wk=nrm(ks[4], (INNER, INNER)),
        wv=nrm(ks[5], (INNER, INNER)),
        wi_q=nrm(ks[6], (INNER, NUM_HEADS), 0.01),
        wi_k=nrm(ks[7], (INNER, NUM_HEADS), 0.01),
        wi_v=nrm(ks[8], (INNER, NUM_HEADS), 0.01),
        bi=jnp.zeros((1, NUM_HEADS), F32),
        wf_q=nrm(ks[9], (INNER, NUM_HEADS), 0.01),
        wf_k=nrm(ks[10], (INNER, NUM_HEADS), 0.01),
        wf_v=nrm(ks[11], (INNER, NUM_HEADS), 0.01),
        bf=jnp.linspace(3.0, 6.0, NUM_HEADS, dtype=F32).reshape(1, NUM_HEADS),
        skip=jnp.ones((1, INNER), F32),
        mh_w=jnp.ones((1, INNER), F32),
        w_down=nrm(ks[12], (INNER, E)),
    )


def init_stack_params(key):
    per_block = [init_block_params(k) for k in jax.random.split(key, NUM_BLOCKS)]
    return {name: jnp.stack([p[name] for p in per_block]) for name in PARAM_NAMES}


def xlstm_block_stack_forward(x, stacked_params, final_ln_w):
    use_roll = _roll_supported()

    emb = jnp.tile(scaled_sinusoidal_embedding(S, E), (B, 1))             # (BS, E)
    r = jnp.arange(BS)
    pos = (r % S).astype(F32)[:, None]                                    # (BS, 1)
    same_seq = (r[:, None] // S) == (r[None, :] // S)
    causal = (r[None, :] <= r[:, None]) & same_seq
    negmask = jnp.where(causal, 0.0, NEG_MASK).astype(F32)                # (BS, BS)

    inputs = [x.reshape(BS, E), emb, pos, negmask]
    inputs += [stacked_params[name] for name in PARAM_NAMES]
    inputs += [final_ln_w]

    out = pl.pallas_call(
        functools.partial(_fused_stack_kernel, use_roll=use_roll),
        out_shape=jax.ShapeDtypeStruct((BS, E), F32),
    )(*inputs)
    return out.reshape(B, S, E)


# ----------------------------------- main -------------------------------------
if __name__ == "__main__":
    key = jax.random.PRNGKey(0)
    k_x, k_p = jax.random.split(key)
    x = jax.random.normal(k_x, (B, S, E), dtype=F32)

    stacked_params = init_stack_params(k_p)
    final_ln_w = jnp.ones((1, E), F32)

    out = xlstm_block_stack_forward(x, stacked_params, final_ln_w)
    out = jax.block_until_ready(out)

    assert out.shape == (B, S, E), out.shape
    assert bool(jnp.all(jnp.isfinite(out)))
    print("KERNEL_OK")
</pallas_src>

<mosaic_0001>
module attributes {stable_mosaic.version = 11 : i64} {
  func.func @_probe_roll_kernel(%arg0: memref<16x4xf32, #tpu.memory_space<vmem>>, %arg1: memref<16x4xf32, #tpu.memory_space<vmem>>) attributes {dimension_semantics = [], scalar_prefetch = 0 : i64, scratch_operands = 0 : i64, tpu.core_type = #tpu.core_type<tc>} {
    %c0 = arith.constant 0 : index
    %c0_0 = arith.constant 0 : index
    %0 = vector.load %arg0[%c0, %c0_0] : memref<16x4xf32, #tpu.memory_space<vmem>>, vector<16x4xf32>
    %c1_i32 = arith.constant 1 : i32
    %1 = tpu.dynamic_rotate %0 by %c1_i32 dim 0 : vector<16x4xf32>, i32 -> vector<16x4xf32>
    %c0_1 = arith.constant 0 : index
    %c0_2 = arith.constant 0 : index
    %2 = vector.load %arg1[%c0_1, %c0_2] : memref<16x4xf32, #tpu.memory_space<vmem>>, vector<16x4xf32>
    tpu.vector_store %arg1[%c0_1, %c0_2], %1 {strides = array<i32>} : memref<16x4xf32, #tpu.memory_space<vmem>>, vector<16x4xf32>,
    return
  }
}

module attributes {stable_mosaic.version = 11 : i64} {
  func.func @_fused_stack_kernel(%arg0: memref<16x32xf32, #tpu.memory_space<vmem>>, %arg1: memref<16x32xf32, #tpu.memory_space<vmem>>, %arg2: memref<16x1xf32, #tpu.memory_space<vmem>>, %arg3: memref<16x16xf32, #tpu.memory_space<vmem>>, %arg4: memref<2x1x32xf32, #tpu.memory_space<vmem>>, %arg5: memref<2x32x64xbf16, #tpu.memory_space<vmem>>, %arg6: memref<2x32x64xbf16, #tpu.memory_space<vmem>>, %arg7: memref<2x4x64xf32, #tpu.memory_space<vmem>>, %arg8: memref<2x1x64xf32, #tpu.memory_space<vmem>>, %arg9: memref<2x64x64xbf16, #tpu.memory_space<vmem>>, %arg10: memref<2x64x64xbf16, #tpu.memory_space<vmem>>, %arg11: memref<2x64x64xbf16, #tpu.memory_space<vmem>>, %arg12: memref<2x64x4xbf16, #tpu.memory_space<vmem>>, %arg13: memref<2x64x4xbf16, #tpu.memory_space<vmem>>, %arg14: memref<2x64x4xbf16, #tpu.memory_space<vmem>>, %arg15: memref<2x1x4xf32, #tpu.memory_space<vmem>>, %arg16: memref<2x64x4xbf16, #tpu.memory_space<vmem>>, %arg17: memref<2x64x4xbf16, #tpu.memory_space<vmem>>, %arg18: memref<2x64x4xbf16, #tpu.memory_space<vmem>>, %arg19: memref<2x1x4xf32, #tpu.memory_space<vmem>>, %arg20: memref<2x1x64xf32, #tpu.memory_space<vmem>>, %arg21: memref<2x1x64xf32, #tpu.memory_space<vmem>>, %arg22: memref<2x64x32xbf16, #tpu.memory_space<vmem>>, %arg23: memref<1x32xf32, #tpu.memory_space<vmem>>, %arg24: memref<16x32xf32, #tpu.memory_space<vmem>>) attributes {dimension_semantics = [], scalar_prefetch = 0 : i64, scratch_operands = 0 : i64, tpu.core_type = #tpu.core_type<tc>} {
    %c0 = arith.constant 0 : index
    %c0_0 = arith.constant 0 : index
    %0 = vector.load %arg2[%c0, %c0_0] : memref<16x1xf32, #tpu.memory_space<vmem>>, vector<16x1xf32>
    %c0_1 = arith.constant 0 : index
    %c0_2 = arith.constant 0 : index
    %1 = vector.load %arg3[%c0_1, %c0_2] : memref<16x16xf32, #tpu.memory_space<vmem>>, vector<16x16xf32>
    %c0_3 = arith.constant 0 : index
    %c0_4 = arith.constant 0 : index
    %2 = vector.load %arg0[%c0_3, %c0_4] : memref<16x32xf32, #tpu.memory_space<vmem>>, vector<16x32xf32>
    %c0_5 = arith.constant 0 : index
    %c0_6 = arith.constant 0 : index
    %3 = vector.load %arg1[%c0_5, %c0_6] : memref<16x32xf32, #tpu.memory_space<vmem>>, vector<16x32xf32>
    %4 = arith.addf %2, %3 : vector<16x32xf32>
    %cst = arith.constant dense<0.000000e+00> : vector<16xf32>
    %5 = vector.multi_reduction <add>, %4, %cst [1] : vector<16x32xf32> to vector<16xf32>
    %6 = vector.shape_cast %5 : vector<16xf32> to vector<16x1xf32>
    %cst_7 = arith.constant 3.200000e+01 : f32
    %7 = vector.broadcast %cst_7 : f32 to vector<16x1xf32>
    %8 = arith.divf %6, %7 : vector<16x1xf32>
    %9 = vector.broadcast %8 : vector<16x1xf32> to vector<16x32xf32>
    %10 = arith.subf %4, %9 : vector<16x32xf32>
    %11 = arith.mulf %10, %10 : vector<16x32xf32>
    %cst_8 = arith.constant dense<0.000000e+00> : vector<16xf32>
    %12 = vector.multi_reduction <add>, %11, %cst_8 [1] : vector<16x32xf32> to vector<16xf32>
    %13 = vector.shape_cast %12 : vector<16xf32> to vector<16x1xf32>
    %cst_9 = arith.constant 3.200000e+01 : f32
    %14 = vector.broadcast %cst_9 : f32 to vector<16x1xf32>
    %15 = arith.divf %13, %14 : vector<16x1xf32>
    %16 = vector.broadcast %8 : vector<16x1xf32> to vector<16x32xf32>
    %17 = arith.subf %4, %16 : vector<16x32xf32>
    %cst_10 = arith.constant 9.99999974E-6 : f32
    %18 = vector.broadcast %cst_10 : f32 to vector<16x1xf32>
    %19 = arith.addf %15, %18 : vector<16x1xf32>
    %20 = math.rsqrt %19 : vector<16x1xf32>
    %21 = vector.broadcast %20 : vector<16x1xf32> to vector<16x32xf32>
    %22 = arith.mulf %17, %21 : vector<16x32xf32>
    %c0_11 = arith.constant 0 : index
    %c0_12 = arith.constant 0 : index
    %c0_13 = arith.constant 0 : index
    %23 = vector.load %arg4[%c0_11, %c0_12, %c0_13] : memref<2x1x32xf32, #tpu.memory_space<vmem>>, vector<1x1x32xf32>
    %24 = vector.shape_cast %23 : vector<1x1x32xf32> to vector<1x32xf32>
    %25 = vector.broadcast %24 : vector<1x32xf32> to vector<16x32xf32>
    %26 = arith.mulf %22, %25 : vector<16x32xf32>
    %27 = arith.truncf %26 : vector<16x32xf32> to vector<16x32xbf16>
    %c0_14 = arith.constant 0 : index
    %c0_15 = arith.constant 0 : index
    %c0_16 = arith.constant 0 : index
    %28 = vector.load %arg5[%c0_14, %c0_15, %c0_16] : memref<2x32x64xbf16, #tpu.memory_space<vmem>>, vector<1x32x64xbf16>
    %29 = vector.shape_cast %28 : vector<1x32x64xbf16> to vector<32x64xbf16>
    %cst_17 = arith.constant dense<0.000000e+00> : vector<16x64xf32>
    %30 = tpu.matmul %27, %29, %cst_17 {dimension_numbers = #tpu.dot_dimension_numbers<[1], [0], [0], [1], [0, 0, 1, 1], [], []>} : vector<16x32xbf16>, vector<32x64xbf16>, vector<16x64xf32> -> vector<16x64xf32>
    %c0_18 = arith.constant 0 : index
    %c0_19 = arith.constant 0 : index
    %c0_20 = arith.constant 0 : index
    %31 = vector.load %arg6[%c0_18, %c0_19, %c0_20] : memref<2x32x64xbf16, #tpu.memory_space<vmem>>, vector<1x32x64xbf16>
    %32 = vector.shape_cast %31 : vector<1x32x64xbf16> to vector<32x64xbf16>
    %cst_21 = arith.constant dense<0.000000e+00> : vector<16x64xf32>
    %33 = tpu.matmul %27, %32, %cst_21 {dimension_numbers = #tpu.dot_dimension_numbers<[1], [0], [0], [1], [0, 0, 1, 1], [], []>} : vector<16x32xbf16>, vector<32x64xbf16>, vector<16x64xf32> -> vector<16x64xf32>
    %c0_22 = arith.constant 0 : index
    %c0_23 = arith.constant 0 : index
    %c0_24 = arith.constant 0 : index
    %34 = vector.load %arg7[%c0_22, %c0_23, %c0_24] : memref<2x4x64xf32, #tpu.memory_space<vmem>>, vector<1x4x64xf32>
    %35 = vector.shape_cast %34 : vector<1x4x64xf32> to vector<4x64xf32>
    %36 = vector.extract_strided_slice %35 {offsets = [3, 0], sizes = [1, 64], strides = [1, 1]} : vector<4x64xf32> to vector<1x64xf32>
    %37 = vector.broadcast %36 : vector<1x64xf32> to vector<16x64xf32>
    %38 = arith.mulf %30, %37 : vector<16x64xf32>
    %39 = tpu.iota {dimensions = array<i32: 0>} : vector<16x16xi32>
    %40 = tpu.iota {dimensions = array<i32: 1>} : vector<16x16xi32>
    %41 = arith.subi %39, %40 : vector<16x16xi32>
    %c3_i32 = arith.constant 3 : i32
    %42 = vector.broadcast %c3_i32 : i32 to vector<16x16xi32>
    %43 = arith.cmpi eq, %41, %42 : vector<16x16xi32>
    %44 = arith.extui %43 : vector<16x16xi1> to vector<16x16xi32>
    %45 = arith.sitofp %44 : vector<16x16xi32> to vector<16x16xf32>
    %cst_25 = arith.constant dense<0.000000e+00> : vector<16x64xf32>
    %46 = tpu.matmul %45, %30, %cst_25 {dimension_numbers = #tpu.dot_dimension_numbers<[1], [0], [0], [1], [0, 0, 1, 1], [], []>} : vector<16x16xf32>, vector<16x64xf32>, vector<16x64xf32> -> vector<16x64xf32>
    %cst_26 = arith.constant 3.000000e+00 : f32
    %47 = vector.broadcast %cst_26 : f32 to vector<16x1xf32>
    %48 = arith.cmpf oge, %0, %47 : vector<16x1xf32>
    %cst_27 = arith.constant 0.000000e+00 : f32
    %49 = vector.broadcast %cst_27 : f32 to vector<16x64xf32>
    %50 = vector.shape_cast %48 : vector<16x1xi1> to vector<16x1xi1>
    %51 = vector.broadcast %50 : vector<16x1xi1> to vector<16x64xi1>
    %52 = arith.select %51, %46, %49 : vector<16x64xi1>, vector<16x64xf32>
    %53 = vector.extract_strided_slice %35 {offsets = [0, 0], sizes = [1, 64], strides = [1, 1]} : vector<4x64xf32> to vector<1x64xf32>
    %54 = vector.broadcast %53 : vector<1x64xf32> to vector<16x64xf32>
    %55 = arith.mulf %52, %54 : vector<16x64xf32>
    %56 = arith.addf %38, %55 : vector<16x64xf32>
    %57 = tpu.iota {dimensions = array<i32: 0>} : vector<16x16xi32>
    %58 = tpu.iota {dimensions = array<i32: 1>} : vector<16x16xi32>
    %59 = arith.subi %57, %58 : vector<16x16xi32>
    %c2_i32 = arith.constant 2 : i32
    %60 = vector.broadcast %c2_i32 : i32 to vector<16x16xi32>
    %61 = arith.cmpi eq, %59, %60 : vector<16x16xi32>
    %62 = arith.extui %61 : vector<16x16xi1> to vector<16x16xi32>
    %63 = arith.sitofp %62 : vector<16x16xi32> to vector<16x16xf32>
    %cst_28 = arith.constant dense<0.000000e+00> : vector<16x64xf32>
    %64 = tpu.matmul %63, %30, %cst_28 {dimension_numbers = #tpu.dot_dimension_numbers<[1], [0], [0], [1], [0, 0, 1, 1], [], []>} : vector<16x16xf32>, vector<16x64xf32>, vector<16x64xf32> -> vector<16x64xf32>
    %cst_29 = arith.constant 2.000000e+00 : f32
    %65 = vector.broadcast %cst_29 : f32 to vector<16x1xf32>
    %66 = arith.cmpf oge, %0, %65 : vector<16x1xf32>
    %cst_30 = arith.constant 0.000000e+00 : f32
    %67 = vector.broadcast %cst_30 : f32 to vector<16x64xf32>
    %68 = vector.shape_cast %66 : vector<16x1xi1> to vector<16x1xi1>
    %69 = vector.broadcast %68 : vector<16x1xi1> to vector<16x64xi1>
    %70 = arith.select %69, %64, %67 : vector<16x64xi1>, vector<16x64xf32>
    %71 = vector.extract_strided_slice %35 {offsets = [1, 0], sizes = [1, 64], strides = [1, 1]} : vector<4x64xf32> to vector<1x64xf32>
    %72 = vector.broadcast %71 : vector<1x64xf32> to vector<16x64xf32>
    %73 = arith.mulf %70, %72 : vector<16x64xf32>
    %74 = arith.addf %56, %73 : vector<16x64xf32>
    %75 = tpu.iota {dimensions = array<i32: 0>} : vector<16x16xi32>
    %76 = tpu.iota {dimensions = array<i32: 1>} : vector<16x16xi32>
    %77 = arith.subi %75, %76 : vector<16x16xi32>
    %c1_i32 = arith.constant 1 : i32
    %78 = vector.broadcast %c1_i32 : i32 to vector<16x16xi32>
    %79 = arith.cmpi eq, %77, %78 : vector<16x16xi32>
    %80 = arith.extui %79 : vector<16x16xi1> to vector<16x16xi32>
    %81 = arith.sitofp %80 : vector<16x16xi32> to vector<16x16xf32>
    %cst_31 = arith.constant dense<0.000000e+00> : vector<16x64xf32>
    %82 = tpu.matmul %81, %30, %cst_31 {dimension_numbers = #tpu.dot_dimension_numbers<[1], [0], [0], [1], [0, 0, 1, 1], [], []>} : vector<16x16xf32>, vector<16x64xf32>, vector<16x64xf32> -> vector<16x64xf32>
    %cst_32 = arith.constant 1.000000e+00 : f32
    %83 = vector.broadcast %cst_32 : f32 to vector<16x1xf32>
    %84 = arith.cmpf oge, %0, %83 : vector<16x1xf32>
    %cst_33 = arith.constant 0.000000e+00 : f32
    %85 = vector.broadcast %cst_33 : f32 to vector<16x64xf32>
    %86 = vector.shape_cast %84 : vector<16x1xi1> to vector<16x1xi1>
    %87 = vector.broadcast %86 : vector<16x1xi1> to vector<16x64xi1>
    %88 = arith.select %87, %82, %85 : vector<16x64xi1>, vector<16x64xf32>
    %89 = vector.extract_strided_slice %35 {offsets = [2, 0], sizes = [1, 64], strides = [1, 1]} : vector<4x64xf32> to vector<1x64xf32>
    %90 = vector.broadcast %89 : vector<1x64xf32> to vector<16x64xf32>
    %91 = arith.mulf %88, %90 : vector<16x64xf32>
    %92 = arith.addf %74, %91 : vector<16x64xf32>
    %c0_34 = arith.constant 0 : index
    %c0_35 = arith.constant 0 : index
    %c0_36 = arith.constant 0 : index
    %93 = vector.load %arg8[%c0_34, %c0_35, %c0_36] : memref<2x1x64xf32, #tpu.memory_space<vmem>>, vector<1x1x64xf32>
    %94 = vector.shape_cast %93 : vector<1x1x64xf32> to vector<1x64xf32>
    %95 = vector.broadcast %94 : vector<1x64xf32> to vector<16x64xf32>
    %96 = arith.addf %92, %95 : vector<16x64xf32>
    %97 = arith.negf %96 : vector<16x64xf32>
    %98 = math.exp %97 : vector<16x64xf32>
    %cst_37 = arith.constant 1.000000e+00 : f32
    %99 = vector.broadcast %cst_37 : f32 to vector<16x64xf32>
    %100 = arith.addf %99, %98 : vector<16x64xf32>
    %101 = arith.divf %99, %100 : vector<16x64xf32>
    %102 = arith.mulf %96, %101 : vector<16x64xf32>
    %103 = arith.truncf %102 : vector<16x64xf32> to vector<16x64xbf16>
    %c0_38 = arith.constant 0 : index
    %c0_39 = arith.constant 0 : index
    %c0_40 = arith.constant 0 : index
    %104 = vector.load %arg9[%c0_38, %c0_39, %c0_40] : memref<2x64x64xbf16, #tpu.memory_space<vmem>>, vector<1x64x64xbf16>
    %105 = vector.shape_cast %104 : vector<1x64x64xbf16> to vector<64x64xbf16>
    %cst_41 = arith.constant dense<0.000000e+00> : vector<16x64xf32>
    %106 = tpu.matmul %103, %105, %cst_41 {dimension_numbers = #tpu.dot_dimension_numbers<[1], [0], [0], [1], [0, 0, 1, 1], [], []>} : vector<16x64xbf16>, vector<64x64xbf16>, vector<16x64xf32> -> vector<16x64xf32>
    %c0_42 = arith.constant 0 : index
    %c0_43 = arith.constant 0 : index
    %c0_44 = arith.constant 0 : index
    %107 = vector.load %arg10[%c0_42, %c0_43, %c0_44] : memref<2x64x64xbf16, #tpu.memory_space<vmem>>, vector<1x64x64xbf16>
    %108 = vector.shape_cast %107 : vector<1x64x64xbf16> to vector<64x64xbf16>
    %cst_45 = arith.constant dense<0.000000e+00> : vector<16x64xf32>
    %109 = tpu.matmul %103, %108, %cst_45 {dimension_numbers = #tpu.dot_dimension_numbers<[1], [0], [0], [1], [0, 0, 1, 1], [], []>} : vector<16x64xbf16>, vector<64x64xbf16>, vector<16x64xf32> -> vector<16x64xf32>
    %110 = arith.truncf %30 : vector<16x64xf32> to vector<16x64xbf16>
    %c0_46 = arith.constant 0 : index
    %c0_47 = arith.constant 0 : index
    %c0_48 = arith.constant 0 : index
    %111 = vector.load %arg11[%c0_46, %c0_47, %c0_48] : memref<2x64x64xbf16, #tpu.memory_space<vmem>>, vector<1x64x64xbf16>
    %112 = vector.shape_cast %111 : vector<1x64x64xbf16> to vector<64x64xbf16>
    %cst_49 = arith.constant dense<0.000000e+00> : vector<16x64xf32>
    %113 = tpu.matmul %110, %112, %cst_49 {dimension_numbers = #tpu.dot_dimension_numbers<[1], [0], [0], [1], [0, 0, 1, 1], [], []>} : vector<16x64xbf16>, vector<64x64xbf16>, vector<16x64xf32> -> vector<16x64xf32>
    %114 = arith.truncf %106 : vector<16x64xf32> to vector<16x64xbf16>
    %115 = arith.truncf %109 : vector<16x64xf32> to vector<16x64xbf16>
    %116 = arith.truncf %113 : vector<16x64xf32> to vector<16x64xbf16>
    %c0_50 = arith.constant 0 : index
    %c0_51 = arith.constant 0 : index
    %c0_52 = arith.constant 0 : index
    %117 = vector.load %arg12[%c0_50, %c0_51, %c0_52] : memref<2x64x4xbf16, #tpu.memory_space<vmem>>, vector<1x64x4xbf16>
    %118 = vector.shape_cast %117 : vector<1x64x4xbf16> to vector<64x4xbf16>
    %cst_53 = arith.constant dense<0.000000e+00> : vector<16x4xf32>
    %119 = tpu.matmul %114, %118, %cst_53 {dimension_numbers = #tpu.dot_dimension_numbers<[1], [0], [0], [1], [0, 0, 1, 1], [], []>} : vector<16x64xbf16>, vector<64x4xbf16>, vector<16x4xf32> -> vector<16x4xf32>
    %c0_54 = arith.constant 0 : index
    %c0_55 = arith.constant 0 : index
    %c0_56 = arith.constant 0 : index
    %120 = vector.load %arg13[%c0_54, %c0_55, %c0_56] : memref<2x64x4xbf16, #tpu.memory_space<vmem>>, vector<1x64x4xbf16>
    %121 = vector.shape_cast %120 : vector<1x64x4xbf16> to vector<64x4xbf16>
    %cst_57 = arith.constant dense<0.000000e+00> : vector<16x4xf32>
    %122 = tpu.matmul %115, %121, %cst_57 {dimension_numbers = #tpu.dot_dimension_numbers<[1], [0], [0], [1], [0, 0, 1, 1], [], []>} : vector<16x64xbf16>, vector<64x4xbf16>, vector<16x4xf32> -> vector<16x4xf32>
    %123 = arith.addf %119, %122 : vector<16x4xf32>
    %c0_58 = arith.constant 0 : index
    %c0_59 = arith.constant 0 : index
    %c0_60 = arith.constant 0 : index
    %124 = vector.load %arg14[%c0_58, %c0_59, %c0_60] : memref<2x64x4xbf16, #tpu.memory_space<vmem>>, vector<1x64x4xbf16>
    %125 = vector.shape_cast %124 : vector<1x64x4xbf16> to vector<64x4xbf16>
    %cst_61 = arith.constant dense<0.000000e+00> : vector<16x4xf32>
    %126 = tpu.matmul %116, %125, %cst_61 {dimension_numbers = #tpu.dot_dimension_numbers<[1], [0], [0], [1], [0, 0, 1, 1], [], []>} : vector<16x64xbf16>, vector<64x4xbf16>, vector<16x4xf32> -> vector<16x4xf32>
    %127 = arith.addf %123, %126 : vector<16x4xf32>
    %c0_62 = arith.constant 0 : index
    %c0_63 = arith.constant 0 : index
    %c0_64 = arith.constant 0 : index
    %128 = vector.load %arg15[%c0_62, %c0_63, %c0_64] : memref<2x1x4xf32, #tpu.memory_space<vmem>>, vector<1x1x4xf32>
    %129 = vector.shape_cast %128 : vector<1x1x4xf32> to vector<1x4xf32>
    %130 = vector.broadcast %129 : vector<1x4xf32> to vector<16x4xf32>
    %131 = arith.addf %127, %130 : vector<16x4xf32>
    %c0_65 = arith.constant 0 : index
    %c0_66 = arith.constant 0 : index
    %c0_67 = arith.constant 0 : index
    %132 = vector.load %arg16[%c0_65, %c0_66, %c0_67] : memref<2x64x4xbf16, #tpu.memory_space<vmem>>, vector<1x64x4xbf16>
    %133 = vector.shape_cast %132 : vector<1x64x4xbf16> to vector<64x4xbf16>
    %cst_68 = arith.constant dense<0.000000e+00> : vector<16x4xf32>
    %134 = tpu.matmul %114, %133, %cst_68 {dimension_numbers = #tpu.dot_dimension_numbers<[1], [0], [0], [1], [0, 0, 1, 1], [], []>} : vector<16x64xbf16>, vector<64x4xbf16>, vector<16x4xf32> -> vector<16x4xf32>
    %c0_69 = arith.constant 0 : index
    %c0_70 = arith.constant 0 : index
    %c0_71 = arith.constant 0 : index
    %135 = vector.load %arg17[%c0_69, %c0_70, %c0_71] : memref<2x64x4xbf16, #tpu.memory_space<vmem>>, vector<1x64x4xbf16>
    %136 = vector.shape_cast %135 : vector<1x64x4xbf16> to vector<64x4xbf16>
    %cst_72 = arith.constant dense<0.000000e+00> : vector<16x4xf32>
    %137 = tpu.matmul %115, %136, %cst_72 {dimension_numbers = #tpu.dot_dimension_numbers<[1], [0], [0], [1], [0, 0, 1, 1], [], []>} : vector<16x64xbf16>, vector<64x4xbf16>, vector<16x4xf32> -> vector<16x4xf32>
    %138 = arith.addf %134, %137 : vector<16x4xf32>
    %c0_73 = arith.constant 0 : index
    %c0_74 = arith.constant 0 : index
    %c0_75 = arith.constant 0 : index
    %139 = vector.load %arg18[%c0_73, %c0_74, %c0_75] : memref<2x64x4xbf16, #tpu.memory_space<vmem>>, vector<1x64x4xbf16>
    %140 = vector.shape_cast %139 : vector<1x64x4xbf16> to vector<64x4xbf16>
    %cst_76 = arith.constant dense<0.000000e+00> : vector<16x4xf32>
    %141 = tpu.matmul %116, %140, %cst_76 {dimension_numbers = #tpu.dot_dimension_numbers<[1], [0], [0], [1], [0, 0, 1, 1], [], []>} : vector<16x64xbf16>, vector<64x4xbf16>, vector<16x4xf32> -> vector<16x4xf32>
    %142 = arith.addf %138, %141 : vector<16x4xf32>
    %c0_77 = arith.constant 0 : index
    %c0_78 = arith.constant 0 : index
    %c0_79 = arith.constant 0 : index
    %143 = vector.load %arg19[%c0_77, %c0_78, %c0_79] : memref<2x1x4xf32, #tpu.memory_space<vmem>>, vector<1x1x4xf32>
    %144 = vector.shape_cast %143 : vector<1x1x4xf32> to vector<1x4xf32>
    %145 = vector.broadcast %144 : vector<1x4xf32> to vector<16x4xf32>
    %146 = arith.addf %142, %145 : vector<16x4xf32>
    %cst_80 = arith.constant 0.000000e+00 : f32
    %147 = vector.broadcast %cst_80 : f32 to vector<16x4xf32>
    %148 = arith.subf %147, %146 : vector<16x4xf32>
    %cst_81 = arith.constant 0.000000e+00 : f32
    %149 = vector.broadcast %cst_81 : f32 to vector<16x4xf32>
    %150 = arith.maximumf %148, %149 : vector<16x4xf32>
    %151 = vector.broadcast %cst_81 : f32 to vector<16x4xf32>
    %152 = arith.subf %148, %151 : vector<16x4xf32>
    %153 = arith.cmpf one, %152, %152 : vector<16x4xf32>
    %154 = vector.broadcast %cst_81 : f32 to vector<16x4xf32>
    %155 = arith.addf %148, %154 : vector<16x4xf32>
    %156 = math.absf %152 : vector<16x4xf32>
    %cst_82 = arith.constant 0.000000e+00 : f32
    %157 = vector.broadcast %cst_82 : f32 to vector<16x4xf32>
    %158 = arith.subf %157, %156 : vector<16x4xf32>
    %159 = math.exp %158 : vector<16x4xf32>
    %160 = math.log1p %159 : vector<16x4xf32>
    %161 = arith.addf %150, %160 : vector<16x4xf32>
    %162 = arith.select %153, %155, %161 : vector<16x4xi1>, vector<16x4xf32>
    %cst_83 = arith.constant 0.000000e+00 : f32
    %163 = vector.broadcast %cst_83 : f32 to vector<16x4xf32>
    %164 = arith.subf %163, %162 : vector<16x4xf32>
    %165 = tpu.iota {dimensions = array<i32: 0>} : vector<16x16xi32>
    %166 = tpu.iota {dimensions = array<i32: 1>} : vector<16x16xi32>
    %167 = arith.subi %165, %166 : vector<16x16xi32>
    %c1_i32_84 = arith.constant 1 : i32
    %168 = vector.broadcast %c1_i32_84 : i32 to vector<16x16xi32>
    %169 = arith.cmpi eq, %167, %168 : vector<16x16xi32>
    %170 = arith.extui %169 : vector<16x16xi1> to vector<16x16xi32>
    %171 = arith.sitofp %170 : vector<16x16xi32> to vector<16x16xf32>
    %cst_85 = arith.constant dense<0.000000e+00> : vector<16x4xf32>
    %172 = tpu.matmul %171, %164, %cst_85 {dimension_numbers = #tpu.dot_dimension_numbers<[1], [0], [0], [1], [0, 0, 1, 1], [], []>} : vector<16x16xf32>, vector<16x4xf32>, vector<16x4xf32> -> vector<16x4xf32>
    %cst_86 = arith.constant 1.000000e+00 : f32
    %173 = vector.broadcast %cst_86 : f32 to vector<16x1xf32>
    %174 = arith.cmpf oge, %0, %173 : vector<16x1xf32>
    %cst_87 = arith.constant 0.000000e+00 : f32
    %175 = vector.broadcast %cst_87 : f32 to vector<16x4xf32>
    %176 = vector.shape_cast %174 : vector<16x1xi1> to vector<16x1xi1>
    %177 = vector.broadcast %176 : vector<16x1xi1> to vector<16x4xi1>
    %178 = arith.select %177, %172, %175 : vector<16x4xi1>, vector<16x4xf32>
    %179 = arith.addf %164, %178 : vector<16x4xf32>
    %180 = tpu.iota {dimensions = array<i32: 0>} : vector<16x16xi32>
    %181 = tpu.iota {dimensions = array<i32: 1>} : vector<16x16xi32>
    %182 = arith.subi %180, %181 : vector<16x16xi32>
    %c2_i32_88 = arith.constant 2 : i32
    %183 = vector.broadcast %c2_i32_88 : i32 to vector<16x16xi32>
    %184 = arith.cmpi eq, %182, %183 : vector<16x16xi32>
    %185 = arith.extui %184 : vector<16x16xi1> to vector<16x16xi32>
    %186 = arith.sitofp %185 : vector<16x16xi32> to vector<16x16xf32>
    %cst_89 = arith.constant dense<0.000000e+00> : vector<16x4xf32>
    %187 = tpu.matmul %186, %179, %cst_89 {dimension_numbers = #tpu.dot_dimension_numbers<[1], [0], [0], [1], [0, 0, 1, 1], [], []>} : vector<16x16xf32>, vector<16x4xf32>, vector<16x4xf32> -> vector<16x4xf32>
    %cst_90 = arith.constant 2.000000e+00 : f32
    %188 = vector.broadcast %cst_90 : f32 to vector<16x1xf32>
    %189 = arith.cmpf oge, %0, %188 : vector<16x1xf32>
    %cst_91 = arith.constant 0.000000e+00 : f32
    %190 = vector.broadcast %cst_91 : f32 to vector<16x4xf32>
    %191 = vector.shape_cast %189 : vector<16x1xi1> to vector<16x1xi1>
    %192 = vector.broadcast %191 : vector<16x1xi1> to vector<16x4xi1>
    %193 = arith.select %192, %187, %190 : vector<16x4xi1>, vector<16x4xf32>
    %194 = arith.addf %179, %193 : vector<16x4xf32>
    %195 = tpu.iota {dimensions = array<i32: 0>} : vector<16x16xi32>
    %196 = tpu.iota {dimensions = array<i32: 1>} : vector<16x16xi32>
    %197 = arith.subi %195, %196 : vector<16x16xi32>
    %c4_i32 = arith.constant 4 : i32
    %198 = vector.broadcast %c4_i32 : i32 to vector<16x16xi32>
    %199 = arith.cmpi eq, %197, %198 : vector<16x16xi32>
    %200 = arith.extui %199 : vector<16x16xi1> to vector<16x16xi32>
    %201 = arith.sitofp %200 : vector<16x16xi32> to vector<16x16xf32>
    %cst_92 = arith.constant dense<0.000000e+00> : vector<16x4xf32>
    %202 = tpu.matmul %201, %194, %cst_92 {dimension_numbers = #tpu.dot_dimension_numbers<[1], [0], [0], [1], [0, 0, 1, 1], [], []>} : vector<16x16xf32>, vector<16x4xf32>, vector<16x4xf32> -> vector<16x4xf32>
    %cst_93 = arith.constant 4.000000e+00 : f32
    %203 = vector.broadcast %cst_93 : f32 to vector<16x1xf32>
    %204 = arith.cmpf oge, %0, %203 : vector<16x1xf32>
    %cst_94 = arith.constant 0.000000e+00 : f32
    %205 = vector.broadcast %cst_94 : f32 to vector<16x4xf32>
    %206 = vector.shape_cast %204 : vector<16x1xi1> to vector<16x1xi1>
    %207 = vector.broadcast %206 : vector<16x1xi1> to vector<16x4xi1>
    %208 = arith.select %207, %202, %205 : vector<16x4xi1>, vector<16x4xf32>
    %209 = arith.addf %194, %208 : vector<16x4xf32>
    %210 = arith.subf %131, %209 : vector<16x4xf32>
    %211 = tpu.transpose %210, [1, 0] : vector<16x4xf32> -> vector<4x16xf32>
    %c0_95 = arith.constant 0 : index
    %c0_96 = arith.constant 0 : index
    %c0_97 = arith.constant 0 : index
    %212 = vector.load %arg21[%c0_95, %c0_96, %c0_97] : memref<2x1x64xf32, #tpu.memory_space<vmem>>, vector<1x1x64xf32>
    %213 = vector.shape_cast %212 : vector<1x1x64xf32> to vector<1x64xf32>
    %214 = vector.extract_strided_slice %106 {offsets = [0, 0], sizes = [16, 16], strides = [1, 1]} : vector<16x64xf32> to vector<16x16xf32>
    %215 = vector.extract_strided_slice %109 {offsets = [0, 0], sizes = [16, 16], strides = [1, 1]} : vector<16x64xf32> to vector<16x16xf32>
    %216 = vector.extract_strided_slice %113 {offsets = [0, 0], sizes = [16, 16], strides = [1, 1]} : vector<16x64xf32> to vector<16x16xf32>
    %217 = vector.extract_strided_slice %209 {offsets = [0, 0], sizes = [16, 1], strides = [1, 1]} : vector<16x4xf32> to vector<16x1xf32>
    %218 = vector.extract_strided_slice %211 {offsets = [0, 0], sizes = [1, 16], strides = [1, 1]} : vector<4x16xf32> to vector<1x16xf32>
    %219 = vector.broadcast %217 : vector<16x1xf32> to vector<16x16xf32>
    %220 = vector.broadcast %218 : vector<1x16xf32> to vector<16x16xf32>
    %221 = arith.addf %219, %220 : vector<16x16xf32>
    %222 = arith.addf %221, %1 : vector<16x16xf32>
    %cst_98 = arith.constant dense<0xFF800000> : vector<16xf32>
    %223 = vector.multi_reduction <maximumf>, %222, %cst_98 [1] : vector<16x16xf32> to vector<16xf32>
    %224 = vector.shape_cast %223 : vector<16xf32> to vector<16x1xf32>
    %225 = vector.broadcast %224 : vector<16x1xf32> to vector<16x16xf32>
    %226 = arith.subf %222, %225 : vector<16x16xf32>
    %227 = math.exp %226 : vector<16x16xf32>
    %cst_99 = arith.constant dense<0.000000e+00> : vector<16x16xf32>
    %228 = tpu.matmul %214, %215, %cst_99 {dimension_numbers = #tpu.dot_dimension_numbers<[1], [1], [0], [0], [0, 0, 1, 0], [], []>} : vector<16x16xf32>, vector<16x16xf32>, vector<16x16xf32> -> vector<16x16xf32>
    %cst_100 = arith.constant 2.500000e-01 : f32
    %229 = vector.broadcast %cst_100 : f32 to vector<16x16xf32>
    %230 = arith.mulf %228, %229 : vector<16x16xf32>
    %231 = arith.mulf %230, %227 : vector<16x16xf32>
    %cst_101 = arith.constant dense<0.000000e+00> : vector<16xf32>
    %232 = vector.multi_reduction <add>, %231, %cst_101 [1] : vector<16x16xf32> to vector<16xf32>
    %233 = vector.shape_cast %232 : vector<16xf32> to vector<16x1xf32>
    %234 = math.absf %233 : vector<16x1xf32>
    %cst_102 = arith.constant 0.000000e+00 : f32
    %235 = vector.broadcast %cst_102 : f32 to vector<16x1xf32>
    %236 = arith.subf %235, %224 : vector<16x1xf32>
    %237 = math.exp %236 : vector<16x1xf32>
    %238 = arith.maximumf %234, %237 : vector<16x1xf32>
    %cst_103 = arith.constant 9.99999997E-7 : f32
    %239 = vector.broadcast %cst_103 : f32 to vector<16x1xf32>
    %240 = arith.addf %238, %239 : vector<16x1xf32>
    %241 = vector.broadcast %240 : vector<16x1xf32> to vector<16x16xf32>
    %242 = arith.divf %231, %241 : vector<16x16xf32>
    %cst_104 = arith.constant dense<0.000000e+00> : vector<16x16xf32>
    %243 = tpu.matmul %242, %216, %cst_104 {dimension_numbers = #tpu.dot_dimension_numbers<[1], [0], [0], [1], [0, 0, 1, 1], [], []>} : vector<16x16xf32>, vector<16x16xf32>, vector<16x16xf32> -> vector<16x16xf32>
    %cst_105 = arith.constant dense<0.000000e+00> : vector<16xf32>
    %244 = vector.multi_reduction <add>, %243, %cst_105 [1] : vector<16x16xf32> to vector<16xf32>
    %245 = vector.shape_cast %244 : vector<16xf32> to vector<16x1xf32>
    %cst_106 = arith.constant 1.600000e+01 : f32
    %246 = vector.broadcast %cst_106 : f32 to vector<16x1xf32>
    %247 = arith.divf %245, %246 : vector<16x1xf32>
    %248 = vector.broadcast %247 : vector<16x1xf32> to vector<16x16xf32>
    %249 = arith.subf %243, %248 : vector<16x16xf32>
    %250 = arith.mulf %249, %249 : vector<16x16xf32>
    %cst_107 = arith.constant dense<0.000000e+00> : vector<16xf32>
    %251 = vector.multi_reduction <add>, %250, %cst_107 [1] : vector<16x16xf32> to vector<16xf32>
    %252 = vector.shape_cast %251 : vector<16xf32> to vector<16x1xf32>
    %cst_108 = arith.constant 1.600000e+01 : f32
    %253 = vector.broadcast %cst_108 : f32 to vector<16x1xf32>
    %254 = arith.divf %252, %253 : vector<16x1xf32>
    %255 = vector.broadcast %247 : vector<16x1xf32> to vector<16x16xf32>
    %256 = arith.subf %243, %255 : vector<16x16xf32>
    %cst_109 = arith.constant 9.99999974E-6 : f32
    %257 = vector.broadcast %cst_109 : f32 to vector<16x1xf32>
    %258 = arith.addf %254, %257 : vector<16x1xf32>
    %259 = math.rsqrt %258 : vector<16x1xf32>
    %260 = vector.broadcast %259 : vector<16x1xf32> to vector<16x16xf32>
    %261 = arith.mulf %256, %260 : vector<16x16xf32>
    %262 = vector.extract_strided_slice %213 {offsets = [0, 0], sizes = [1, 16], strides = [1, 1]} : vector<1x64xf32> to vector<1x16xf32>
    %263 = vector.broadcast %262 : vector<1x16xf32> to vector<16x16xf32>
    %264 = arith.mulf %261, %263 : vector<16x16xf32>
    %265 = vector.extract_strided_slice %106 {offsets = [0, 16], sizes = [16, 16], strides = [1, 1]} : vector<16x64xf32> to vector<16x16xf32>
    %266 = vector.extract_strided_slice %109 {offsets = [0, 16], sizes = [16, 16], strides = [1, 1]} : vector<16x64xf32> to vector<16x16xf32>
    %267 = vector.extract_strided_slice %113 {offsets = [0, 16], sizes = [16, 16], strides = [1, 1]} : vector<16x64xf32> to vector<16x16xf32>
    %268 = vector.extract_strided_slice %209 {offsets = [0, 1], sizes = [16, 1], strides = [1, 1]} : vector<16x4xf32> to vector<16x1xf32>
    %269 = vector.extract_strided_slice %211 {offsets = [1, 0], sizes = [1, 16], strides = [1, 1]} : vector<4x16xf32> to vector<1x16xf32>
    %270 = vector.broadcast %268 : vector<16x1xf32> to vector<16x16xf32>
    %271 = vector.broadcast %269 : vector<1x16xf32> to vector<16x16xf32>
    %272 = arith.addf %270, %271 : vector<16x16xf32>
    %273 = arith.addf %272, %1 : vector<16x16xf32>
    %cst_110 = arith.constant dense<0xFF800000> : vector<16xf32>
    %274 = vector.multi_reduction <maximumf>, %273, %cst_110 [1] : vector<16x16xf32> to vector<16xf32>
    %275 = vector.shape_cast %274 : vector<16xf32> to vector<16x1xf32>
    %276 = vector.broadcast %275 : vector<16x1xf32> to vector<16x16xf32>
    %277 = arith.subf %273, %276 : vector<16x16xf32>
    %278 = math.exp %277 : vector<16x16xf32>
    %cst_111 = arith.constant dense<0.000000e+00> : vector<16x16xf32>
    %279 = tpu.matmul %265, %266, %cst_111 {dimension_numbers = #tpu.dot_dimension_numbers<[1], [1], [0], [0], [0, 0, 1, 0], [], []>} : vector<16x16xf32>, vector<16x16xf32>, vector<16x16xf32> -> vector<16x16xf32>
    %cst_112 = arith.constant 2.500000e-01 : f32
    %280 = vector.broadcast %cst_112 : f32 to vector<16x16xf32>
    %281 = arith.mulf %279, %280 : vector<16x16xf32>
    %282 = arith.mulf %281, %278 : vector<16x16xf32>
    %cst_113 = arith.constant dense<0.000000e+00> : vector<16xf32>
    %283 = vector.multi_reduction <add>, %282, %cst_113 [1] : vector<16x16xf32> to vector<16xf32>
    %284 = vector.shape_cast %283 : vector<16xf32> to vector<16x1xf32>
    %285 = math.absf %284 : vector<16x1xf32>
    %cst_114 = arith.constant 0.000000e+00 : f32
    %286 = vector.broadcast %cst_114 : f32 to vector<16x1xf32>
    %287 = arith.subf %286, %275 : vector<16x1xf32>
    %288 = math.exp %287 : vector<16x1xf32>
    %289 = arith.maximumf %285, %288 : vector<16x1xf32>
    %cst_115 = arith.constant 9.99999997E-7 : f32
    %290 = vector.broadcast %cst_115 : f32 to vector<16x1xf32>
    %291 = arith.addf %289, %290 : vector<16x1xf32>
    %292 = vector.broadcast %291 : vector<16x1xf32> to vector<16x16xf32>
    %293 = arith.divf %282, %292 : vector<16x16xf32>
    %cst_116 = arith.constant dense<0.000000e+00> : vector<16x16xf32>
    %294 = tpu.matmul %293, %267, %cst_116 {dimension_numbers = #tpu.dot_dimension_numbers<[1], [0], [0], [1], [0, 0, 1, 1], [], []>} : vector<16x16xf32>, vector<16x16xf32>, vector<16x16xf32> -> vector<16x16xf32>
    %cst_117 = arith.constant dense<0.000000e+00> : vector<16xf32>
    %295 = vector.multi_reduction <add>, %294, %cst_117 [1] : vector<16x16xf32> to vector<16xf32>
    %296 = vector.shape_cast %295 : vector<16xf32> to vector<16x1xf32>
    %cst_118 = arith.constant 1.600000e+01 : f32
    %297 = vector.broadcast %cst_118 : f32 to vector<16x1xf32>
    %298 = arith.divf %296, %297 : vector<16x1xf32>
    %299 = vector.broadcast %298 : vector<16x1xf32> to vector<16x16xf32>
    %300 = arith.subf %294, %299 : vector<16x16xf32>
    %301 = arith.mulf %300, %300 : vector<16x16xf32>
    %cst_119 = arith.constant dense<0.000000e+00> : vector<16xf32>
    %302 = vector.multi_reduction <add>, %301, %cst_119 [1] : vector<16x16xf32> to vector<16xf32>
    %303 = vector.shape_cast %302 : vector<16xf32> to vector<16x1xf32>
    %cst_120 = arith.constant 1.600000e+01 : f32
    %304 = vector.broadcast %cst_120 : f32 to vector<16x1xf32>
    %305 = arith.divf %303, %304 : vector<16x1xf32>
    %306 = vector.broadcast %298 : vector<16x1xf32> to vector<16x16xf32>
    %307 = arith.subf %294, %306 : vector<16x16xf32>
    %cst_121 = arith.constant 9.99999974E-6 : f32
    %308 = vector.broadcast %cst_121 : f32 to vector<16x1xf32>
    %309 = arith.addf %305, %308 : vector<16x1xf32>
    %310 = math.rsqrt %309 : vector<16x1xf32>
    %311 = vector.broadcast %310 : vector<16x1xf32> to vector<16x16xf32>
    %312 = arith.mulf %307, %311 : vector<16x16xf32>
    %313 = vector.extract_strided_slice %213 {offsets = [0, 16], sizes = [1, 16], strides = [1, 1]} : vector<1x64xf32> to vector<1x16xf32>
    %314 = vector.broadcast %313 : vector<1x16xf32> to vector<16x16xf32>
    %315 = arith.mulf %312, %314 : vector<16x16xf32>
    %316 = vector.extract_strided_slice %106 {offsets = [0, 32], sizes = [16, 16], strides = [1, 1]} : vector<16x64xf32> to vector<16x16xf32>
    %317 = vector.extract_strided_slice %109 {offsets = [0, 32], sizes = [16, 16], strides = [1, 1]} : vector<16x64xf32> to vector<16x16xf32>
    %318 = vector.extract_strided_slice %113 {offsets = [0, 32], sizes = [16, 16], strides = [1, 1]} : vector<16x64xf32> to vector<16x16xf32>
    %319 = vector.extract_strided_slice %209 {offsets = [0, 2], sizes = [16, 1], strides = [1, 1]} : vector<16x4xf32> to vector<16x1xf32>
    %320 = vector.extract_strided_slice %211 {offsets = [2, 0], sizes = [1, 16], strides = [1, 1]} : vector<4x16xf32> to vector<1x16xf32>
    %321 = vector.broadcast %319 : vector<16x1xf32> to vector<16x16xf32>
    %322 = vector.broadcast %320 : vector<1x16xf32> to vector<16x16xf32>
    %323 = arith.addf %321, %322 : vector<16x16xf32>
    %324 = arith.addf %323, %1 : vector<16x16xf32>
    %cst_122 = arith.constant dense<0xFF800000> : vector<16xf32>
    %325 = vector.multi_reduction <maximumf>, %324, %cst_122 [1] : vector<16x16xf32> to vector<16xf32>
    %326 = vector.shape_cast %325 : vector<16xf32> to vector<16x1xf32>
    %327 = vector.broadcast %326 : vector<16x1xf32> to vector<16x16xf32>
    %328 = arith.subf %324, %327 : vector<16x16xf32>
    %329 = math.exp %328 : vector<16x16xf32>
    %cst_123 = arith.constant dense<0.000000e+00> : vector<16x16xf32>
    %330 = tpu.matmul %316, %317, %cst_123 {dimension_numbers = #tpu.dot_dimension_numbers<[1], [1], [0], [0], [0, 0, 1, 0], [], []>} : vector<16x16xf32>, vector<16x16xf32>, vector<16x16xf32> -> vector<16x16xf32>
    %cst_124 = arith.constant 2.500000e-01 : f32
    %331 = vector.broadcast %cst_124 : f32 to vector<16x16xf32>
    %332 = arith.mulf %330, %331 : vector<16x16xf32>
    %333 = arith.mulf %332, %329 : vector<16x16xf32>
    %cst_125 = arith.constant dense<0.000000e+00> : vector<16xf32>
    %334 = vector.multi_reduction <add>, %333, %cst_125 [1] : vector<16x16xf32> to vector<16xf32>
    %335 = vector.shape_cast %334 : vector<16xf32> to vector<16x1xf32>
    %336 = math.absf %335 : vector<16x1xf32>
    %cst_126 = arith.constant 0.000000e+00 : f32
    %337 = vector.broadcast %cst_126 : f32 to vector<16x1xf32>
    %338 = arith.subf %337, %326 : vector<16x1xf32>
    %339 = math.exp %338 : vector<16x1xf32>
    %340 = arith.maximumf %336, %339 : vector<16x1xf32>
    %cst_127 = arith.constant 9.99999997E-7 : f32
    %341 = vector.broadcast %cst_127 : f32 to vector<16x1xf32>
    %342 = arith.addf %340, %341 : vector<16x1xf32>
    %343 = vector.broadcast %342 : vector<16x1xf32> to vector<16x16xf32>
    %344 = arith.divf %333, %343 : vector<16x16xf32>
    %cst_128 = arith.constant dense<0.000000e+00> : vector<16x16xf32>
    %345 = tpu.matmul %344, %318, %cst_128 {dimension_numbers = #tpu.dot_dimension_numbers<[1], [0], [0], [1], [0, 0, 1, 1], [], []>} : vector<16x16xf32>, vector<16x16xf32>, vector<16x16xf32> -> vector<16x16xf32>
    %cst_129 = arith.constant dense<0.000000e+00> : vector<16xf32>
    %346 = vector.multi_reduction <add>, %345, %cst_129 [1] : vector<16x16xf32> to vector<16xf32>
    %347 = vector.shape_cast %346 : vector<16xf32> to vector<16x1xf32>
    %cst_130 = arith.constant 1.600000e+01 : f32
    %348 = vector.broadcast %cst_130 : f32 to vector<16x1xf32>
    %349 = arith.divf %347, %348 : vector<16x1xf32>
    %350 = vector.broadcast %349 : vector<16x1xf32> to vector<16x16xf32>
    %351 = arith.subf %345, %350 : vector<16x16xf32>
    %352 = arith.mulf %351, %351 : vector<16x16xf32>
    %cst_131 = arith.constant dense<0.000000e+00> : vector<16xf32>
    %353 = vector.multi_reduction <add>, %352, %cst_131 [1] : vector<16x16xf32> to vector<16xf32>
    %354 = vector.shape_cast %353 : vector<16xf32> to vector<16x1xf32>
    %cst_132 = arith.constant 1.600000e+01 : f32
    %355 = vector.broadcast %cst_132 : f32 to vector<16x1xf32>
    %356 = arith.divf %354, %355 : vector<16x1xf32>
    %357 = vector.broadcast %349 : vector<16x1xf32> to vector<16x16xf32>
    %358 = arith.subf %345, %357 : vector<16x16xf32>
    %cst_133 = arith.constant 9.99999974E-6 : f32
    %359 = vector.broadcast %cst_133 : f32 to vector<16x1xf32>
    %360 = arith.addf %356, %359 : vector<16x1xf32>
    %361 = math.rsqrt %360 : vector<16x1xf32>
    %362 = vector.broadcast %361 : vector<16x1xf32> to vector<16x16xf32>
    %363 = arith.mulf %358, %362 : vector<16x16xf32>
    %364 = vector.extract_strided_slice %213 {offsets = [0, 32], sizes = [1, 16], strides = [1, 1]} : vector<1x64xf32> to vector<1x16xf32>
    %365 = vector.broadcast %364 : vector<1x16xf32> to vector<16x16xf32>
    %366 = arith.mulf %363, %365 : vector<16x16xf32>
    %367 = vector.extract_strided_slice %106 {offsets = [0, 48], sizes = [16, 16], strides = [1, 1]} : vector<16x64xf32> to vector<16x16xf32>
    %368 = vector.extract_strided_slice %109 {offsets = [0, 48], sizes = [16, 16], strides = [1, 1]} : vector<16x64xf32> to vector<16x16xf32>
    %369 = vector.extract_strided_slice %113 {offsets = [0, 48], sizes = [16, 16], strides = [1, 1]} : vector<16x64xf32> to vector<16x16xf32>
    %370 = vector.extract_strided_slice %209 {offsets = [0, 3], sizes = [16, 1], strides = [1, 1]} : vector<16x4xf32> to vector<16x1xf32>
    %371 = vector.extract_strided_slice %211 {offsets = [3, 0], sizes = [1, 16], strides = [1, 1]} : vector<4x16xf32> to vector<1x16xf32>
    %372 = vector.broadcast %370 : vector<16x1xf32> to vector<16x16xf32>
    %373 = vector.broadcast %371 : vector<1x16xf32> to vector<16x16xf32>
    %374 = arith.addf %372, %373 : vector<16x16xf32>
    %375 = arith.addf %374, %1 : vector<16x16xf32>
    %cst_134 = arith.constant dense<0xFF800000> : vector<16xf32>
    %376 = vector.multi_reduction <maximumf>, %375, %cst_134 [1] : vector<16x16xf32> to vector<16xf32>
    %377 = vector.shape_cast %376 : vector<16xf32> to vector<16x1xf32>
    %378 = vector.broadcast %377 : vector<16x1xf32> to vector<16x16xf32>
    %379 = arith.subf %375, %378 : vector<16x16xf32>
    %380 = math.exp %379 : vector<16x16xf32>
    %cst_135 = arith.constant dense<0.000000e+00> : vector<16x16xf32>
    %381 = tpu.matmul %367, %368, %cst_135 {dimension_numbers = #tpu.dot_dimension_numbers<[1], [1], [0], [0], [0, 0, 1, 0], [], []>} : vector<16x16xf32>, vector<16x16xf32>, vector<16x16xf32> -> vector<16x16xf32>
    %cst_136 = arith.constant 2.500000e-01 : f32
    %382 = vector.broadcast %cst_136 : f32 to vector<16x16xf32>
    %383 = arith.mulf %381, %382 : vector<16x16xf32>
    %384 = arith.mulf %383, %380 : vector<16x16xf32>
    %cst_137 = arith.constant dense<0.000000e+00> : vector<16xf32>
    %385 = vector.multi_reduction <add>, %384, %cst_137 [1] : vector<16x16xf32> to vector<16xf32>
    %386 = vector.shape_cast %385 : vector<16xf32> to vector<16x1xf32>
    %387 = math.absf %386 : vector<16x1xf32>
    %cst_138 = arith.constant 0.000000e+00 : f32
    %388 = vector.broadcast %cst_138 : f32 to vector<16x1xf32>
    %389 = arith.subf %388, %377 : vector<16x1xf32>
    %390 = math.exp %389 : vector<16x1xf32>
    %391 = arith.maximumf %387, %390 : vector<16x1xf32>
    %cst_139 = arith.constant 9.99999997E-7 : f32
    %392 = vector.broadcast %cst_139 : f32 to vector<16x1xf32>
    %393 = arith.addf %391, %392 : vector<16x1xf32>
    %394 = vector.broadcast %393 : vector<16x1xf32> to vector<16x16xf32>
    %395 = arith.divf %384, %394 : vector<16x16xf32>
    %cst_140 = arith.constant dense<0.000000e+00> : vector<16x16xf32>
    %396 = tpu.matmul %395, %369, %cst_140 {dimension_numbers = #tpu.dot_dimension_numbers<[1], [0], [0], [1], [0, 0, 1, 1], [], []>} : vector<16x16xf32>, vector<16x16xf32>, vector<16x16xf32> -> vector<16x16xf32>
    %cst_141 = arith.constant dense<0.000000e+00> : vector<16xf32>
    %397 = vector.multi_reduction <add>, %396, %cst_141 [1] : vector<16x16xf32> to vector<16xf32>
    %398 = vector.shape_cast %397 : vector<16xf32> to vector<16x1xf32>
    %cst_142 = arith.constant 1.600000e+01 : f32
    %399 = vector.broadcast %cst_142 : f32 to vector<16x1xf32>
    %400 = arith.divf %398, %399 : vector<16x1xf32>
    %401 = vector.broadcast %400 : vector<16x1xf32> to vector<16x16xf32>
    %402 = arith.subf %396, %401 : vector<16x16xf32>
    %403 = arith.mulf %402, %402 : vector<16x16xf32>
    %cst_143 = arith.constant dense<0.000000e+00> : vector<16xf32>
    %404 = vector.multi_reduction <add>, %403, %cst_143 [1] : vector<16x16xf32> to vector<16xf32>
    %405 = vector.shape_cast %404 : vector<16xf32> to vector<16x1xf32>
    %cst_144 = arith.constant 1.600000e+01 : f32
    %406 = vector.broadcast %cst_144 : f32 to vector<16x1xf32>
    %407 = arith.divf %405, %406 : vector<16x1xf32>
    %408 = vector.broadcast %400 : vector<16x1xf32> to vector<16x16xf32>
    %409 = arith.subf %396, %408 : vector<16x16xf32>
    %cst_145 = arith.constant 9.99999974E-6 : f32
    %410 = vector.broadcast %cst_145 : f32 to vector<16x1xf32>
    %411 = arith.addf %407, %410 : vector<16x1xf32>
    %412 = math.rsqrt %411 : vector<16x1xf32>
    %413 = vector.broadcast %412 : vector<16x1xf32> to vector<16x16xf32>
    %414 = arith.mulf %409, %413 : vector<16x16xf32>
    %415 = vector.extract_strided_slice %213 {offsets = [0, 48], sizes = [1, 16], strides = [1, 1]} : vector<1x64xf32> to vector<1x16xf32>
    %416 = vector.broadcast %415 : vector<1x16xf32> to vector<16x16xf32>
    %417 = arith.mulf %414, %416 : vector<16x16xf32>
    %418 = tpu.concatenate %264, %315, %366, %417 in 1 : vector<16x16xf32>, vector<16x16xf32>, vector<16x16xf32>, vector<16x16xf32> -> vector<16x64xf32>
    %c0_146 = arith.constant 0 : index
    %c0_147 = arith.constant 0 : index
    %c0_148 = arith.constant 0 : index
    %419 = vector.load %arg20[%c0_146, %c0_147, %c0_148] : memref<2x1x64xf32, #tpu.memory_space<vmem>>, vector<1x1x64xf32>
    %420 = vector.shape_cast %419 : vector<1x1x64xf32> to vector<1x64xf32>
    %421 = vector.broadcast %420 : vector<1x64xf32> to vector<16x64xf32>
    %422 = arith.mulf %421, %102 : vector<16x64xf32>
    %423 = arith.addf %418, %422 : vector<16x64xf32>
    %424 = arith.negf %33 : vector<16x64xf32>
    %425 = math.exp %424 : vector<16x64xf32>
    %cst_149 = arith.constant 1.000000e+00 : f32
    %426 = vector.broadcast %cst_149 : f32 to vector<16x64xf32>
    %427 = arith.addf %426, %425 : vector<16x64xf32>
    %428 = arith.divf %426, %427 : vector<16x64xf32>
    %429 = arith.mulf %33, %428 : vector<16x64xf32>
    %430 = arith.mulf %423, %429 : vector<16x64xf32>
    %431 = arith.truncf %430 : vector<16x64xf32> to vector<16x64xbf16>
    %c0_150 = arith.constant 0 : index
    %c0_151 = arith.constant 0 : index
    %c0_152 = arith.constant 0 : index
    %432 = vector.load %arg22[%c0_150, %c0_151, %c0_152] : memref<2x64x32xbf16, #tpu.memory_space<vmem>>, vector<1x64x32xbf16>
    %433 = vector.shape_cast %432 : vector<1x64x32xbf16> to vector<64x32xbf16>
    %cst_153 = arith.constant dense<0.000000e+00> : vector<16x32xf32>
    %434 = tpu.matmul %431, %433, %cst_153 {dimension_numbers = #tpu.dot_dimension_numbers<[1], [0], [0], [1], [0, 0, 1, 1], [], []>} : vector<16x64xbf16>, vector<64x32xbf16>, vector<16x32xf32> -> vector<16x32xf32>
    %435 = arith.addf %4, %434 : vector<16x32xf32>
    %cst_154 = arith.constant dense<0.000000e+00> : vector<16xf32>
    %436 = vector.multi_reduction <add>, %435, %cst_154 [1] : vector<16x32xf32> to vector<16xf32>
    %437 = vector.shape_cast %436 : vector<16xf32> to vector<16x1xf32>
    %cst_155 = arith.constant 3.200000e+01 : f32
    %438 = vector.broadcast %cst_155 : f32 to vector<16x1xf32>
    %439 = arith.divf %437, %438 : vector<16x1xf32>
    %440 = vector.broadcast %439 : vector<16x1xf32> to vector<16x32xf32>
    %441 = arith.subf %435, %440 : vector<16x32xf32>
    %442 = arith.mulf %441, %441 : vector<16x32xf32>
    %cst_156 = arith.constant dense<0.000000e+00> : vector<16xf32>
    %443 = vector.multi_reduction <add>, %442, %cst_156 [1] : vector<16x32xf32> to vector<16xf32>
    %444 = vector.shape_cast %443 : vector<16xf32> to vector<16x1xf32>
    %cst_157 = arith.constant 3.200000e+01 : f32
    %445 = vector.broadcast %cst_157 : f32 to vector<16x1xf32>
    %446 = arith.divf %444, %445 : vector<16x1xf32>
    %447 = vector.broadcast %439 : vector<16x1xf32> to vector<16x32xf32>
    %448 = arith.subf %435, %447 : vector<16x32xf32>
    %cst_158 = arith.constant 9.99999974E-6 : f32
    %449 = vector.broadcast %cst_158 : f32 to vector<16x1xf32>
    %450 = arith.addf %446, %449 : vector<16x1xf32>
    %451 = math.rsqrt %450 : vector<16x1xf32>
    %452 = vector.broadcast %451 : vector<16x1xf32> to vector<16x32xf32>
    %453 = arith.mulf %448, %452 : vector<16x32xf32>
    %c1 = arith.constant 1 : index
    %c0_159 = arith.constant 0 : index
    %c0_160 = arith.constant 0 : index
    %454 = vector.load %arg4[%c1, %c0_159, %c0_160] : memref<2x1x32xf32, #tpu.memory_space<vmem>>, vector<1x1x32xf32>
    %455 = vector.shape_cast %454 : vector<1x1x32xf32> to vector<1x32xf32>
    %456 = vector.broadcast %455 : vector<1x32xf32> to vector<16x32xf32>
    %457 = arith.mulf %453, %456 : vector<16x32xf32>
    %458 = arith.truncf %457 : vector<16x32xf32> to vector<16x32xbf16>
    %c1_161 = arith.constant 1 : index
    %c0_162 = arith.constant 0 : index
    %c0_163 = arith.constant 0 : index
    %459 = vector.load %arg5[%c1_161, %c0_162, %c0_163] : memref<2x32x64xbf16, #tpu.memory_space<vmem>>, vector<1x32x64xbf16>
    %460 = vector.shape_cast %459 : vector<1x32x64xbf16> to vector<32x64xbf16>
    %cst_164 = arith.constant dense<0.000000e+00> : vector<16x64xf32>
    %461 = tpu.matmul %458, %460, %cst_164 {dimension_numbers = #tpu.dot_dimension_numbers<[1], [0], [0], [1], [0, 0, 1, 1], [], []>} : vector<16x32xbf16>, vector<32x64xbf16>, vector<16x64xf32> -> vector<16x64xf32>
    %c1_165 = arith.constant 1 : index
    %c0_166 = arith.constant 0 : index
    %c0_167 = arith.constant 0 : index
    %462 = vector.load %arg6[%c1_165, %c0_166, %c0_167] : memref<2x32x64xbf16, #tpu.memory_space<vmem>>, vector<1x32x64xbf16>
    %463 = vector.shape_cast %462 : vector<1x32x64xbf16> to vector<32x64xbf16>
    %cst_168 = arith.constant dense<0.000000e+00> : vector<16x64xf32>
    %464 = tpu.matmul %458, %463, %cst_168 {dimension_numbers = #tpu.dot_dimension_numbers<[1], [0], [0], [1], [0, 0, 1, 1], [], []>} : vector<16x32xbf16>, vector<32x64xbf16>, vector<16x64xf32> -> vector<16x64xf32>
    %c1_169 = arith.constant 1 : index
    %c0_170 = arith.constant 0 : index
    %c0_171 = arith.constant 0 : index
    %465 = vector.load %arg7[%c1_169, %c0_170, %c0_171] : memref<2x4x64xf32, #tpu.memory_space<vmem>>, vector<1x4x64xf32>
    %466 = vector.shape_cast %465 : vector<1x4x64xf32> to vector<4x64xf32>
    %467 = vector.extract_strided_slice %466 {offsets = [3, 0], sizes = [1, 64], strides = [1, 1]} : vector<4x64xf32> to vector<1x64xf32>
    %468 = vector.broadcast %467 : vector<1x64xf32> to vector<16x64xf32>
    %469 = arith.mulf %461, %468 : vector<16x64xf32>
    %470 = tpu.iota {dimensions = array<i32: 0>} : vector<16x16xi32>
    %471 = tpu.iota {dimensions = array<i32: 1>} : vector<16x16xi32>
    %472 = arith.subi %470, %471 : vector<16x16xi32>
    %c3_i32_172 = arith.constant 3 : i32
    %473 = vector.broadcast %c3_i32_172 : i32 to vector<16x16xi32>
    %474 = arith.cmpi eq, %472, %473 : vector<16x16xi32>
    %475 = arith.extui %474 : vector<16x16xi1> to vector<16x16xi32>
    %476 = arith.sitofp %475 : vector<16x16xi32> to vector<16x16xf32>
    %cst_173 = arith.constant dense<0.000000e+00> : vector<16x64xf32>
    %477 = tpu.matmul %476, %461, %cst_173 {dimension_numbers = #tpu.dot_dimension_numbers<[1], [0], [0], [1], [0, 0, 1, 1], [], []>} : vector<16x16xf32>, vector<16x64xf32>, vector<16x64xf32> -> vector<16x64xf32>
    %cst_174 = arith.constant 3.000000e+00 : f32
    %478 = vector.broadcast %cst_174 : f32 to vector<16x1xf32>
    %479 = arith.cmpf oge, %0, %478 : vector<16x1xf32>
    %cst_175 = arith.constant 0.000000e+00 : f32
    %480 = vector.broadcast %cst_175 : f32 to vector<16x64xf32>
    %481 = vector.shape_cast %479 : vector<16x1xi1> to vector<16x1xi1>
    %482 = vector.broadcast %481 : vector<16x1xi1> to vector<16x64xi1>
    %483 = arith.select %482, %477, %480 : vector<16x64xi1>, vector<16x64xf32>
    %484 = vector.extract_strided_slice %466 {offsets = [0, 0], sizes = [1, 64], strides = [1, 1]} : vector<4x64xf32> to vector<1x64xf32>
    %485 = vector.broadcast %484 : vector<1x64xf32> to vector<16x64xf32>
    %486 = arith.mulf %483, %485 : vector<16x64xf32>
    %487 = arith.addf %469, %486 : vector<16x64xf32>
    %488 = tpu.iota {dimensions = array<i32: 0>} : vector<16x16xi32>
    %489 = tpu.iota {dimensions = array<i32: 1>} : vector<16x16xi32>
    %490 = arith.subi %488, %489 : vector<16x16xi32>
    %c2_i32_176 = arith.constant 2 : i32
    %491 = vector.broadcast %c2_i32_176 : i32 to vector<16x16xi32>
    %492 = arith.cmpi eq, %490, %491 : vector<16x16xi32>
    %493 = arith.extui %492 : vector<16x16xi1> to vector<16x16xi32>
    %494 = arith.sitofp %493 : vector<16x16xi32> to vector<16x16xf32>
    %cst_177 = arith.constant dense<0.000000e+00> : vector<16x64xf32>
    %495 = tpu.matmul %494, %461, %cst_177 {dimension_numbers = #tpu.dot_dimension_numbers<[1], [0], [0], [1], [0, 0, 1, 1], [], []>} : vector<16x16xf32>, vector<16x64xf32>, vector<16x64xf32> -> vector<16x64xf32>
    %cst_178 = arith.constant 2.000000e+00 : f32
    %496 = vector.broadcast %cst_178 : f32 to vector<16x1xf32>
    %497 = arith.cmpf oge, %0, %496 : vector<16x1xf32>
    %cst_179 = arith.constant 0.000000e+00 : f32
    %498 = vector.broadcast %cst_179 : f32 to vector<16x64xf32>
    %499 = vector.shape_cast %497 : vector<16x1xi1> to vector<16x1xi1>
    %500 = vector.broadcast %499 : vector<16x1xi1> to vector<16x64xi1>
    %501 = arith.select %500, %495, %498 : vector<16x64xi1>, vector<16x64xf32>
    %502 = vector.extract_strided_slice %466 {offsets = [1, 0], sizes = [1, 64], strides = [1, 1]} : vector<4x64xf32> to vector<1x64xf32>
    %503 = vector.broadcast %502 : vector<1x64xf32> to vector<16x64xf32>
    %504 = arith.mulf %501, %503 : vector<16x64xf32>
    %505 = arith.addf %487, %504 : vector<16x64xf32>
    %506 = tpu.iota {dimensions = array<i32: 0>} : vector<16x16xi32>
    %507 = tpu.iota {dimensions = array<i32: 1>} : vector<16x16xi32>
    %508 = arith.subi %506, %507 : vector<16x16xi32>
    %c1_i32_180 = arith.constant 1 : i32
    %509 = vector.broadcast %c1_i32_180 : i32 to vector<16x16xi32>
    %510 = arith.cmpi eq, %508, %509 : vector<16x16xi32>
    %511 = arith.extui %510 : vector<16x16xi1> to vector<16x16xi32>
    %512 = arith.sitofp %511 : vector<16x16xi32> to vector<16x16xf32>
    %cst_181 = arith.constant dense<0.000000e+00> : vector<16x64xf32>
    %513 = tpu.matmul %512, %461, %cst_181 {dimension_numbers = #tpu.dot_dimension_numbers<[1], [0], [0], [1], [0, 0, 1, 1], [], []>} : vector<16x16xf32>, vector<16x64xf32>, vector<16x64xf32> -> vector<16x64xf32>
    %cst_182 = arith.constant 1.000000e+00 : f32
    %514 = vector.broadcast %cst_182 : f32 to vector<16x1xf32>
    %515 = arith.cmpf oge, %0, %514 : vector<16x1xf32>
    %cst_183 = arith.constant 0.000000e+00 : f32
    %516 = vector.broadcast %cst_183 : f32 to vector<16x64xf32>
    %517 = vector.shape_cast %515 : vector<16x1xi1> to vector<16x1xi1>
    %518 = vector.broadcast %517 : vector<16x1xi1> to vector<16x64xi1>
    %519 = arith.select %518, %513, %516 : vector<16x64xi1>, vector<16x64xf32>
    %520 = vector.extract_strided_slice %466 {offsets = [2, 0], sizes = [1, 64], strides = [1, 1]} : vector<4x64xf32> to vector<1x64xf32>
    %521 = vector.broadcast %520 : vector<1x64xf32> to vector<16x64xf32>
    %522 = arith.mulf %519, %521 : vector<16x64xf32>
    %523 = arith.addf %505, %522 : vector<16x64xf32>
    %c1_184 = arith.constant 1 : index
    %c0_185 = arith.constant 0 : index
    %c0_186 = arith.constant 0 : index
    %524 = vector.load %arg8[%c1_184, %c0_185, %c0_186] : memref<2x1x64xf32, #tpu.memory_space<vmem>>, vector<1x1x64xf32>
    %525 = vector.shape_cast %524 : vector<1x1x64xf32> to vector<1x64xf32>
    %526 = vector.broadcast %525 : vector<1x64xf32> to vector<16x64xf32>
    %527 = arith.addf %523, %526 : vector<16x64xf32>
    %528 = arith.negf %527 : vector<16x64xf32>
    %529 = math.exp %528 : vector<16x64xf32>
    %cst_187 = arith.constant 1.000000e+00 : f32
    %530 = vector.broadcast %cst_187 : f32 to vector<16x64xf32>
    %531 = arith.addf %530, %529 : vector<16x64xf32>
    %532 = arith.divf %530, %531 : vector<16x64xf32>
    %533 = arith.mulf %527, %532 : vector<16x64xf32>
    %534 = arith.truncf %533 : vector<16x64xf32> to vector<16x64xbf16>
    %c1_188 = arith.constant 1 : index
    %c0_189 = arith.constant 0 : index
    %c0_190 = arith.constant 0 : index
    %535 = vector.load %arg9[%c1_188, %c0_189, %c0_190] : memref<2x64x64xbf16, #tpu.memory_space<vmem>>, vector<1x64x64xbf16>
    %536 = vector.shape_cast %535 : vector<1x64x64xbf16> to vector<64x64xbf16>
    %cst_191 = arith.constant dense<0.000000e+00> : vector<16x64xf32>
    %537 = tpu.matmul %534, %536, %cst_191 {dimension_numbers = #tpu.dot_dimension_numbers<[1], [0], [0], [1], [0, 0, 1, 1], [], []>} : vector<16x64xbf16>, vector<64x64xbf16>, vector<16x64xf32> -> vector<16x64xf32>
    %c1_192 = arith.constant 1 : index
    %c0_193 = arith.constant 0 : index
    %c0_194 = arith.constant 0 : index
    %538 = vector.load %arg10[%c1_192, %c0_193, %c0_194] : memref<2x64x64xbf16, #tpu.memory_space<vmem>>, vector<1x64x64xbf16>
    %539 = vector.shape_cast %538 : vector<1x64x64xbf16> to vector<64x64xbf16>
    %cst_195 = arith.constant dense<0.000000e+00> : vector<16x64xf32>
    %540 = tpu.matmul %534, %539, %cst_195 {dimension_numbers = #tpu.dot_dimension_numbers<[1], [0], [0], [1], [0, 0, 1, 1], [], []>} : vector<16x64xbf16>, vector<64x64xbf16>, vector<16x64xf32> -> vector<16x64xf32>
    %541 = arith.truncf %461 : vector<16x64xf32> to vector<16x64xbf16>
    %c1_196 = arith.constant 1 : index
    %c0_197 = arith.constant 0 : index
    %c0_198 = arith.constant 0 : index
    %542 = vector.load %arg11[%c1_196, %c0_197, %c0_198] : memref<2x64x64xbf16, #tpu.memory_space<vmem>>, vector<1x64x64xbf16>
    %543 = vector.shape_cast %542 : vector<1x64x64xbf16> to vector<64x64xbf16>
    %cst_199 = arith.constant dense<0.000000e+00> : vector<16x64xf32>
    %544 = tpu.matmul %541, %543, %cst_199 {dimension_numbers = #tpu.dot_dimension_numbers<[1], [0], [0], [1], [0, 0, 1, 1], [], []>} : vector<16x64xbf16>, vector<64x64xbf16>, vector<16x64xf32> -> vector<16x64xf32>
    %545 = arith.truncf %537 : vector<16x64xf32> to vector<16x64xbf16>
    %546 = arith.truncf %540 : vector<16x64xf32> to vector<16x64xbf16>
    %547 = arith.truncf %544 : vector<16x64xf32> to vector<16x64xbf16>
    %c1_200 = arith.constant 1 : index
    %c0_201 = arith.constant 0 : index
    %c0_202 = arith.constant 0 : index
    %548 = vector.load %arg12[%c1_200, %c0_201, %c0_202] : memref<2x64x4xbf16, #tpu.memory_space<vmem>>, vector<1x64x4xbf16>
    %549 = vector.shape_cast %548 : vector<1x64x4xbf16> to vector<64x4xbf16>
    %cst_203 = arith.constant dense<0.000000e+00> : vector<16x4xf32>
    %550 = tpu.matmul %545, %549, %cst_203 {dimension_numbers = #tpu.dot_dimension_numbers<[1], [0], [0], [1], [0, 0, 1, 1], [], []>} : vector<16x64xbf16>, vector<64x4xbf16>, vector<16x4xf32> -> vector<16x4xf32>
    %c1_204 = arith.constant 1 : index
    %c0_205 = arith.constant 0 : index
    %c0_206 = arith.constant 0 : index
    %551 = vector.load %arg13[%c1_204, %c0_205, %c0_206] : memref<2x64x4xbf16, #tpu.memory_space<vmem>>, vector<1x64x4xbf16>
    %552 = vector.shape_cast %551 : vector<1x64x4xbf16> to vector<64x4xbf16>
    %cst_207 = arith.constant dense<0.000000e+00> : vector<16x4xf32>
    %553 = tpu.matmul %546, %552, %cst_207 {dimension_numbers = #tpu.dot_dimension_numbers<[1], [0], [0], [1], [0, 0, 1, 1], [], []>} : vector<16x64xbf16>, vector<64x4xbf16>, vector<16x4xf32> -> vector<16x4xf32>
    %554 = arith.addf %550, %553 : vector<16x4xf32>
    %c1_208 = arith.constant 1 : index
    %c0_209 = arith.constant 0 : index
    %c0_210 = arith.constant 0 : index
    %555 = vector.load %arg14[%c1_208, %c0_209, %c0_210] : memref<2x64x4xbf16, #tpu.memory_space<vmem>>, vector<1x64x4xbf16>
    %556 = vector.shape_cast %555 : vector<1x64x4xbf16> to vector<64x4xbf16>
    %cst_211 = arith.constant dense<0.000000e+00> : vector<16x4xf32>
    %557 = tpu.matmul %547, %556, %cst_211 {dimension_numbers = #tpu.dot_dimension_numbers<[1], [0], [0], [1], [0, 0, 1, 1], [], []>} : vector<16x64xbf16>, vector<64x4xbf16>, vector<16x4xf32> -> vector<16x4xf32>
    %558 = arith.addf %554, %557 : vector<16x4xf32>
    %c1_212 = arith.constant 1 : index
    %c0_213 = arith.constant 0 : index
    %c0_214 = arith.constant 0 : index
    %559 = vector.load %arg15[%c1_212, %c0_213, %c0_214] : memref<2x1x4xf32, #tpu.memory_space<vmem>>, vector<1x1x4xf32>
    %560 = vector.shape_cast %559 : vector<1x1x4xf32> to vector<1x4xf32>
    %561 = vector.broadcast %560 : vector<1x4xf32> to vector<16x4xf32>
    %562 = arith.addf %558, %561 : vector<16x4xf32>
    %c1_215 = arith.constant 1 : index
    %c0_216 = arith.constant 0 : index
    %c0_217 = arith.constant 0 : index
    %563 = vector.load %arg16[%c1_215, %c0_216, %c0_217] : memref<2x64x4xbf16, #tpu.memory_space<vmem>>, vector<1x64x4xbf16>
    %564 = vector.shape_cast %563 : vector<1x64x4xbf16> to vector<64x4xbf16>
    %cst_218 = arith.constant dense<0.000000e+00> : vector<16x4xf32>
    %565 = tpu.matmul %545, %564, %cst_218 {dimension_numbers = #tpu.dot_dimension_numbers<[1], [0], [0], [1], [0, 0, 1, 1], [], []>} : vector<16x64xbf16>, vector<64x4xbf16>, vector<16x4xf32> -> vector<16x4xf32>
    %c1_219 = arith.constant 1 : index
    %c0_220 = arith.constant 0 : index
    %c0_221 = arith.constant 0 : index
    %566 = vector.load %arg17[%c1_219, %c0_220, %c0_221] : memref<2x64x4xbf16, #tpu.memory_space<vmem>>, vector<1x64x4xbf16>
    %567 = vector.shape_cast %566 : vector<1x64x4xbf16> to vector<64x4xbf16>
    %cst_222 = arith.constant dense<0.000000e+00> : vector<16x4xf32>
    %568 = tpu.matmul %546, %567, %cst_222 {dimension_numbers = #tpu.dot_dimension_numbers<[1], [0], [0], [1], [0, 0, 1, 1], [], []>} : vector<16x64xbf16>, vector<64x4xbf16>, vector<16x4xf32> -> vector<16x4xf32>
    %569 = arith.addf %565, %568 : vector<16x4xf32>
    %c1_223 = arith.constant 1 : index
    %c0_224 = arith.constant 0 : index
    %c0_225 = arith.constant 0 : index
    %570 = vector.load %arg18[%c1_223, %c0_224, %c0_225] : memref<2x64x4xbf16, #tpu.memory_space<vmem>>, vector<1x64x4xbf16>
    %571 = vector.shape_cast %570 : vector<1x64x4xbf16> to vector<64x4xbf16>
    %cst_226 = arith.constant dense<0.000000e+00> : vector<16x4xf32>
    %572 = tpu.matmul %547, %571, %cst_226 {dimension_numbers = #tpu.dot_dimension_numbers<[1], [0], [0], [1], [0, 0, 1, 1], [], []>} : vector<16x64xbf16>, vector<64x4xbf16>, vector<16x4xf32> -> vector<16x4xf32>
    %573 = arith.addf %569, %572 : vector<16x4xf32>
    %c1_227 = arith.constant 1 : index
    %c0_228 = arith.constant 0 : index
    %c0_229 = arith.constant 0 : index
    %574 = vector.load %arg19[%c1_227, %c0_228, %c0_229] : memref<2x1x4xf32, #tpu.memory_space<vmem>>, vector<1x1x4xf32>
    %575 = vector.shape_cast %574 : vector<1x1x4xf32> to vector<1x4xf32>
    %576 = vector.broadcast %575 : vector<1x4xf32> to vector<16x4xf32>
    %577 = arith.addf %573, %576 : vector<16x4xf32>
    %cst_230 = arith.constant 0.000000e+00 : f32
    %578 = vector.broadcast %cst_230 : f32 to vector<16x4xf32>
    %579 = arith.subf %578, %577 : vector<16x4xf32>
    %cst_231 = arith.constant 0.000000e+00 : f32
    %580 = vector.broadcast %cst_231 : f32 to vector<16x4xf32>
    %581 = arith.maximumf %579, %580 : vector<16x4xf32>
    %582 = vector.broadcast %cst_231 : f32 to vector<16x4xf32>
    %583 = arith.subf %579, %582 : vector<16x4xf32>
    %584 = arith.cmpf one, %583, %583 : vector<16x4xf32>
    %585 = vector.broadcast %cst_231 : f32 to vector<16x4xf32>
    %586 = arith.addf %579, %585 : vector<16x4xf32>
    %587 = math.absf %583 : vector<16x4xf32>
    %cst_232 = arith.constant 0.000000e+00 : f32
    %588 = vector.broadcast %cst_232 : f32 to vector<16x4xf32>
    %589 = arith.subf %588, %587 : vector<16x4xf32>
    %590 = math.exp %589 : vector<16x4xf32>
    %591 = math.log1p %590 : vector<16x4xf32>
    %592 = arith.addf %581, %591 : vector<16x4xf32>
    %593 = arith.select %584, %586, %592 : vector<16x4xi1>, vector<16x4xf32>
    %cst_233 = arith.constant 0.000000e+00 : f32
    %594 = vector.broadcast %cst_233 : f32 to vector<16x4xf32>
    %595 = arith.subf %594, %593 : vector<16x4xf32>
    %596 = tpu.iota {dimensions = array<i32: 0>} : vector<16x16xi32>
    %597 = tpu.iota {dimensions = array<i32: 1>} : vector<16x16xi32>
    %598 = arith.subi %596, %597 : vector<16x16xi32>
    %c1_i32_234 = arith.constant 1 : i32
    %599 = vector.broadcast %c1_i32_234 : i32 to vector<16x16xi32>
    %600 = arith.cmpi eq, %598, %599 : vector<16x16xi32>
    %601 = arith.extui %600 : vector<16x16xi1> to vector<16x16xi32>
    %602 = arith.sitofp %601 : vector<16x16xi32> to vector<16x16xf32>
    %cst_235 = arith.constant dense<0.000000e+00> : vector<16x4xf32>
    %603 = tpu.matmul %602, %595, %cst_235 {dimension_numbers = #tpu.dot_dimension_numbers<[1], [0], [0], [1], [0, 0, 1, 1], [], []>} : vector<16x16xf32>, vector<16x4xf32>, vector<16x4xf32> -> vector<16x4xf32>
    %cst_236 = arith.constant 1.000000e+00 : f32
    %604 = vector.broadcast %cst_236 : f32 to vector<16x1xf32>
    %605 = arith.cmpf oge, %0, %604 : vector<16x1xf32>
    %cst_237 = arith.constant 0.000000e+00 : f32
    %606 = vector.broadcast %cst_237 : f32 to vector<16x4xf32>
    %607 = vector.shape_cast %605 : vector<16x1xi1> to vector<16x1xi1>
    %608 = vector.broadcast %607 : vector<16x1xi1> to vector<16x4xi1>
    %609 = arith.select %608, %603, %606 : vector<16x4xi1>, vector<16x4xf32>
    %610 = arith.addf %595, %609 : vector<16x4xf32>
    %611 = tpu.iota {dimensions = array<i32: 0>} : vector<16x16xi32>
    %612 = tpu.iota {dimensions = array<i32: 1>} : vector<16x16xi32>
    %613 = arith.subi %611, %612 : vector<16x16xi32>
    %c2_i32_238 = arith.constant 2 : i32
    %614 = vector.broadcast %c2_i32_238 : i32 to vector<16x16xi32>
    %615 = arith.cmpi eq, %613, %614 : vector<16x16xi32>
    %616 = arith.extui %615 : vector<16x16xi1> to vector<16x16xi32>
    %617 = arith.sitofp %616 : vector<16x16xi32> to vector<16x16xf32>
    %cst_239 = arith.constant dense<0.000000e+00> : vector<16x4xf32>
    %618 = tpu.matmul %617, %610, %cst_239 {dimension_numbers = #tpu.dot_dimension_numbers<[1], [0], [0], [1], [0, 0, 1, 1], [], []>} : vector<16x16xf32>, vector<16x4xf32>, vector<16x4xf32> -> vector<16x4xf32>
    %cst_240 = arith.constant 2.000000e+00 : f32
    %619 = vector.broadcast %cst_240 : f32 to vector<16x1xf32>
    %620 = arith.cmpf oge, %0, %619 : vector<16x1xf32>
    %cst_241 = arith.constant 0.000000e+00 : f32
    %621 = vector.broadcast %cst_241 : f32 to vector<16x4xf32>
    %622 = vector.shape_cast %620 : vector<16x1xi1> to vector<16x1xi1>
    %623 = vector.broadcast %622 : vector<16x1xi1> to vector<16x4xi1>
    %624 = arith.select %623, %618, %621 : vector<16x4xi1>, vector<16x4xf32>
    %625 = arith.addf %610, %624 : vector<16x4xf32>
    %626 = tpu.iota {dimensions = array<i32: 0>} : vector<16x16xi32>
    %627 = tpu.iota {dimensions = array<i32: 1>} : vector<16x16xi32>
    %628 = arith.subi %626, %627 : vector<16x16xi32>
    %c4_i32_242 = arith.constant 4 : i32
    %629 = vector.broadcast %c4_i32_242 : i32 to vector<16x16xi32>
    %630 = arith.cmpi eq, %628, %629 : vector<16x16xi32>
    %631 = arith.extui %630 : vector<16x16xi1> to vector<16x16xi32>
    %632 = arith.sitofp %631 : vector<16x16xi32> to vector<16x16xf32>
    %cst_243 = arith.constant dense<0.000000e+00> : vector<16x4xf32>
    %633 = tpu.matmul %632, %625, %cst_243 {dimension_numbers = #tpu.dot_dimension_numbers<[1], [0], [0], [1], [0, 0, 1, 1], [], []>} : vector<16x16xf32>, vector<16x4xf32>, vector<16x4xf32> -> vector<16x4xf32>
    %cst_244 = arith.constant 4.000000e+00 : f32
    %634 = vector.broadcast %cst_244 : f32 to vector<16x1xf32>
    %635 = arith.cmpf oge, %0, %634 : vector<16x1xf32>
    %cst_245 = arith.constant 0.000000e+00 : f32
    %636 = vector.broadcast %cst_245 : f32 to vector<16x4xf32>
    %637 = vector.shape_cast %635 : vector<16x1xi1> to vector<16x1xi1>
    %638 = vector.broadcast %637 : vector<16x1xi1> to vector<16x4xi1>
    %639 = arith.select %638, %633, %636 : vector<16x4xi1>, vector<16x4xf32>
    %640 = arith.addf %625, %639 : vector<16x4xf32>
    %641 = arith.subf %562, %640 : vector<16x4xf32>
    %642 = tpu.transpose %641, [1, 0] : vector<16x4xf32> -> vector<4x16xf32>
    %c1_246 = arith.constant 1 : index
    %c0_247 = arith.constant 0 : index
    %c0_248 = arith.constant 0 : index
    %643 = vector.load %arg21[%c1_246, %c0_247, %c0_248] : memref<2x1x64xf32, #tpu.memory_space<vmem>>, vector<1x1x64xf32>
    %644 = vector.shape_cast %643 : vector<1x1x64xf32> to vector<1x64xf32>
    %645 = vector.extract_strided_slice %537 {offsets = [0, 0], sizes = [16, 16], strides = [1, 1]} : vector<16x64xf32> to vector<16x16xf32>
    %646 = vector.extract_strided_slice %540 {offsets = [0, 0], sizes = [16, 16], strides = [1, 1]} : vector<16x64xf32> to vector<16x16xf32>
    %647 = vector.extract_strided_slice %544 {offsets = [0, 0], sizes = [16, 16], strides = [1, 1]} : vector<16x64xf32> to vector<16x16xf32>
    %648 = vector.extract_strided_slice %640 {offsets = [0, 0], sizes = [16, 1], strides = [1, 1]} : vector<16x4xf32> to vector<16x1xf32>
    %649 = vector.extract_strided_slice %642 {offsets = [0, 0], sizes = [1, 16], strides = [1, 1]} : vector<4x16xf32> to vector<1x16xf32>
    %650 = vector.broadcast %648 : vector<16x1xf32> to vector<16x16xf32>
    %651 = vector.broadcast %649 : vector<1x16xf32> to vector<16x16xf32>
    %652 = arith.addf %650, %651 : vector<16x16xf32>
    %653 = arith.addf %652, %1 : vector<16x16xf32>
    %cst_249 = arith.constant dense<0xFF800000> : vector<16xf32>
    %654 = vector.multi_reduction <maximumf>, %653, %cst_249 [1] : vector<16x16xf32> to vector<16xf32>
    %655 = vector.shape_cast %654 : vector<16xf32> to vector<16x1xf32>
    %656 = vector.broadcast %655 : vector<16x1xf32> to vector<16x16xf32>
    %657 = arith.subf %653, %656 : vector<16x16xf32>
    %658 = math.exp %657 : vector<16x16xf32>
    %cst_250 = arith.constant dense<0.000000e+00> : vector<16x16xf32>
    %659 = tpu.matmul %645, %646, %cst_250 {dimension_numbers = #tpu.dot_dimension_numbers<[1], [1], [0], [0], [0, 0, 1, 0], [], []>} : vector<16x16xf32>, vector<16x16xf32>, vector<16x16xf32> -> vector<16x16xf32>
    %cst_251 = arith.constant 2.500000e-01 : f32
    %660 = vector.broadcast %cst_251 : f32 to vector<16x16xf32>
    %661 = arith.mulf %659, %660 : vector<16x16xf32>
    %662 = arith.mulf %661, %658 : vector<16x16xf32>
    %cst_252 = arith.constant dense<0.000000e+00> : vector<16xf32>
    %663 = vector.multi_reduction <add>, %662, %cst_252 [1] : vector<16x16xf32> to vector<16xf32>
    %664 = vector.shape_cast %663 : vector<16xf32> to vector<16x1xf32>
    %665 = math.absf %664 : vector<16x1xf32>
    %cst_253 = arith.constant 0.000000e+00 : f32
    %666 = vector.broadcast %cst_253 : f32 to vector<16x1xf32>
    %667 = arith.subf %666, %655 : vector<16x1xf32>
    %668 = math.exp %667 : vector<16x1xf32>
    %669 = arith.maximumf %665, %668 : vector<16x1xf32>
    %cst_254 = arith.constant 9.99999997E-7 : f32
    %670 = vector.broadcast %cst_254 : f32 to vector<16x1xf32>
    %671 = arith.addf %669, %670 : vector<16x1xf32>
    %672 = vector.broadcast %671 : vector<16x1xf32> to vector<16x16xf32>
    %673 = arith.divf %662, %672 : vector<16x16xf32>
    %cst_255 = arith.constant dense<0.000000e+00> : vector<16x16xf32>
    %674 = tpu.matmul %673, %647, %cst_255 {dimension_numbers = #tpu.dot_dimension_numbers<[1], [0], [0], [1], [0, 0, 1, 1], [], []>} : vector<16x16xf32>, vector<16x16xf32>, vector<16x16xf32> -> vector<16x16xf32>
    %cst_256 = arith.constant dense<0.000000e+00> : vector<16xf32>
    %675 = vector.multi_reduction <add>, %674, %cst_256 [1] : vector<16x16xf32> to vector<16xf32>
    %676 = vector.shape_cast %675 : vector<16xf32> to vector<16x1xf32>
    %cst_257 = arith.constant 1.600000e+01 : f32
    %677 = vector.broadcast %cst_257 : f32 to vector<16x1xf32>
    %678 = arith.divf %676, %677 : vector<16x1xf32>
    %679 = vector.broadcast %678 : vector<16x1xf32> to vector<16x16xf32>
    %680 = arith.subf %674, %679 : vector<16x16xf32>
    %681 = arith.mulf %680, %680 : vector<16x16xf32>
    %cst_258 = arith.constant dense<0.000000e+00> : vector<16xf32>
    %682 = vector.multi_reduction <add>, %681, %cst_258 [1] : vector<16x16xf32> to vector<16xf32>
    %683 = vector.shape_cast %682 : vector<16xf32> to vector<16x1xf32>
    %cst_259 = arith.constant 1.600000e+01 : f32
    %684 = vector.broadcast %cst_259 : f32 to vector<16x1xf32>
    %685 = arith.divf %683, %684 : vector<16x1xf32>
    %686 = vector.broadcast %678 : vector<16x1xf32> to vector<16x16xf32>
    %687 = arith.subf %674, %686 : vector<16x16xf32>
    %cst_260 = arith.constant 9.99999974E-6 : f32
    %688 = vector.broadcast %cst_260 : f32 to vector<16x1xf32>
    %689 = arith.addf %685, %688 : vector<16x1xf32>
    %690 = math.rsqrt %689 : vector<16x1xf32>
    %691 = vector.broadcast %690 : vector<16x1xf32> to vector<16x16xf32>
    %692 = arith.mulf %687, %691 : vector<16x16xf32>
    %693 = vector.extract_strided_slice %644 {offsets = [0, 0], sizes = [1, 16], strides = [1, 1]} : vector<1x64xf32> to vector<1x16xf32>
    %694 = vector.broadcast %693 : vector<1x16xf32> to vector<16x16xf32>
    %695 = arith.mulf %692, %694 : vector<16x16xf32>
    %696 = vector.extract_strided_slice %537 {offsets = [0, 16], sizes = [16, 16], strides = [1, 1]} : vector<16x64xf32> to vector<16x16xf32>
    %697 = vector.extract_strided_slice %540 {offsets = [0, 16], sizes = [16, 16], strides = [1, 1]} : vector<16x64xf32> to vector<16x16xf32>
    %698 = vector.extract_strided_slice %544 {offsets = [0, 16], sizes = [16, 16], strides = [1, 1]} : vector<16x64xf32> to vector<16x16xf32>
    %699 = vector.extract_strided_slice %640 {offsets = [0, 1], sizes = [16, 1], strides = [1, 1]} : vector<16x4xf32> to vector<16x1xf32>
    %700 = vector.extract_strided_slice %642 {offsets = [1, 0], sizes = [1, 16], strides = [1, 1]} : vector<4x16xf32> to vector<1x16xf32>
    %701 = vector.broadcast %699 : vector<16x1xf32> to vector<16x16xf32>
    %702 = vector.broadcast %700 : vector<1x16xf32> to vector<16x16xf32>
    %703 = arith.addf %701, %702 : vector<16x16xf32>
    %704 = arith.addf %703, %1 : vector<16x16xf32>
    %cst_261 = arith.constant dense<0xFF800000> : vector<16xf32>
    %705 = vector.multi_reduction <maximumf>, %704, %cst_261 [1] : vector<16x16xf32> to vector<16xf32>
    %706 = vector.shape_cast %705 : vector<16xf32> to vector<16x1xf32>
    %707 = vector.broadcast %706 : vector<16x1xf32> to vector<16x16xf32>
    %708 = arith.subf %704, %707 : vector<16x16xf32>
    %709 = math.exp %708 : vector<16x16xf32>
    %cst_262 = arith.constant dense<0.000000e+00> : vector<16x16xf32>
    %710 = tpu.matmul %696, %697, %cst_262 {dimension_numbers = #tpu.dot_dimension_numbers<[1], [1], [0], [0], [0, 0, 1, 0], [], []>} : vector<16x16xf32>, vector<16x16xf32>, vector<16x16xf32> -> vector<16x16xf32>
    %cst_263 = arith.constant 2.500000e-01 : f32
    %711 = vector.broadcast %cst_263 : f32 to vector<16x16xf32>
    %712 = arith.mulf %710, %711 : vector<16x16xf32>
    %713 = arith.mulf %712, %709 : vector<16x16xf32>
    %cst_264 = arith.constant dense<0.000000e+00> : vector<16xf32>
    %714 = vector.multi_reduction <add>, %713, %cst_264 [1] : vector<16x16xf32> to vector<16xf32>
    %715 = vector.shape_cast %714 : vector<16xf32> to vector<16x1xf32>
    %716 = math.absf %715 : vector<16x1xf32>
    %cst_265 = arith.constant 0.000000e+00 : f32
    %717 = vector.broadcast %cst_265 : f32 to vector<16x1xf32>
    %718 = arith.subf %717, %706 : vector<16x1xf32>
    %719 = math.exp %718 : vector<16x1xf32>
    %720 = arith.maximumf %716, %719 : vector<16x1xf32>
    %cst_266 = arith.constant 9.99999997E-7 : f32
    %721 = vector.broadcast %cst_266 : f32 to vector<16x1xf32>
    %722 = arith.addf %720, %721 : vector<16x1xf32>
    %723 = vector.broadcast %722 : vector<16x1xf32> to vector<16x16xf32>
    %724 = arith.divf %713, %723 : vector<16x16xf32>
    %cst_267 = arith.constant dense<0.000000e+00> : vector<16x16xf32>
    %725 = tpu.matmul %724, %698, %cst_267 {dimension_numbers = #tpu.dot_dimension_numbers<[1], [0], [0], [1], [0, 0, 1, 1], [], []>} : vector<16x16xf32>, vector<16x16xf32>, vector<16x16xf32> -> vector<16x16xf32>
    %cst_268 = arith.constant dense<0.000000e+00> : vector<16xf32>
    %726 = vector.multi_reduction <add>, %725, %cst_268 [1] : vector<16x16xf32> to vector<16xf32>
    %727 = vector.shape_cast %726 : vector<16xf32> to vector<16x1xf32>
    %cst_269 = arith.constant 1.600000e+01 : f32
    %728 = vector.broadcast %cst_269 : f32 to vector<16x1xf32>
    %729 = arith.divf %727, %728 : vector<16x1xf32>
    %730 = vector.broadcast %729 : vector<16x1xf32> to vector<16x16xf32>
    %731 = arith.subf %725, %730 : vector<16x16xf32>
    %732 = arith.mulf %731, %731 : vector<16x16xf32>
    %cst_270 = arith.constant dense<0.000000e+00> : vector<16xf32>
    %733 = vector.multi_reduction <add>, %732, %cst_270 [1] : vector<16x16xf32> to vector<16xf32>
    %734 = vector.shape_cast %733 : vector<16xf32> to vector<16x1xf32>
    %cst_271 = arith.constant 1.600000e+01 : f32
    %735 = vector.broadcast %cst_271 : f32 to vector<16x1xf32>
    %736 = arith.divf %734, %735 : vector<16x1xf32>
    %737 = vector.broadcast %729 : vector<16x1xf32> to vector<16x16xf32>
    %738 = arith.subf %725, %737 : vector<16x16xf32>
    %cst_272 = arith.constant 9.99999974E-6 : f32
    %739 = vector.broadcast %cst_272 : f32 to vector<16x1xf32>
    %740 = arith.addf %736, %739 : vector<16x1xf32>
    %741 = math.rsqrt %740 : vector<16x1xf32>
    %742 = vector.broadcast %741 : vector<16x1xf32> to vector<16x16xf32>
    %743 = arith.mulf %738, %742 : vector<16x16xf32>
    %744 = vector.extract_strided_slice %644 {offsets = [0, 16], sizes = [1, 16], strides = [1, 1]} : vector<1x64xf32> to vector<1x16xf32>
    %745 = vector.broadcast %744 : vector<1x16xf32> to vector<16x16xf32>
    %746 = arith.mulf %743, %745 : vector<16x16xf32>
    %747 = vector.extract_strided_slice %537 {offsets = [0, 32], sizes = [16, 16], strides = [1, 1]} : vector<16x64xf32> to vector<16x16xf32>
    %748 = vector.extract_strided_slice %540 {offsets = [0, 32], sizes = [16, 16], strides = [1, 1]} : vector<16x64xf32> to vector<16x16xf32>
    %749 = vector.extract_strided_slice %544 {offsets = [0, 32], sizes = [16, 16], strides = [1, 1]} : vector<16x64xf32> to vector<16x16xf32>
    %750 = vector.extract_strided_slice %640 {offsets = [0, 2], sizes = [16, 1], strides = [1, 1]} : vector<16x4xf32> to vector<16x1xf32>
    %751 = vector.extract_strided_slice %642 {offsets = [2, 0], sizes = [1, 16], strides = [1, 1]} : vector<4x16xf32> to vector<1x16xf32>
    %752 = vector.broadcast %750 : vector<16x1xf32> to vector<16x16xf32>
    %753 = vector.broadcast %751 : vector<1x16xf32> to vector<16x16xf32>
    %754 = arith.addf %752, %753 : vector<16x16xf32>
    %755 = arith.addf %754, %1 : vector<16x16xf32>
    %cst_273 = arith.constant dense<0xFF800000> : vector<16xf32>
    %756 = vector.multi_reduction <maximumf>, %755, %cst_273 [1] : vector<16x16xf32> to vector<16xf32>
    %757 = vector.shape_cast %756 : vector<16xf32> to vector<16x1xf32>
    %758 = vector.broadcast %757 : vector<16x1xf32> to vector<16x16xf32>
    %759 = arith.subf %755, %758 : vector<16x16xf32>
    %760 = math.exp %759 : vector<16x16xf32>
    %cst_274 = arith.constant dense<0.000000e+00> : vector<16x16xf32>
    %761 = tpu.matmul %747, %748, %cst_274 {dimension_numbers = #tpu.dot_dimension_numbers<[1], [1], [0], [0], [0, 0, 1, 0], [], []>} : vector<16x16xf32>, vector<16x16xf32>, vector<16x16xf32> -> vector<16x16xf32>
    %cst_275 = arith.constant 2.500000e-01 : f32
    %762 = vector.broadcast %cst_275 : f32 to vector<16x16xf32>
    %763 = arith.mulf %761, %762 : vector<16x16xf32>
    %764 = arith.mulf %763, %760 : vector<16x16xf32>
    %cst_276 = arith.constant dense<0.000000e+00> : vector<16xf32>
    %765 = vector.multi_reduction <add>, %764, %cst_276 [1] : vector<16x16xf32> to vector<16xf32>
    %766 = vector.shape_cast %765 : vector<16xf32> to vector<16x1xf32>
    %767 = math.absf %766 : vector<16x1xf32>
    %cst_277 = arith.constant 0.000000e+00 : f32
    %768 = vector.broadcast %cst_277 : f32 to vector<16x1xf32>
    %769 = arith.subf %768, %757 : vector<16x1xf32>
    %770 = math.exp %769 : vector<16x1xf32>
    %771 = arith.maximumf %767, %770 : vector<16x1xf32>
    %cst_278 = arith.constant 9.99999997E-7 : f32
    %772 = vector.broadcast %cst_278 : f32 to vector<16x1xf32>
    %773 = arith.addf %771, %772 : vector<16x1xf32>
    %774 = vector.broadcast %773 : vector<16x1xf32> to vector<16x16xf32>
    %775 = arith.divf %764, %774 : vector<16x16xf32>
    %cst_279 = arith.constant dense<0.000000e+00> : vector<16x16xf32>
    %776 = tpu.matmul %775, %749, %cst_279 {dimension_numbers = #tpu.dot_dimension_numbers<[1], [0], [0], [1], [0, 0, 1, 1], [], []>} : vector<16x16xf32>, vector<16x16xf32>, vector<16x16xf32> -> vector<16x16xf32>
    %cst_280 = arith.constant dense<0.000000e+00> : vector<16xf32>
    %777 = vector.multi_reduction <add>, %776, %cst_280 [1] : vector<16x16xf32> to vector<16xf32>
    %778 = vector.shape_cast %777 : vector<16xf32> to vector<16x1xf32>
    %cst_281 = arith.constant 1.600000e+01 : f32
    %779 = vector.broadcast %cst_281 : f32 to vector<16x1xf32>
    %780 = arith.divf %778, %779 : vector<16x1xf32>
    %781 = vector.broadcast %780 : vector<16x1xf32> to vector<16x16xf32>
    %782 = arith.subf %776, %781 : vector<16x16xf32>
    %783 = arith.mulf %782, %782 : vector<16x16xf32>
    %cst_282 = arith.constant dense<0.000000e+00> : vector<16xf32>
    %784 = vector.multi_reduction <add>, %783, %cst_282 [1] : vector<16x16xf32> to vector<16xf32>
    %785 = vector.shape_cast %784 : vector<16xf32> to vector<16x1xf32>
    %cst_283 = arith.constant 1.600000e+01 : f32
    %786 = vector.broadcast %cst_283 : f32 to vector<16x1xf32>
    %787 = arith.divf %785, %786 : vector<16x1xf32>
    %788 = vector.broadcast %780 : vector<16x1xf32> to vector<16x16xf32>
    %789 = arith.subf %776, %788 : vector<16x16xf32>
    %cst_284 = arith.constant 9.99999974E-6 : f32
    %790 = vector.broadcast %cst_284 : f32 to vector<16x1xf32>
    %791 = arith.addf %787, %790 : vector<16x1xf32>
    %792 = math.rsqrt %791 : vector<16x1xf32>
    %793 = vector.broadcast %792 : vector<16x1xf32> to vector<16x16xf32>
    %794 = arith.mulf %789, %793 : vector<16x16xf32>
    %795 = vector.extract_strided_slice %644 {offsets = [0, 32], sizes = [1, 16], strides = [1, 1]} : vector<1x64xf32> to vector<1x16xf32>
    %796 = vector.broadcast %795 : vector<1x16xf32> to vector<16x16xf32>
    %797 = arith.mulf %794, %796 : vector<16x16xf32>
    %798 = vector.extract_strided_slice %537 {offsets = [0, 48], sizes = [16, 16], strides = [1, 1]} : vector<16x64xf32> to vector<16x16xf32>
    %799 = vector.extract_strided_slice %540 {offsets = [0, 48], sizes = [16, 16], strides = [1, 1]} : vector<16x64xf32> to vector<16x16xf32>
    %800 = vector.extract_strided_slice %544 {offsets = [0, 48], sizes = [16, 16], strides = [1, 1]} : vector<16x64xf32> to vector<16x16xf32>
    %801 = vector.extract_strided_slice %640 {offsets = [0, 3], sizes = [16, 1], strides = [1, 1]} : vector<16x4xf32> to vector<16x1xf32>
    %802 = vector.extract_strided_slice %642 {offsets = [3, 0], sizes = [1, 16], strides = [1, 1]} : vector<4x16xf32> to vector<1x16xf32>
    %803 = vector.broadcast %801 : vector<16x1xf32> to vector<16x16xf32>
    %804 = vector.broadcast %802 : vector<1x16xf32> to vector<16x16xf32>
    %805 = arith.addf %803, %804 : vector<16x16xf32>
    %806 = arith.addf %805, %1 : vector<16x16xf32>
    %cst_285 = arith.constant dense<0xFF800000> : vector<16xf32>
    %807 = vector.multi_reduction <maximumf>, %806, %cst_285 [1] : vector<16x16xf32> to vector<16xf32>
    %808 = vector.shape_cast %807 : vector<16xf32> to vector<16x1xf32>
    %809 = vector.broadcast %808 : vector<16x1xf32> to vector<16x16xf32>
    %810 = arith.subf %806, %809 : vector<16x16xf32>
    %811 = math.exp %810 : vector<16x16xf32>
    %cst_286 = arith.constant dense<0.000000e+00> : vector<16x16xf32>
    %812 = tpu.matmul %798, %799, %cst_286 {dimension_numbers = #tpu.dot_dimension_numbers<[1], [1], [0], [0], [0, 0, 1, 0], [], []>} : vector<16x16xf32>, vector<16x16xf32>, vector<16x16xf32> -> vector<16x16xf32>
    %cst_287 = arith.constant 2.500000e-01 : f32
    %813 = vector.broadcast %cst_287 : f32 to vector<16x16xf32>
    %814 = arith.mulf %812, %813 : vector<16x16xf32>
    %815 = arith.mulf %814, %811 : vector<16x16xf32>
    %cst_288 = arith.constant dense<0.000000e+00> : vector<16xf32>
    %816 = vector.multi_reduction <add>, %815, %cst_288 [1] : vector<16x16xf32> to vector<16xf32>
    %817 = vector.shape_cast %816 : vector<16xf32> to vector<16x1xf32>
    %818 = math.absf %817 : vector<16x1xf32>
    %cst_289 = arith.constant 0.000000e+00 : f32
    %819 = vector.broadcast %cst_289 : f32 to vector<16x1xf32>
    %820 = arith.subf %819, %808 : vector<16x1xf32>
    %821 = math.exp %820 : vector<16x1xf32>
    %822 = arith.maximumf %818, %821 : vector<16x1xf32>
    %cst_290 = arith.constant 9.99999997E-7 : f32
    %823 = vector.broadcast %cst_290 : f32 to vector<16x1xf32>
    %824 = arith.addf %822, %823 : vector<16x1xf32>
    %825 = vector.broadcast %824 : vector<16x1xf32> to vector<16x16xf32>
    %826 = arith.divf %815, %825 : vector<16x16xf32>
    %cst_291 = arith.constant dense<0.000000e+00> : vector<16x16xf32>
    %827 = tpu.matmul %826, %800, %cst_291 {dimension_numbers = #tpu.dot_dimension_numbers<[1], [0], [0], [1], [0, 0, 1, 1], [], []>} : vector<16x16xf32>, vector<16x16xf32>, vector<16x16xf32> -> vector<16x16xf32>
    %cst_292 = arith.constant dense<0.000000e+00> : vector<16xf32>
    %828 = vector.multi_reduction <add>, %827, %cst_292 [1] : vector<16x16xf32> to vector<16xf32>
    %829 = vector.shape_cast %828 : vector<16xf32> to vector<16x1xf32>
    %cst_293 = arith.constant 1.600000e+01 : f32
    %830 = vector.broadcast %cst_293 : f32 to vector<16x1xf32>
    %831 = arith.divf %829, %830 : vector<16x1xf32>
    %832 = vector.broadcast %831 : vector<16x1xf32> to vector<16x16xf32>
    %833 = arith.subf %827, %832 : vector<16x16xf32>
    %834 = arith.mulf %833, %833 : vector<16x16xf32>
    %cst_294 = arith.constant dense<0.000000e+00> : vector<16xf32>
    %835 = vector.multi_reduction <add>, %834, %cst_294 [1] : vector<16x16xf32> to vector<16xf32>
    %836 = vector.shape_cast %835 : vector<16xf32> to vector<16x1xf32>
    %cst_295 = arith.constant 1.600000e+01 : f32
    %837 = vector.broadcast %cst_295 : f32 to vector<16x1xf32>
    %838 = arith.divf %836, %837 : vector<16x1xf32>
    %839 = vector.broadcast %831 : vector<16x1xf32> to vector<16x16xf32>
    %840 = arith.subf %827, %839 : vector<16x16xf32>
    %cst_296 = arith.constant 9.99999974E-6 : f32
    %841 = vector.broadcast %cst_296 : f32 to vector<16x1xf32>
    %842 = arith.addf %838, %841 : vector<16x1xf32>
    %843 = math.rsqrt %842 : vector<16x1xf32>
    %844 = vector.broadcast %843 : vector<16x1xf32> to vector<16x16xf32>
    %845 = arith.mulf %840, %844 : vector<16x16xf32>
    %846 = vector.extract_strided_slice %644 {offsets = [0, 48], sizes = [1, 16], strides = [1, 1]} : vector<1x64xf32> to vector<1x16xf32>
    %847 = vector.broadcast %846 : vector<1x16xf32> to vector<16x16xf32>
    %848 = arith.mulf %845, %847 : vector<16x16xf32>
    %849 = tpu.concatenate %695, %746, %797, %848 in 1 : vector<16x16xf32>, vector<16x16xf32>, vector<16x16xf32>, vector<16x16xf32> -> vector<16x64xf32>
    %c1_297 = arith.constant 1 : index
    %c0_298 = arith.constant 0 : index
    %c0_299 = arith.constant 0 : index
    %850 = vector.load %arg20[%c1_297, %c0_298, %c0_299] : memref<2x1x64xf32, #tpu.memory_space<vmem>>, vector<1x1x64xf32>
    %851 = vector.shape_cast %850 : vector<1x1x64xf32> to vector<1x64xf32>
    %852 = vector.broadcast %851 : vector<1x64xf32> to vector<16x64xf32>
    %853 = arith.mulf %852, %533 : vector<16x64xf32>
    %854 = arith.addf %849, %853 : vector<16x64xf32>
    %855 = arith.negf %464 : vector<16x64xf32>
    %856 = math.exp %855 : vector<16x64xf32>
    %cst_300 = arith.constant 1.000000e+00 : f32
    %857 = vector.broadcast %cst_300 : f32 to vector<16x64xf32>
    %858 = arith.addf %857, %856 : vector<16x64xf32>
    %859 = arith.divf %857, %858 : vector<16x64xf32>
    %860 = arith.mulf %464, %859 : vector<16x64xf32>
    %861 = arith.mulf %854, %860 : vector<16x64xf32>
    %862 = arith.truncf %861 : vector<16x64xf32> to vector<16x64xbf16>
    %c1_301 = arith.constant 1 : index
    %c0_302 = arith.constant 0 : index
    %c0_303 = arith.constant 0 : index
    %863 = vector.load %arg22[%c1_301, %c0_302, %c0_303] : memref<2x64x32xbf16, #tpu.memory_space<vmem>>, vector<1x64x32xbf16>
    %864 = vector.shape_cast %863 : vector<1x64x32xbf16> to vector<64x32xbf16>
    %cst_304 = arith.constant dense<0.000000e+00> : vector<16x32xf32>
    %865 = tpu.matmul %862, %864, %cst_304 {dimension_numbers = #tpu.dot_dimension_numbers<[1], [0], [0], [1], [0, 0, 1, 1], [], []>} : vector<16x64xbf16>, vector<64x32xbf16>, vector<16x32xf32> -> vector<16x32xf32>
    %866 = arith.addf %435, %865 : vector<16x32xf32>
    %cst_305 = arith.constant dense<0.000000e+00> : vector<16xf32>
    %867 = vector.multi_reduction <add>, %866, %cst_305 [1] : vector<16x32xf32> to vector<16xf32>
    %868 = vector.shape_cast %867 : vector<16xf32> to vector<16x1xf32>
    %cst_306 = arith.constant 3.200000e+01 : f32
    %869 = vector.broadcast %cst_306 : f32 to vector<16x1xf32>
    %870 = arith.divf %868, %869 : vector<16x1xf32>
    %871 = vector.broadcast %870 : vector<16x1xf32> to vector<16x32xf32>
    %872 = arith.subf %866, %871 : vector<16x32xf32>
    %873 = arith.mulf %872, %872 : vector<16x32xf32>
    %cst_307 = arith.constant dense<0.000000e+00> : vector<16xf32>
    %874 = vector.multi_reduction <add>, %873, %cst_307 [1] : vector<16x32xf32> to vector<16xf32>
    %875 = vector.shape_cast %874 : vector<16xf32> to vector<16x1xf32>
    %cst_308 = arith.constant 3.200000e+01 : f32
    %876 = vector.broadcast %cst_308 : f32 to vector<16x1xf32>
    %877 = arith.divf %875, %876 : vector<16x1xf32>
    %878 = vector.broadcast %870 : vector<16x1xf32> to vector<16x32xf32>
    %879 = arith.subf %866, %878 : vector<16x32xf32>
    %cst_309 = arith.constant 9.99999974E-6 : f32
    %880 = vector.broadcast %cst_309 : f32 to vector<16x1xf32>
    %881 = arith.addf %877, %880 : vector<16x1xf32>
    %882 = math.rsqrt %881 : vector<16x1xf32>
    %883 = vector.broadcast %882 : vector<16x1xf32> to vector<16x32xf32>
    %884 = arith.mulf %879, %883 : vector<16x32xf32>
    %c0_310 = arith.constant 0 : index
    %c0_311 = arith.constant 0 : index
    %885 = vector.load %arg23[%c0_310, %c0_311] : memref<1x32xf32, #tpu.memory_space<vmem>>, vector<1x32xf32>
    %886 = vector.broadcast %885 : vector<1x32xf32> to vector<16x32xf32>
    %887 = arith.mulf %884, %886 : vector<16x32xf32>
    %c0_312 = arith.constant 0 : index
    %c0_313 = arith.constant 0 : index
    %888 = vector.load %arg24[%c0_312, %c0_313] : memref<16x32xf32, #tpu.memory_space<vmem>>, vector<16x32xf32>
    tpu.vector_store %arg24[%c0_312, %c0_313], %887 {strides = array<i32>} : memref<16x32xf32, #tpu.memory_space<vmem>>, vector<16x32xf32>,
    return
  }
}

</mosaic_0001>

<bundles_post_ra>
// kernel: tpu_custom_call.1
= control target key start
LH: loop header
LB: loop body
LE: loop exit
PB: predicated region body
PF: predicated region fallthrough
CT: control target
= control target key end

     0   :  { %v12_v0 = vlaneseq  ;;  %vm17_vm0 = vcmask 31744   ;;  %s46_s0 = inlined_call_operand.vmem [shape: f32[16,4], index: 0, kind: input, shape index: {}]   ;;  %s47_s1 = inlined_call_operand.vmem [shape: f32[16,4], index: 1, kind: output, shape index: {}]  }
   0x1   :  { %v8_v1 = vld [vmem:[%s46_s0] sm:$0xff]  ;;  %v9_v2 = vld [vmem:[%s46_s0 + $0x8] sm:$0xff] }
   0x2   :  { %v10_v3 = vrot.slane %v8_v1, 7  ;;  %v11_v4 = vrot.slane %v9_v2, 7  ;;  %v13_v5 = vshrl.u32 %v12_v0, 7 }
   0x4   :  { %vm14_vm1 = vcmp.lt.s32.totalorder %v13_v5, 1 }
   0x5   :  { %v16_v6 = vsel %vm14_vm1, %v11_v4, %v10_v3  ;;  %v15_v7 = vsel %vm14_vm1, %v10_v3, %v11_v4 }
   0x6   :  { %18 = vst.msk [vmem:[%s47_s1] sm:$0xff] %vm17_vm0, %v16_v6  ;;  %19 = vst.msk [vmem:[%s47_s1 + $0x8] sm:$0xff] %vm17_vm0, %v15_v7 }

// kernel: tpu_custom_call.1
= control target key start
LH: loop header
LB: loop body
LE: loop exit
PB: predicated region body
PF: predicated region fallthrough
CT: control target
= control target key end

     0   :  { %s8358_s0 = inlined_call_operand.vmem [shape: f32[16,32], index: 0, kind: input, shape index: {}]   ;;  %s8359_s1 = inlined_call_operand.vmem [shape: f32[16,32], index: 1, kind: input, shape index: {}]   ;;  %s8360_s2 = inlined_call_operand.vmem [shape: f32[16,1], index: 2, kind: input, shape index: {}]   ;;  %s8361_s3 = inlined_call_operand.vmem [shape: f32[16,16], index: 3, kind: input, shape index: {}]   ;;  %s8362_s4 = inlined_call_operand.vmem [shape: f32[2,1,32], index: 4, kind: input, shape index: {}]   ;;  %s8363_s5 = inlined_call_operand.vmem [shape: bf16[2,32,64], index: 5, kind: input, shape index: {}]   ;;  %s8364_s6 = inlined_call_operand.vmem [shape: bf16[2,32,64], index: 6, kind: input, shape index: {}]   ;;  %s8365_s7 = inlined_call_operand.vmem [shape: f32[2,4,64], index: 7, kind: input, shape index: {}]   ;;  %s8366_s8 = inlined_call_operand.vmem [shape: f32[2,1,64], index: 8, kind: input, shape index: {}]   ;;  %s8367_s9 = inlined_call_operand.vmem [shape: bf16[2,64,64], index: 9, kind: input, shape index: {}]   ;;  %s8368_s10 = inlined_call_operand.vmem [shape: bf16[2,64,64], index: 10, kind: input, shape index: {}]   ;;  %s8369_s11 = inlined_call_operand.vmem [shape: bf16[2,64,64], index: 11, kind: input, shape index: {}]   ;;  %s8370_s12 = inlined_call_operand.vmem [shape: bf16[2,64,4], index: 12, kind: input, shape index: {}]   ;;  %s8371_s13 = inlined_call_operand.vmem [shape: bf16[2,64,4], index: 13, kind: input, shape index: {}]   ;;  %s8372_s14 = inlined_call_operand.vmem [shape: bf16[2,64,4], index: 14, kind: input, shape index: {}]   ;;  %s8373_s15 = inlined_call_operand.vmem [shape: f32[2,1,4], index: 15, kind: input, shape index: {}]   ;;  %s8374_s16 = inlined_call_operand.vmem [shape: bf16[2,64,4], index: 16, kind: input, shape index: {}]   ;;  %s8375_s17 = inlined_call_operand.vmem [shape: bf16[2,64,4], index: 17, kind: input, shape index: {}]   ;;  %s8376_s18 = inlined_call_operand.vmem [shape: bf16[2,64,4], index: 18, kind: input, shape index: {}]   ;;  %s8377_s19 = inlined_call_operand.vmem [shape: f32[2,1,4], index: 19, kind: input, shape index: {}]   ;;  %s8378_s20 = inlined_call_operand.vmem [shape: f32[2,1,64], index: 20, kind: input, shape index: {}]   ;;  %s8379_s21 = inlined_call_operand.vmem [shape: f32[2,1,64], index: 21, kind: input, shape index: {}]   ;;  %s8380_s22 = inlined_call_operand.vmem [shape: bf16[2,64,32], index: 22, kind: input, shape index: {}]   ;;  %s8381_s23 = inlined_call_operand.vmem [shape: f32[1,32], index: 23, kind: input, shape index: {}]   ;;  %s8382_s24 = inlined_call_operand.hbm [shape: f32[16,32], index: 24, kind: output, shape index: {}]  }
   0x1   :  { %8397 = sst [smem:[#allocation5_spill]] %s8358_s0 }
   0x2   :  { %8398 = sst [smem:[#allocation6_spill]] %s8359_s1 }
   0x3   :  { %8399 = sst [smem:[#allocation7_spill]] %s8360_s2 }
   0x4   :  { %8400 = sst [smem:[#allocation8_spill]] %s8361_s3 }
   0x5   :  { %8401 = sst [smem:[#allocation9_spill]] %s8362_s4 }
   0x6   :  { %8402 = sst [smem:[#allocation10_spill]] %s8363_s5 }
   0x7   :  { %8403 = sst [smem:[#allocation11_spill]] %s8364_s6 }
   0x8   :  { %8404 = sst [smem:[#allocation12_spill]] %s8365_s7 }
   0x9   :  { %8405 = sst [smem:[#allocation13_spill]] %s8366_s8 }
   0xa   :  { %8406 = sst [smem:[#allocation14_spill]] %s8373_s15 }
   0xb   :  { %s8407_s27 = sld [smem:[#allocation5_spill]]  ;;  %vm89_vm0 = vcmask 261120  }
   0xc   :  { %s8408_s15 = sld [smem:[#allocation6_spill]] }
  0x11   :  { %v83_v0 = vld [vmem:[%s8407_s27] sm:$0xff]  ;;  %v84_v2 = vld [vmem:[%s8407_s27 + $0x8] sm:$0xff] }
  0x12   :  { %v85_v1 = vld [vmem:[%s8408_s15] sm:$0xff]  ;;  %v86_v4 = vld [vmem:[%s8408_s15 + $0x8] sm:$0xff] }
  0x13   :  { %v7018_v3 = vadd.f32 %v85_v1, %v83_v0  ;;  %v7023_v5 = vadd.f32 %v86_v4, %v84_v2 }
  0x15   :  { %v90_v6 = vsel %vm89_vm0, %v7018_v3, 0.0  ;;  %v93_v7 = vsel %vm89_vm0, %v7023_v5, 0.0 }
  0x16   :  { %91 = vadd.xlane.f32.xlu0 %v90_v6 }
  0x1a   :  { %94 = vadd.xlane.f32.xlu0 %v93_v7 }
  0x1b   :  { %29 = vsyncpa [#allocation3], 0  ;;  %s8409_s3 = sld [smem:[#allocation10_spill]]  ;;  %v6869_v19 = vmov 0.0   ;;  %vm6870_vm1 = vmmov 0   ;;  %v245_v37 = vlaneseq  ;;  %vm264_vm4 = vcmask 130048  }
  0x1c   :  { %6070 = vmatprep.subr.bf16.mxu1 %v6869_v19  ;;  %6074 = vmatprep.mubr.msk.bf16.mxu1 %vm6870_vm1, %v6869_v19  ;;  %s8410_s5 = sld [smem:[#allocation9_spill]]  ;;  %v6871_v44 = vmov 0   ;;  %v6573_v7 = vld [vmem:[%s8367_s9 + $0x18] sm:$0xff]   ;;  %s6873_s4 = smov 112  }
  0x1d   :  { %s8411_s28 = sld [smem:[#allocation11_spill]]  ;;  %v7058_v38 = vshrl.u32 %v245_v37, 7  ;;  %v255_v39 = vand.u32 127, %v245_v37  ;;  %6554 = vset.pattern.permute.xlu1 %v6871_v44  ;;  %6553 = vset.pattern.permute.xlu0 %v6871_v44  ;;  %s6877_s15 = smov 80  }
  0x1e   :  { %s8412_s7 = sld [smem:[#allocation7_spill]]  ;;  %s6878_s30 = smov 16  }
  0x1f   :  { %v7061_v40 = vsub.s32 %v7058_v38, %v255_v39  ;;  %v253_v54 = vadd.s32 8, %v7058_v38  ;;  %s8413_s27 = sld [smem:[#allocation12_spill]]  ;;  %s8395_s26 = smov 32  }
  0x20   :  { %s8414_s29 = sld [smem:[#allocation13_spill]]  ;;  %s8393_s25 = smov 48  }
  0x21   :  { %v6569_v18 = vld [vmem:[%s8409_s3 + $0x8] sm:$0xff]   ;;  %v6570_v20 = vld [vmem:[%s8409_s3] sm:$0xff]   ;;  %vm258_vm2 = vcmp.eq.s32.totalorder %v7061_v40, 3  ;;  %vm368_vm3 = vcmp.eq.s32.totalorder %v7061_v40, 2  ;;  %v7092_v55 = vsub.s32 %v253_v54, %v255_v39  ;;  %vm477_vm15 = vcmp.eq.s32.totalorder %v7061_v40, 1  ;;  %s8415_s8 = sld [smem:[#allocation14_spill]] }
  0x22   :  { %6071 = vmatpush3.bf16.msra.mxu1 %v6569_v18  ;;  %v5538_v30 = vld [vmem:[%s8410_s5] ss:$0 sm:$0xff]  ;;  %v7066_v41 = vsel %vm258_vm2, 1.0, %v6869_v19  ;;  %v7069_v42 = vsel %vm368_vm3, 1.0, %v6869_v19  ;;  %v7116_v63 = vsel %vm477_vm15, 1.0, %v6869_v19  ;;  %v7185_v18 = vsub.s32 0, %v7058_v38 }
  0x23   :  { %6072 = vmatprep.subr.bf16.mxu1 %v6869_v19  ;;  %v6571_v34 = vld [vmem:[%s8411_s28 + $0x8] sm:$0xff]   ;;  %v6572_v36 = vld [vmem:[%s8411_s28] sm:$0xff]   ;;  %6090 = vmatprep.mubr.msk.f32.mxu0 %vm264_vm4, %v7066_v41  ;;  %vm259_vm13 = vcmp.eq.s32.totalorder %v7092_v55, 3  ;;  %vm369_vm14 = vcmp.eq.s32.totalorder %v7092_v55, 2  ;;  %vm478_vm2 = vcmp.eq.s32.totalorder %v7092_v55, 1  ;;  %vm1507_vm15 = vcmp.eq.s32.totalorder %v7061_v40, 4 }
  0x24   :  { %v80_v43 = vld [vmem:[%s8412_s7 + $0x8] sm:$0xff]  ;;  %v79_v46 = vld [vmem:[%s8412_s7] sm:$0xff]  ;;  %v7108_v61 = vsel %vm259_vm13, 1.0, %v6869_v19  ;;  %v7111_v62 = vsel %vm369_vm14, 1.0, %v6869_v19  ;;  %v7132_v2 = vsel %vm478_vm2, 1.0, %v6869_v19  ;;  %vm1508_vm2 = vcmp.eq.s32.totalorder %v7092_v55, 4 }
  0x25   :  { %vm347_vm5 = vcmp.ge.f32.partialorder %v80_v43, 3.0  ;;  %vm455_vm6 = vcmp.ge.f32.partialorder %v79_v46, 2.0  ;;  %vm456_vm7 = vcmp.ge.f32.partialorder %v80_v43, 2.0  ;;  %vm346_vm8 = vcmp.ge.f32.partialorder %v79_v46, 3.0  ;;  %s8416_s6 = sld [smem:[#allocation8_spill]]  ;;  %s6875_s7 = smov 96  }
  0x26   :  { %6073 = vmatpush3.bf16.msra.mxu1 %v6570_v20  ;;  %v349_v45 = vsel %vm347_vm5, 1, %v6871_v44  ;;  %v457_v47 = vsel %vm455_vm6, 1, %v6871_v44  ;;  %v458_v48 = vsel %vm456_vm7, 1, %v6871_v44  ;;  %v348_v49 = vsel %vm346_vm8, 1, %v6871_v44 }
  0x27   :  { %6078 = vmatprep.subr.bf16.mxu1 %v6869_v19  ;;  %vm564_vm9 = vcmp.ge.f32.partialorder %v79_v46, 1.0  ;;  %vm565_vm10 = vcmp.ge.f32.partialorder %v80_v43, 1.0  ;;  %vm1594_vm11 = vcmp.ge.f32.partialorder %v79_v46, 4.0  ;;  %vm1595_vm12 = vcmp.ge.f32.partialorder %v80_v43, 4.0 }
  0x28   :  { %v566_v50 = vsel %vm564_vm9, 1, %v6871_v44  ;;  %v567_v51 = vsel %vm565_vm10, 1, %v6871_v44  ;;  %v1596_v52 = vsel %vm1594_vm11, 1, %v6871_v44  ;;  %v1597_v53 = vsel %vm1595_vm12, 1, %v6871_v44 }
  0x29   :  { %v7188_v20 = vsub.s32 3, %v7058_v38  ;;  %vm642_vm10 = vcmask 523264   ;;  %v7435_v40 = vsel %vm1508_vm2, 1.0, %v6869_v19 }
  0x30   :  { %351 = vperm.xlu0 %6553, %v348_v49  }
  0x9f   :  { %v92_v8 = vpop.xlane.xlu0 %91 }
  0xa0   :  { %v97_v9 = vmul.f32 0.03125, %v92_v8  ;;  %v6574_v8 = vld [vmem:[%s8368_s10 + $0x18] sm:$0xff]  }
  0xa2   :  { %v99_v10 = vsub.f32 %v7018_v3, %v97_v9  ;;  %v6575_v9 = vld [vmem:[%s8367_s9 + $0x10] sm:$0xff]  }
  0xa3   :  { %v95_v11 = vpop.xlane.xlu0 %94 }
  0xa4   :  { %v98_v12 = vmul.f32 0.03125, %v95_v11  ;;  %v101_v13 = vmul.f32 %v99_v10, %v99_v10  ;;  %v6577_v11 = vld [vmem:[%s8367_s9 + $0x8] sm:$0xff]  }
  0xa6   :  { %v100_v14 = vsub.f32 %v7023_v5, %v98_v12  ;;  %v103_v15 = vsel %vm89_vm0, %v101_v13, 0.0  ;;  %v6578_v12 = vld [vmem:[%s8368_s10 + $0x8] sm:$0xff]   ;;  %v6579_v13 = vld [vmem:[%s8367_s9] sm:$0xff]  }
  0xa7   :  { %104 = vadd.xlane.f32.xlu1 %v103_v15 }
  0xa8   :  { %v102_v16 = vmul.f32 %v100_v14, %v100_v14 }
  0xaa   :  { %v106_v17 = vsel %vm89_vm0, %v102_v16, 0.0 }
  0xab   :  { %107 = vadd.xlane.f32.xlu1 %v106_v17 }
  0xbc   :  { %354 = vperm.xlu1 %6554, %v349_v45  }
  0xc0   :  { %460 = vperm.xlu1 %6554, %v457_v47  }
  0xc4   :  { %463 = vperm.xlu1 %6554, %v458_v48  }
  0xc8   :  { %569 = vperm.xlu1 %6554, %v566_v50  }
  0xcc   :  { %572 = vperm.xlu1 %6554, %v567_v51  }
  0xd0   :  { %1599 = vperm.xlu1 %6554, %v1596_v52  }
  0xd4   :  { %1602 = vperm.xlu1 %6554, %v1597_v53  }
 0x130   :  { %v105_v21 = vpop.xlane.xlu1 %104 }
 0x131   :  { %v109_v22 = vmul.f32 0.03125, %v105_v21  ;;  %v244_v21 = vld [vmem:[%s8413_s27] sm:$0xf] }
 0x133   :  { %v111_v23 = vadd.f32 1e-05, %v109_v22  ;;  %v7194_v22 = vsub.s32 1, %v7058_v38 }
 0x134   :  { %v108_v24 = vpop.xlane.xlu1 %107 }
 0x135   :  { %6657 = vrsqrt.f32 %v111_v23  ;;  %v110_v25 = vmul.f32 0.03125, %v108_v24  ;;  %v7196_v23 = vpop.permute.xlu0 %351 }
 0x136   :  { %vm356_vm6 = vcmp.eq.s32.totalorder %v7196_v23, 1 }
 0x137   :  { %v112_v26 = vadd.f32 1e-05, %v110_v25  ;;  %v363_v25 = vrot.slane %v244_v21, %v7185_v18 }
 0x138   :  { %v7178_v15 = vpop.permute.xlu1 %354 }
 0x139   :  { %6659 = vrsqrt.f32 %v112_v26  ;;  %v248_v26 = vrot.slane %v244_v21, %v7188_v20  ;;  %vm357_vm5 = vcmp.eq.s32.totalorder %v7178_v15, 1 }
 0x13c   :  { %v7180_v16 = vpop.permute.xlu1 %460 }
 0x13d   :  { %vm465_vm7 = vcmp.eq.s32.totalorder %v7180_v16, 1 }
 0x140   :  { %v7182_v17 = vpop.permute.xlu1 %463 }
 0x141   :  { %vm466_vm3 = vcmp.eq.s32.totalorder %v7182_v17, 1 }
 0x142   :  { %v6658_v27 = vpop.eup %6657 }
 0x143   :  { %v115_v28 = vmul.f32 %v6658_v27, %v99_v10  ;;  %v6576_v10 = vld [vmem:[%s8368_s10 + $0x10] sm:$0xff]   ;;  %v7203_v27 = vsub.s32 2, %v7058_v38 }
 0x144   :  { %v7198_v24 = vpop.permute.xlu1 %569 }
 0x145   :  { %v124_v32 = vmul.f32 %v5538_v30, %v115_v28  ;;  %v581_v39 = vrot.slane %v244_v21, %v7203_v27  ;;  %vm574_vm9 = vcmp.eq.s32.totalorder %v7198_v24, 1 }
 0x146   :  { %v6660_v29 = vpop.eup %6659 }
 0x147   :  { %v116_v31 = vmul.f32 %v6660_v29, %v100_v14  ;;  %v6580_v14 = vld [vmem:[%s8368_s10] sm:$0xff]  }
 0x148   :  { %v7220_v43 = vpop.permute.xlu1 %572 }
 0x149   :  { %v125_v33 = vmul.f32 %v5538_v30, %v116_v31  ;;  %v472_v30 = vrot.slane %v244_v21, %v7194_v22  ;;  %vm575_vm8 = vcmp.eq.s32.totalorder %v7220_v43, 1 }
 0x14b   :  { %v126_v35 = vpack.c.bf16 %v125_v33, %v124_v32 }
 0x14c   :  { %v7443_v55 = vpop.permute.xlu1 %1599 }
 0x14d   :  { %6075 = vmatmul.mubr.msk.bf16.vlgmr.msra.gmra.mxu1 %vm89_vm0, %v126_v35 }
 0x14e   :  { %6079 = vmatpush3.bf16.msra.mxu1 %v6571_v34  ;;  %6082 = vmatprep.mubr.msk.bf16.mxu1 %vm6870_vm1, %v6869_v19 }
 0x14f   :  { %6080 = vmatprep.subr.bf16.mxu1 %v6869_v19 }
 0x152   :  { %6081 = vmatpush3.bf16.msra.mxu1 %v6572_v36 }
 0x155   :  { %6083 = vmatmul.mubr.msk.bf16.vlgmr.msra.gmra.mxu1 %vm89_vm0, %v126_v35 }
 0x156   :  { %6097 = vmatprep.mubr.msk.f32.mxu1 %vm264_vm4, %v7069_v42 }
 0x20d   :  { %v7094_v56 = vpop.f32.mrf.mxu1 }
 0x20e   :  { %v249_v47 = vmul.f32 %v248_v26, %v7094_v56 }
 0x20f   :  { %v6076_v57 = vpop.f32.mrf.mxu1 }
 0x211   :  { %v7098_v58 = vpop.f32.mrf.mxu1 }
 0x212   :  { %6086 = vmatprep.subr.mxu0 %v7098_v58  ;;  %6093 = vmatprep.subr.mxu1 %v7098_v58  ;;  %v760_v59 = vpack.c.bf16 %v7098_v58, %v7094_v56  ;;  %v250_v33 = vmul.f32 %v248_v26, %v7098_v58 }
 0x213   :  { %v6077_v60 = vpop.f32.mrf.mxu1  ;;  %6087 = vmatpush3.msra.mxu0 %v7098_v58  ;;  %6094 = vmatpush3.msra.mxu1 %v7098_v58 }
 0x214   :  { %6088 = vmatprep.subr.mxu0 %v7094_v56  ;;  %6095 = vmatprep.subr.mxu1 %v7094_v56 }
 0x215   :  { %v7118_v0 = vpop.f32.mrf.mxu1  ;;  %6089 = vmatpush3.msra.mxu0 %v7094_v56  ;;  %6096 = vmatpush3.msra.mxu1 %v7094_v56 }
 0x216   :  { %6091 = vmatmul.mubr.msk.f32.vlgmr.msra.gmra.mxu0 %vm264_vm4, %v7108_v61  ;;  %6098 = vmatmul.mubr.msk.f32.vlgmr.msra.gmra.mxu1 %vm264_vm4, %v7111_v62 }
 0x217   :  { %6100 = vmatprep.subr.mxu0 %v7098_v58  ;;  %v6084_v1 = vpop.f32.mrf.mxu1  ;;  %6104 = vmatprep.mubr.msk.f32.mxu0 %vm264_vm4, %v7116_v63 }
 0x218   :  { %6101 = vmatpush3.msra.mxu0 %v7098_v58  ;;  %6107 = vmatprep.subr.bf16.mxu1 %v6869_v19  ;;  %v5557_v1 = vld [vmem:[%s8414_s29] ss:$0 sm:$0xff] }
 0x219   :  { %6102 = vmatprep.subr.mxu0 %v7094_v56  ;;  %v7136_v4 = vpop.f32.mrf.mxu1  ;;  %6115 = vmatprep.mubr.msk.bf16.mxu1 %vm6870_vm1, %v6869_v19  ;;  %v6592_v58 = vld [vmem:[%s8370_s12] sm:$0xff]  }
 0x21a   :  { %6103 = vmatpush3.msra.mxu0 %v7094_v56  ;;  %6108 = vmatpush3.bf16.msra.mxu1 %v6573_v7  ;;  %v6591_v56 = vld [vmem:[%s8371_s13] sm:$0xff]  }
 0x21b   :  { %6105 = vmatmul.mubr.msk.f32.vlgmr.msra.gmra.mxu0 %vm264_vm4, %v7132_v2  ;;  %v6085_v6 = vpop.f32.mrf.mxu1  ;;  %6119 = vmatprep.subr.bf16.mxu0 %v6869_v19 }
 0x21c   :  { %6127 = vmatprep.mubr.msk.bf16.mxu0 %vm6870_vm1, %v6869_v19  ;;  %6120 = vmatpush3.bf16.msra.mxu0 %v6574_v8 }
 0x21d   :  { %6109 = vmatprep.subr.bf16.mxu1 %v6869_v19  ;;  %6121 = vmatprep.subr.bf16.mxu0 %v6869_v19 }
 0x21e   :  { %6110 = vmatpush3.bf16.msra.mxu1 %v6575_v9 }
 0x21f   :  { %6111 = vmatprep.subr.bf16.mxu1 %v6869_v19 }
 0x220   :  { %6122 = vmatpush3.bf16.msra.mxu0 %v6576_v10 }
 0x221   :  { %6123 = vmatprep.subr.bf16.mxu0 %v6869_v19 }
 0x222   :  { %6112 = vmatpush3.bf16.msra.mxu1 %v6577_v11 }
 0x223   :  { %6113 = vmatprep.subr.bf16.mxu1 %v6869_v19 }
 0x224   :  { %6124 = vmatpush3.bf16.msra.mxu0 %v6578_v12 }
 0x225   :  { %6125 = vmatprep.subr.bf16.mxu0 %v6869_v19 }
 0x226   :  { %6114 = vmatpush3.bf16.msra.mxu1 %v6579_v13 }
 0x227   :  { %6131 = vmatprep.subr.bf16.mxu1 %v6869_v19 }
 0x228   :  { %6126 = vmatpush3.bf16.msra.mxu0 %v6580_v14 }
 0x229   :  { %6143 = vmatprep.subr.bf16.mxu0 %v6869_v19 }
 0x2d6   :  { %v6092_v28 = vpop.f32.mrf.mxu0  ;;  %v6099_v29 = vpop.f32.mrf.mxu1 }
 0x2d7   :  { %v359_v31 = vsel %vm357_vm5, %v6092_v28, 0.0  ;;  %v468_v32 = vsel %vm466_vm3, %v6099_v29, 0.0 }
 0x2d8   :  { %v365_v34 = vmul.f32 %v363_v25, %v359_v31  ;;  %v337_v35 = vpop.f32.mrf.mxu0  ;;  %v446_v36 = vpop.f32.mrf.mxu1  ;;  %v474_v46 = vmul.f32 %v472_v30, %v468_v32  ;;  %v6581_v32 = vld [vmem:[%s8369_s11 + $0x18] sm:$0xff]  }
 0x2d9   :  { %v358_v37 = vsel %vm356_vm6, %v337_v35, 0.0  ;;  %v467_v38 = vsel %vm465_vm7, %v446_v36, 0.0  ;;  %v6582_v35 = vld [vmem:[%s8369_s11 + $0x10] sm:$0xff]  }
 0x2da   :  { %v367_v45 = vadd.f32 %v365_v34, %v250_v33  ;;  %v364_v48 = vmul.f32 %v363_v25, %v358_v37  ;;  %v473_v52 = vmul.f32 %v472_v30, %v467_v38  ;;  %v6585_v34 = vld [vmem:[%s8371_s13 + $0x18] sm:$0xff]   ;;  %v6587_v36 = vld [vmem:[%s8371_s13 + $0x10] sm:$0xff]   ;;  %v6583_v37 = vld [vmem:[%s8369_s11 + $0x8] sm:$0xff]  }
 0x2db   :  { %v6106_v49 = vpop.f32.mrf.mxu0  ;;  %v6589_v38 = vld [vmem:[%s8371_s13 + $0x8] sm:$0xff]  }
 0x2dc   :  { %v476_v50 = vadd.f32 %v474_v46, %v367_v45  ;;  %v366_v51 = vadd.f32 %v364_v48, %v249_v47  ;;  %v577_v53 = vsel %vm575_vm8, %v6106_v49, 0.0  ;;  %v6586_v45 = vld [vmem:[%s8370_s12 + $0x18] sm:$0xff]   ;;  %v6588_v46 = vld [vmem:[%s8370_s12 + $0x10] sm:$0xff]   ;;  %v6590_v47 = vld [vmem:[%s8370_s12 + $0x8] sm:$0xff]  }
 0x2dd   :  { %v583_v54 = vmul.f32 %v581_v39, %v577_v53  ;;  %v555_v57 = vpop.f32.mrf.mxu0  ;;  %v6593_v53 = vld [vmem:[%s8372_s14 + $0x18] sm:$0xff]  }
 0x2de   :  { %v475_v60 = vadd.f32 %v473_v52, %v366_v51  ;;  %v576_v6 = vsel %vm574_vm9, %v555_v57, 0.0 }
 0x2df   :  { %v585_v7 = vadd.f32 %v583_v54, %v476_v50  ;;  %v582_v8 = vmul.f32 %v581_v39, %v576_v6  ;;  %v6584_v39 = vld [vmem:[%s8369_s11] sm:$0xff]   ;;  %v6594_v54 = vld [vmem:[%s8375_s17 + $0x18] sm:$0xff]  }
 0x2e1   :  { %v594_v9 = vadd.f32 %v5557_v1, %v585_v7  ;;  %v584_v10 = vadd.f32 %v582_v8, %v475_v60  ;;  %v6595_v7 = vld [vmem:[%s8372_s14 + $0x10] sm:$0xff]  }
 0x2e2   :  { %v6596_v8 = vld [vmem:[%s8375_s17 + $0x10] sm:$0xff]  }
 0x2e3   :  { %v5559_v11 = vmul.f32 -1.442695, %v594_v9  ;;  %v593_v12 = vadd.f32 %v5557_v1, %v584_v10  ;;  %v6598_v10 = vld [vmem:[%s8375_s17 + $0x8] sm:$0xff]  }
 0x2e5   :  { %6661 = vpow2.f32 %v5559_v11  ;;  %v5558_v13 = vmul.f32 -1.442695, %v593_v12 }
 0x2e7   :  { %6663 = vpow2.f32 %v5558_v13  ;;  %v6600_v13 = vld [vmem:[%s8375_s17] sm:$0xff]  }
 0x2f2   :  { %v6662_v14 = vpop.eup %6661 }
 0x2f3   :  { %v602_v21 = vadd.f32 1.0, %v6662_v14 }
 0x2f4   :  { %v6664_v25 = vpop.eup %6663 }
 0x2f5   :  { %6665 = vrcp.f32 %v602_v21  ;;  %v601_v26 = vadd.f32 1.0, %v6664_v25  ;;  %v6601_v25 = vld [vmem:[%s8374_s16 + $0x18] sm:$0xff]  }
 0x2f7   :  { %6667 = vrcp.f32 %v601_v26  ;;  %v6602_v26 = vld [vmem:[%s8376_s18 + $0x18] sm:$0xff]  }
 0x302   :  { %v6666_v28 = vpop.eup %6665 }
 0x303   :  { %v7232_v30 = vmul.f32 %v6666_v28, %v594_v9  ;;  %v6597_v9 = vld [vmem:[%s8372_s14 + $0x8] sm:$0xff]  }
 0x304   :  { %v6668_v29 = vpop.eup %6667 }
 0x305   :  { %v7234_v31 = vmul.f32 %v6668_v29, %v593_v12  ;;  %v6599_v12 = vld [vmem:[%s8372_s14] sm:$0xff]  }
 0x307   :  { %v609_v33 = vpack.c.bf16 %v7232_v30, %v7234_v31 }
 0x309   :  { %6116 = vmatmul.mubr.msk.bf16.vlgmr.msra.gmra.mxu1 %vm642_vm10, %v609_v33  ;;  %6128 = vmatmul.mubr.msk.bf16.vlgmr.msra.gmra.mxu0 %vm642_vm10, %v609_v33  ;;  %v6604_v33 = vld [vmem:[%s8376_s18 + $0x10] sm:$0xff]  }
 0x30a   :  { %6132 = vmatpush3.bf16.msra.mxu1 %v6581_v32  ;;  %6139 = vmatprep.mubr.msk.bf16.mxu1 %vm6870_vm1, %v6869_v19  ;;  %v6603_v32 = vld [vmem:[%s8374_s16 + $0x10] sm:$0xff]  }
 0x30b   :  { %6133 = vmatprep.subr.bf16.mxu1 %v6869_v19  ;;  %6144 = vmatpush3.bf16.msra.mxu0 %v6585_v34  ;;  %v6605_v34 = vld [vmem:[%s8374_s16 + $0x8] sm:$0xff]  }
 0x30c   :  { %6145 = vmatprep.subr.bf16.mxu0 %v6869_v19  ;;  %6151 = vmatprep.mubr.msk.bf16.mxu0 %vm6870_vm1, %v6869_v19 }
 0x30e   :  { %6134 = vmatpush3.bf16.msra.mxu1 %v6582_v35  ;;  %v6606_v35 = vld [vmem:[%s8376_s18 + $0x8] sm:$0xff]  }
 0x30f   :  { %6135 = vmatprep.subr.bf16.mxu1 %v6869_v19  ;;  %6146 = vmatpush3.bf16.msra.mxu0 %v6587_v36  ;;  %v6607_v36 = vld [vmem:[%s8374_s16] sm:$0xff]  }
 0x310   :  { %6147 = vmatprep.subr.bf16.mxu0 %v6869_v19 }
 0x312   :  { %6136 = vmatpush3.bf16.msra.mxu1 %v6583_v37  ;;  %v6608_v37 = vld [vmem:[%s8376_s18] sm:$0xff]  }
 0x313   :  { %6137 = vmatprep.subr.bf16.mxu1 %v6869_v19  ;;  %6148 = vmatpush3.bf16.msra.mxu0 %v6589_v38 }
 0x314   :  { %6149 = vmatprep.subr.bf16.mxu0 %v6869_v19 }
 0x316   :  { %6138 = vmatpush3.bf16.msra.mxu1 %v6584_v39 }
 0x317   :  { %6155 = vmatprep.subr.bf16.mxu1 %v6869_v19  ;;  %6150 = vmatpush3.bf16.msra.mxu0 %v6591_v56 }
 0x318   :  { %6167 = vmatprep.subr.bf16.mxu0 %v6869_v19 }
 0x319   :  { %6140 = vmatmul.mubr.msk.bf16.vlgmr.msra.gmra.mxu1 %vm642_vm10, %v760_v59 }
 0x31a   :  { %6156 = vmatpush3.bf16.msra.mxu1 %v6586_v45  ;;  %6163 = vmatprep.mubr.msk.bf16.mxu1 %vm6870_vm1, %v6869_v19 }
 0x31b   :  { %6157 = vmatprep.subr.bf16.mxu1 %v6869_v19 }
 0x31e   :  { %6158 = vmatpush3.bf16.msra.mxu1 %v6588_v46 }
 0x31f   :  { %6159 = vmatprep.subr.bf16.mxu1 %v6869_v19 }
 0x322   :  { %6160 = vmatpush3.bf16.msra.mxu1 %v6590_v47 }
 0x323   :  { %6161 = vmatprep.subr.bf16.mxu1 %v6869_v19 }
 0x326   :  { %6162 = vmatpush3.bf16.msra.mxu1 %v6592_v58 }
 0x327   :  { %6179 = vmatprep.subr.bf16.mxu1 %v6869_v19 }
 0x3c9   :  { %v7298_v59 = vpop.f32.mrf.mxu1  ;;  %v7300_v48 = vpop.f32.mrf.mxu0 }
 0x3cb   :  { %v6117_v49 = vpop.f32.mrf.mxu1  ;;  %v6129_v50 = vpop.f32.mrf.mxu0 }
 0x3cd   :  { %v7302_v51 = vpop.f32.mrf.mxu1  ;;  %v7304_v52 = vpop.f32.mrf.mxu0 }
 0x3ce   :  { %v837_v57 = vpack.c.bf16 %v7302_v51, %v7298_v59  ;;  %v838_v60 = vpack.c.bf16 %v7304_v52, %v7300_v48 }
 0x3cf   :  { %v6118_v1 = vpop.f32.mrf.mxu1  ;;  %v6130_v6 = vpop.f32.mrf.mxu0 }
 0x3d0   :  { %6152 = vmatmul.mubr.msk.bf16.vlgmr.msra.gmra.mxu0 %vm642_vm10, %v838_v60  ;;  %6164 = vmatmul.mubr.msk.bf16.vlgmr.msra.gmra.mxu1 %vm642_vm10, %v837_v57 }
 0x3d1   :  { %6168 = vmatpush3.bf16.msra.mxu0 %v6593_v53  ;;  %6180 = vmatpush3.bf16.msra.mxu1 %v6594_v54 }
 0x3d2   :  { %6169 = vmatprep.subr.bf16.mxu0 %v6869_v19  ;;  %6181 = vmatprep.subr.bf16.mxu1 %v6869_v19 }
 0x3d3   :  { %6175 = vmatprep.mubr.msk.bf16.mxu0 %vm6870_vm1, %v6869_v19  ;;  %6187 = vmatprep.mubr.msk.bf16.mxu1 %vm6870_vm1, %v6869_v19 }
 0x3d5   :  { %6170 = vmatpush3.bf16.msra.mxu0 %v6595_v7  ;;  %6182 = vmatpush3.bf16.msra.mxu1 %v6596_v8 }
 0x3d6   :  { %6171 = vmatprep.subr.bf16.mxu0 %v6869_v19  ;;  %6183 = vmatprep.subr.bf16.mxu1 %v6869_v19 }
 0x3d9   :  { %v7338_v11 = vpop.f32.mrf.mxu1  ;;  %6172 = vmatpush3.bf16.msra.mxu0 %v6597_v9  ;;  %6184 = vmatpush3.bf16.msra.mxu1 %v6598_v10 }
 0x3da   :  { %6173 = vmatprep.subr.bf16.mxu0 %v6869_v19  ;;  %6185 = vmatprep.subr.bf16.mxu1 %v6869_v19 }
 0x3db   :  { %v6141_v14 = vpop.f32.mrf.mxu1 }
 0x3dd   :  { %v7348_v21 = vpop.f32.mrf.mxu1  ;;  %6174 = vmatpush3.bf16.msra.mxu0 %v6599_v12  ;;  %6186 = vmatpush3.bf16.msra.mxu1 %v6600_v13 }
 0x3de   :  { %v839_v28 = vpack.c.bf16 %v7348_v21, %v7338_v11  ;;  %6191 = vmatprep.subr.bf16.mxu0 %v6869_v19  ;;  %6203 = vmatprep.subr.bf16.mxu1 %v6869_v19 }
 0x3df   :  { %v6142_v29 = vpop.f32.mrf.mxu1 }
 0x3e0   :  { %6176 = vmatmul.mubr.msk.bf16.vlgmr.msra.gmra.mxu0 %vm642_vm10, %v839_v28  ;;  %6188 = vmatmul.mubr.msk.bf16.vlgmr.msra.gmra.mxu1 %vm642_vm10, %v838_v60 }
 0x3e1   :  { %6192 = vmatpush3.bf16.msra.mxu0 %v6601_v25  ;;  %6204 = vmatpush3.bf16.msra.mxu1 %v6602_v26  ;;  %v5606_v26 = vld [vmem:[%s8377_s19] ss:$0 sm:$0xff] }
 0x3e2   :  { %6193 = vmatprep.subr.bf16.mxu0 %v6869_v19  ;;  %6205 = vmatprep.subr.bf16.mxu1 %v6869_v19 }
 0x3e3   :  { %6199 = vmatprep.mubr.msk.bf16.mxu0 %vm6870_vm1, %v6869_v19  ;;  %6211 = vmatprep.mubr.msk.bf16.mxu1 %vm6870_vm1, %v6869_v19 }
 0x3e5   :  { %6194 = vmatpush3.bf16.msra.mxu0 %v6603_v32  ;;  %6206 = vmatpush3.bf16.msra.mxu1 %v6604_v33 }
 0x3e6   :  { %6195 = vmatprep.subr.bf16.mxu0 %v6869_v19  ;;  %6207 = vmatprep.subr.bf16.mxu1 %v6869_v19 }
 0x3e9   :  { %6196 = vmatpush3.bf16.msra.mxu0 %v6605_v34  ;;  %6208 = vmatpush3.bf16.msra.mxu1 %v6606_v35 }
 0x3ea   :  { %6197 = vmatprep.subr.bf16.mxu0 %v6869_v19  ;;  %6209 = vmatprep.subr.bf16.mxu1 %v6869_v19 }
 0x3ed   :  { %6198 = vmatpush3.bf16.msra.mxu0 %v6607_v36  ;;  %6210 = vmatpush3.bf16.msra.mxu1 %v6608_v37 }
 0x3ee   :  { %6236 = vmatprep.subr.msk.mxu1 %vm264_vm4, %v7304_v52 }
 0x3f0   :  { %6200 = vmatmul.mubr.msk.bf16.vlgmr.msra.gmra.mxu0 %vm642_vm10, %v837_v57  ;;  %6212 = vmatmul.mubr.msk.bf16.vlgmr.msra.gmra.mxu1 %vm642_vm10, %v839_v28 }
 0x3f1   :  { %6237 = vmatpush3.xpose.msk.msra.mxu1 %vm264_vm4, %v7304_v52  ;;  %6240 = vmatprep.mubr.msk.f32.mxu1 %vm264_vm4, %v7298_v59 }
 0x3f2   :  { %6238 = vmatprep.subr.msk.mxu1 %vm264_vm4, %v7300_v48  ;;  %6219 = vmatprep.mubr.msk.f32.mxu0 %vm264_vm4, %v7116_v63 }
 0x3f5   :  { %6239 = vmatpush3.xpose.msk.msra.mxu1 %vm264_vm4, %v7300_v48 }
 0x3f8   :  { %6241 = vmatmul.mubr.msk.f32.vlgmr.msra.gmra.mxu1 %vm264_vm4, %v7302_v51 }
 0x490   :  { %v917_v38 = vpop.f32.mrf.mxu0  ;;  %v985_v39 = vpop.f32.mrf.mxu1 }
 0x491   :  { %v986_v45 = vadd.f32 %v985_v39, %v917_v38 }
 0x492   :  { %v6153_v46 = vpop.f32.mrf.mxu0  ;;  %v6165_v47 = vpop.f32.mrf.mxu1 }
 0x494   :  { %v920_v56 = vpop.f32.mrf.mxu0  ;;  %v988_v58 = vpop.f32.mrf.mxu1 }
 0x495   :  { %v989_v49 = vadd.f32 %v988_v58, %v920_v56 }
 0x496   :  { %v6154_v50 = vpop.f32.mrf.mxu0  ;;  %v6166_v53 = vpop.f32.mrf.mxu1 }
 0x4a0   :  { %v1061_v54 = vpop.f32.mrf.mxu0  ;;  %v1153_v57 = vpop.f32.mrf.mxu1 }
 0x4a1   :  { %v7406_v60 = vadd.f32 %v1061_v54, %v986_v45 }
 0x4a2   :  { %v6177_v1 = vpop.f32.mrf.mxu0  ;;  %v6189_v6 = vpop.f32.mrf.mxu1 }
 0x4a4   :  { %v1064_v7 = vpop.f32.mrf.mxu0  ;;  %v1156_v8 = vpop.f32.mrf.mxu1 }
 0x4a5   :  { %v7408_v9 = vadd.f32 %v1064_v7, %v989_v49 }
 0x4a6   :  { %v6178_v10 = vpop.f32.mrf.mxu0  ;;  %v6190_v12 = vpop.f32.mrf.mxu1 }
 0x4b0   :  { %v1218_v13 = vpop.f32.mrf.mxu0  ;;  %v1291_v14 = vpop.f32.mrf.mxu1 }
 0x4b1   :  { %v1219_v25 = vadd.f32 %v1218_v13, %v1153_v57 }
 0x4b2   :  { %v6201_v28 = vpop.f32.mrf.mxu0  ;;  %v6213_v29 = vpop.f32.mrf.mxu1 }
 0x4b3   :  { %v1298_v32 = vadd.f32 %v1291_v14, %v1219_v25 }
 0x4b4   :  { %v1221_v33 = vpop.f32.mrf.mxu0  ;;  %v1294_v34 = vpop.f32.mrf.mxu1 }
 0x4b5   :  { %v1307_v35 = vadd.f32 %v5606_v26, %v1298_v32  ;;  %v1222_v36 = vadd.f32 %v1221_v33, %v1156_v8 }
 0x4b6   :  { %v6202_v37 = vpop.f32.mrf.mxu0  ;;  %v6214_v38 = vpop.f32.mrf.mxu1 }
 0x4b7   :  { %v1309_v39 = vsub.f32 0.0, %v1307_v35  ;;  %v1299_v45 = vadd.f32 %v1294_v34, %v1222_v36 }
 0x4b9   :  { %v1317_v46 = vand.u32 2147483647, %v1309_v39  ;;  %v1308_v47 = vadd.f32 %v5606_v26, %v1299_v45  ;;  %v1311_v34 = vmax.f32 %v1309_v39, 0.0  ;;  %vm1313_vm14 = vcmp.ne.f32.partialorder %v1309_v39, %v1309_v39 }
 0x4bb   :  { %v1319_v56 = vsub.f32 0.0, %v1317_v46  ;;  %v1310_v58 = vsub.f32 0.0, %v1308_v47 }
 0x4bd   :  { %v1321_v49 = vmul.f32 1.442695, %v1319_v56  ;;  %v1318_v50 = vand.u32 2147483647, %v1310_v58  ;;  %v1312_v37 = vmax.f32 %v1310_v58, 0.0  ;;  %vm1314_vm13 = vcmp.ne.f32.partialorder %v1310_v58, %v1310_v58 }
 0x4bf   :  { %6669 = vpow2.f32 %v1321_v49  ;;  %v1320_v53 = vsub.f32 0.0, %v1318_v50 }
 0x4c1   :  { %v1323_v54 = vmul.f32 1.442695, %v1320_v53 }
 0x4c3   :  { %6671 = vpow2.f32 %v1323_v54 }
 0x4cc   :  { %v6670_v57 = vpop.eup %6669 }
 0x4cd   :  { %v1325_v1 = vadd.f32 1.0, %v6670_v57  ;;  %v1328_v8 = vmul.f32 -0.5, %v6670_v57  ;;  %v1331_v13 = vand.u32 2147483647, %v6670_v57 }
 0x4cf   :  { %6673 = vlog2.f32 %v1325_v1  ;;  %v1329_v12 = vadd.f32 1.0, %v1328_v8  ;;  %vm1332_vm11 = vcmp.lt.f32.partialorder %v1331_v13, 0.0004427343 }
 0x4d0   :  { %v6672_v6 = vpop.eup %6671 }
 0x4d1   :  { %v1334_v7 = vadd.f32 1.0, %v6672_v6  ;;  %v1337_v10 = vmul.f32 -0.5, %v6672_v6  ;;  %v1330_v28 = vmul.f32 %v6670_v57, %v1329_v12  ;;  %v1340_v29 = vand.u32 2147483647, %v6672_v6 }
 0x4d3   :  { %6675 = vlog2.f32 %v1334_v7  ;;  %v1338_v25 = vadd.f32 1.0, %v1337_v10  ;;  %vm1341_vm12 = vcmp.lt.f32.partialorder %v1340_v29, 0.0004427343 }
 0x4d5   :  { %v1339_v36 = vmul.f32 %v6672_v6, %v1338_v25  ;;  %v7425_v6 = vsel %vm1507_vm15, 1.0, %v6869_v19  ;;  %v7445_v25 = vpop.permute.xlu1 %1602 }
 0x4dc   :  { %v6674_v14 = vpop.eup %6673 }
 0x4dd   :  { %v1327_v26 = vmul.f32 0.6931472, %v6674_v14 }
 0x4df   :  { %v1333_v32 = vsel %vm1332_vm11, %v1330_v28, %v1327_v26  ;;  %vm1605_vm11 = vcmp.eq.s32.totalorder %v7445_v25, 1 }
 0x4e0   :  { %v6676_v33 = vpop.eup %6675  ;;  %v1343_v38 = vadd.f32 %v1333_v32, %v1311_v34 }
 0x4e1   :  { %v1336_v35 = vmul.f32 0.6931472, %v6676_v33 }
 0x4e2   :  { %v1345_v56 = vsel %vm1313_vm14, %v1309_v39, %v1343_v38 }
 0x4e3   :  { %v1342_v45 = vsel %vm1341_vm12, %v1339_v36, %v1336_v35  ;;  %v1347_v50 = vsub.f32 0.0, %v1345_v56  ;;  %vm1604_vm12 = vcmp.eq.s32.totalorder %v7443_v55, 1  ;;  %v6872_v35 = vmov 1   ;;  %v5590_v36 = vld [vmem:[%s8415_s8] ss:$0 sm:$0xff] }
 0x4e4   :  { %v1344_v46 = vadd.f32 %v1342_v45, %v1312_v37  ;;  %v1077_v37 = vadd.f32 %v5590_v36, %v7406_v60  ;;  %v1078_v45 = vadd.f32 %v5590_v36, %v7408_v9  ;;  %v7478_v9 = vld [vmem:[%s8416_s6] sm:$0xff] }
 0x4e6   :  { %v1346_v47 = vsel %vm1314_vm13, %v1310_v58, %v1344_v46  ;;  %vm2723_vm13 = vcmask 392192  }
 0x4e7   :  { %v1348_v49 = vsub.f32 0.0, %v1346_v47 }
 0x4e9   :  { %6215 = vmatprep.subr.mxu0 %v1348_v49 }
 0x4ea   :  { %6216 = vmatpush3.msra.mxu0 %v1348_v49 }
 0x4eb   :  { %6217 = vmatprep.subr.mxu0 %v1347_v50 }
 0x4ec   :  { %6218 = vmatpush3.msra.mxu0 %v1347_v50 }
 0x4ed   :  { %6220 = vmatmul.mubr.msk.f32.vlgmr.msra.gmra.mxu0 %vm264_vm4, %v7132_v2 }
 0x4ee   :  { %6226 = vmatprep.mubr.msk.f32.mxu0 %vm264_vm4, %v7069_v42 }
 0x5ad   :  { %v6221_v53 = vpop.f32.mrf.mxu0 }
 0x5ae   :  { %v1425_v54 = vsel %vm575_vm8, %v6221_v53, 0.0 }
 0x5af   :  { %v1427_v57 = vadd.f32 %v1425_v54, %v1348_v49  ;;  %v1415_v1 = vpop.f32.mrf.mxu0  ;;  %v7483_v54 = vld [vmem:[%s8416_s6 + $0x8] sm:$0xff] }
 0x5b0   :  { %v1424_v39 = vsel %vm574_vm9, %v1415_v1, 0.0 }
 0x5b1   :  { %v1426_v58 = vadd.f32 %v1424_v39, %v1347_v50  ;;  %6222 = vmatprep.subr.mxu0 %v1427_v57 }
 0x5b2   :  { %6223 = vmatpush3.msra.mxu0 %v1427_v57 }
 0x5b3   :  { %6224 = vmatprep.subr.mxu0 %v1426_v58 }
 0x5b4   :  { %6225 = vmatpush3.msra.mxu0 %v1426_v58 }
 0x5b5   :  { %6227 = vmatmul.mubr.msk.f32.vlgmr.msra.gmra.mxu0 %vm264_vm4, %v7111_v62 }
 0x5b6   :  { %6233 = vmatprep.mubr.msk.f32.mxu0 %vm264_vm4, %v7425_v6 }
 0x675   :  { %v6228_v7 = vpop.f32.mrf.mxu0 }
 0x676   :  { %v1504_v8 = vsel %vm466_vm3, %v6228_v7, 0.0 }
 0x677   :  { %v1506_v10 = vadd.f32 %v1504_v8, %v1427_v57  ;;  %v1494_v12 = vpop.f32.mrf.mxu0 }
 0x678   :  { %v1503_v13 = vsel %vm465_vm7, %v1494_v12, 0.0 }
 0x679   :  { %v1505_v14 = vadd.f32 %v1503_v13, %v1426_v58  ;;  %6229 = vmatprep.subr.mxu0 %v1506_v10 }
 0x67a   :  { %6230 = vmatpush3.msra.mxu0 %v1506_v10 }
 0x67b   :  { %6231 = vmatprep.subr.mxu0 %v1505_v14 }
 0x67c   :  { %6232 = vmatpush3.msra.mxu0 %v1505_v14 }
 0x67d   :  { %6234 = vmatmul.mubr.msk.f32.vlgmr.msra.gmra.mxu0 %vm264_vm4, %v7435_v40  ;;  %6243 = vmatprep.subr.mxu0 %v7348_v21 }
 0x67e   :  { %6244 = vmatpush3.msra.mxu0 %v7348_v21 }
 0x67f   :  { %6245 = vmatprep.subr.mxu0 %v7338_v11 }
 0x680   :  { %6246 = vmatpush3.msra.mxu0 %v7338_v11 }
 0x73d   :  { %v6235_v26 = vpop.f32.mrf.mxu0 }
 0x73e   :  { %v1607_v28 = vsel %vm1605_vm11, %v6235_v26, 0.0 }
 0x73f   :  { %v7450_v29 = vadd.f32 %v1607_v28, %v1506_v10  ;;  %v1585_v32 = vpop.f32.mrf.mxu0 }
 0x740   :  { %v1606_v33 = vsel %vm1604_vm12, %v1585_v32, 0.0 }
 0x741   :  { %v7455_v34 = vadd.f32 %v1606_v33, %v1505_v14  ;;  %1652 = vperm.xlu0 %6553, %v7450_v29   ;;  %v1611_v46 = vsub.f32 %v1078_v45, %v7450_v29 }
 0x743   :  { %1647 = vperm.xlu1 %6554, %v7455_v34   ;;  %v1610_v38 = vsub.f32 %v1077_v37, %v7455_v34 }
 0x745   :  { %6556 = vset.pattern.permute.xlu0 %v6872_v35 }
 0x76c   :  { %1612 = vxpose.xlu1.b32.start [1/2] (short) (narrow) %v1610_v38, 8  ;;  %v6242_v38 = vpop.f32.mrf.mxu1 }
 0x76e   :  { %v1753_v45 = vpop.f32.mrf.mxu1 }
 0x770   :  { %1613 = vxpose.xlu1.b32.end [2/2] (short) (narrow) %v1611_v46, 8  ;;  %v1762_v46 = vmul.f32 0.25, %v1753_v45 }
 0x78e   :  { %1938 = vrot.lane.b32.xlu1 %v7304_v52, %s6873_s4 }
 0x78f   :  { %6555 = vset.pattern.permute.xlu1 %v6872_v35 }
 0x792   :  { %1905 = vperm.xlu1 %6555, %v7455_v34  }
 0x7bc   :  { %v1653_v49 = vpop.permute.xlu0 %1652 }
 0x7be   :  { %v1648_v47 = vpop.permute.xlu1 %1647 }
 0x7e8   :  { %v7471_v56 = vpop.trf.xlu1 }
 0x7e9   :  { %v1658_v60 = vrot.slane %v7471_v56, %v7185_v18  ;;  %v1915_v8 = vrot.slane %v7471_v56, %v7194_v22 }
 0x7eb   :  { %v1659_v50 = vadd.f32 %v1658_v60, %v1648_v47  ;;  %v1660_v53 = vadd.f32 %v1658_v60, %v1653_v49  ;;  %v1763_v49 = vmul.f32 0.25, %v6242_v38 }
 0x7ed   :  { %v1661_v57 = vadd.f32 %v1659_v50, %v7478_v9  ;;  %v1662_v39 = vadd.f32 %v1660_v53, %v7483_v54 }
 0x7ef   :  { %v1663_v1 = vsel %vm264_vm4, %v1661_v57, -inf  ;;  %v1666_v58 = vsel %vm264_vm4, %v1662_v39, -inf }
 0x7f0   :  { %1664 = vmax.xlane.f32.xlu0 %v1663_v1 }
 0x7f4   :  { %1667 = vmax.xlane.f32.xlu0 %v1666_v58 }
 0x800   :  { %v1939_v7 = vpop.permute.xlu1 %1938 }
 0x801   :  { %6250 = vmatprep.subr.msk.mxu0 %vm264_vm4, %v1939_v7 }
 0x80d   :  { %v1906_v10 = vpop.permute.xlu1 %1905 }
 0x80e   :  { %v1916_v12 = vadd.f32 %v1915_v8, %v1906_v10 }
 0x810   :  { %v7493_v13 = vadd.f32 %v1916_v12, %v7478_v9 }
 0x812   :  { %v1920_v14 = vsel %vm264_vm4, %v7493_v13, -inf }
 0x813   :  { %1921 = vmax.xlane.f32.xlu1 %v1920_v14 }
 0x879   :  { %v1665_v26 = vpop.xlane.xlu0 %1664 }
 0x87a   :  { %v1669_v28 = vsub.f32 %v1661_v57, %v1665_v26  ;;  %v1774_v57 = vsub.f32 0.0, %v1665_v26 }
 0x87c   :  { %v1671_v32 = vmul.f32 1.442695, %v1669_v28 }
 0x87d   :  { %v1668_v33 = vpop.xlane.xlu0 %1667 }
 0x87e   :  { %6677 = vpow2.f32 %v1671_v32  ;;  %v1670_v36 = vsub.f32 %v1662_v39, %v1668_v33  ;;  %v1776_v39 = vmul.f32 1.442695, %v1774_v57  ;;  %v1775_v10 = vsub.f32 0.0, %v1668_v33 }
 0x880   :  { %v1673_v37 = vmul.f32 1.442695, %v1670_v36  ;;  %v1778_v12 = vmul.f32 1.442695, %v1775_v10 }
 0x882   :  { %6679 = vpow2.f32 %v1673_v37 }
 0x883   :  { %6681 = vpow2.f32 %v1776_v39 }
 0x884   :  { %6683 = vpow2.f32 %v1778_v12 }
 0x88b   :  { %v6678_v47 = vpop.eup %6677 }
 0x88c   :  { %v1764_v60 = vmul.f32 %v6678_v47, %v1762_v46 }
 0x88e   :  { %v1766_v50 = vsel %vm264_vm4, %v1764_v60, 0.0 }
 0x88f   :  { %v6680_v53 = vpop.eup %6679  ;;  %1767 = vadd.xlane.f32.xlu0 %v1766_v50 }
 0x890   :  { %v1765_v1 = vmul.f32 %v6680_v53, %v1763_v49  ;;  %v6682_v32 = vpop.eup %6681 }
 0x891   :  { %v6684_v46 = vpop.eup %6683 }
 0x892   :  { %v1769_v58 = vsel %vm264_vm4, %v1765_v1, 0.0 }
 0x893   :  { %1770 = vadd.xlane.f32.xlu0 %v1769_v58 }
 0x8a9   :  { %1936 = vrot.lane.b32.xlu0 %v7300_v48, %s6873_s4 }
 0x8ad   :  { %1932 = vrot.lane.b32.xlu0 %v7298_v59, %s6873_s4 }
 0x8b1   :  { %1934 = vrot.lane.b32.xlu0 %v7302_v51, %s6873_s4 }
 0x8b5   :  { %1909 = vperm.xlu0 %6556, %v7450_v29  }
 0x918   :  { %v1768_v14 = vpop.xlane.xlu0 %1767 }
 0x919   :  { %v1772_v28 = vand.u32 2147483647, %v1768_v14 }
 0x91b   :  { %v1780_v36 = vmax.f32 %v1772_v28, %v6682_v32 }
 0x91c   :  { %v1771_v37 = vpop.xlane.xlu0 %1770 }
 0x91d   :  { %v1782_v38 = vadd.f32 1e-06, %v1780_v36  ;;  %v1773_v45 = vand.u32 2147483647, %v1771_v37 }
 0x91f   :  { %6685 = vrcp.f32 %v1782_v38  ;;  %v1781_v47 = vmax.f32 %v1773_v45, %v6684_v46 }
 0x920   :  { %v1937_v49 = vpop.permute.xlu0 %1936 }
 0x921   :  { %v1783_v50 = vadd.f32 1e-06, %v1781_v47 }
 0x923   :  { %6687 = vrcp.f32 %v1783_v50 }
 0x924   :  { %v1933_v53 = vpop.permute.xlu0 %1932 }
 0x928   :  { %v1935_v58 = vpop.permute.xlu0 %1934 }
 0x92c   :  { %v6686_v26 = vpop.eup %6685 }
 0x92d   :  { %v1785_v33 = vmul.f32 %v6686_v26, %v1764_v60  ;;  %v6874_v60 = vmov 2  }
 0x92e   :  { %6557 = vset.pattern.permute.xlu0 %v6874_v60  ;;  %6558 = vset.pattern.permute.xlu1 %v6874_v60 }
 0x92f   :  { %6247 = vmatprep.mubr.msk.f32.mxu0 %vm264_vm4, %v1785_v33 }
 0x930   :  { %v6688_v57 = vpop.eup %6687  ;;  %v1910_v39 = vpop.permute.xlu0 %1909 }
 0x931   :  { %v1917_v10 = vadd.f32 %v1915_v8, %v1910_v39  ;;  %v1787_v12 = vmul.f32 %v6688_v57, %v1765_v1  ;;  %v1922_v1 = vpop.xlane.xlu1 %1921  ;;  %v6876_v39 = vmov 3  }
 0x933   :  { %6248 = vmatmul.mubr.msk.f32.vlgmr.msra.gmra.mxu0 %vm264_vm4, %v1787_v12  ;;  %v1919_v14 = vadd.f32 %v1917_v10, %v7483_v54  ;;  %v2035_v12 = vsub.f32 0.0, %v1922_v1 }
 0x934   :  { %6251 = vmatpush3.xpose.msk.msra.mxu0 %vm264_vm4, %v1939_v7  ;;  %6254 = vmatprep.mubr.msk.f32.mxu0 %vm264_vm4, %v1933_v53  ;;  %v1926_v7 = vsub.f32 %v7493_v13, %v1922_v1 }
 0x935   :  { %6252 = vmatprep.subr.msk.mxu0 %vm264_vm4, %v1937_v49  ;;  %v1923_v28 = vsel %vm264_vm4, %v1919_v14, -inf }
 0x936   :  { %1924 = vmax.xlane.f32.xlu0 %v1923_v28  ;;  %v1928_v37 = vmul.f32 1.442695, %v1926_v7  ;;  %v2037_v28 = vmul.f32 1.442695, %v2035_v12 }
 0x938   :  { %6253 = vmatpush3.xpose.msk.msra.mxu0 %vm264_vm4, %v1937_v49 }
 0x93b   :  { %6255 = vmatmul.mubr.msk.f32.vlgmr.msra.gmra.mxu0 %vm264_vm4, %v1935_v58 }
 0x9bf   :  { %v1925_v8 = vpop.xlane.xlu0 %1924 }
 0x9c0   :  { %v1927_v32 = vsub.f32 %v1919_v14, %v1925_v8  ;;  %v2036_v10 = vsub.f32 0.0, %v1925_v8 }
 0x9c2   :  { %v1930_v36 = vmul.f32 1.442695, %v1927_v32  ;;  %v2039_v14 = vmul.f32 1.442695, %v2036_v10 }
 0x9c4   :  { %6689 = vpow2.f32 %v1930_v36 }
 0x9c5   :  { %6691 = vpow2.f32 %v1928_v37 }
 0x9c6   :  { %6693 = vpow2.f32 %v2039_v14  ;;  %v2180_v14 = vrot.slane %v7471_v56, %v7203_v27 }
 0x9c7   :  { %6695 = vpow2.f32 %v2037_v28 }
 0x9d1   :  { %v6690_v49 = vpop.eup %6689 }
 0x9d2   :  { %v6692_v58 = vpop.eup %6691 }
 0x9d3   :  { %v6694_v36 = vpop.eup %6693 }
 0x9f3   :  { %v7518_v38 = vpop.f32.mrf.mxu0 }
 0x9f5   :  { %v7520_v45 = vpop.f32.mrf.mxu0 }
 0x9fb   :  { %v6256_v46 = vpop.f32.mrf.mxu0 }
 0x9fc   :  { %v2024_v47 = vmul.f32 0.25, %v6256_v46 }
 0x9fd   :  { %v2014_v50 = vpop.f32.mrf.mxu0 }
 0x9fe   :  { %v2023_v53 = vmul.f32 0.25, %v2014_v50  ;;  %v2026_v26 = vmul.f32 %v6690_v49, %v2024_v47  ;;  %v6696_v49 = vpop.eup %6695 }
 0xa00   :  { %v2030_v33 = vsel %vm264_vm4, %v2026_v26, 0.0  ;;  %v2025_v57 = vmul.f32 %v6692_v58, %v2023_v53 }
 0xa01   :  { %2031 = vadd.xlane.f32.xlu1 %v2030_v33 }
 0xa02   :  { %v2027_v13 = vsel %vm264_vm4, %v2025_v57, 0.0 }
 0xa03   :  { %2028 = vadd.xlane.f32.xlu0 %v2027_v13 }
 0xa12   :  { %2051 = vrot.lane.b32.xlu1 %v7338_v11, %s6873_s4 }
 0xa16   :  { %2203 = vrot.lane.b32.xlu1 %v7304_v52, %s6875_s7 }
 0xa19   :  { %2053 = vrot.lane.b32.xlu0 %v7348_v21, %s6873_s4 }
 0xa1a   :  { %2201 = vrot.lane.b32.xlu1 %v7300_v48, %s6875_s7 }
 0xa1d   :  { %2197 = vrot.lane.b32.xlu0 %v7298_v59, %s6875_s7 }
 0xa1e   :  { %2199 = vrot.lane.b32.xlu1 %v7302_v51, %s6875_s7 }
 0xa21   :  { %2170 = vperm.xlu0 %6557, %v7455_v34  }
 0xa22   :  { %2174 = vperm.xlu1 %6558, %v7450_v29  }
 0xa25   :  { %6560 = vset.pattern.permute.xlu0 %v6876_v39 }
 0xa26   :  { %6559 = vset.pattern.permute.xlu1 %v6876_v39 }
 0xa8a   :  { %v2032_v32 = vpop.xlane.xlu1 %2031 }
 0xa8b   :  { %v2034_v7 = vand.u32 2147483647, %v2032_v32 }
 0xa8c   :  { %v2029_v37 = vpop.xlane.xlu0 %2028 }
 0xa8d   :  { %v2042_v46 = vmax.f32 %v2034_v7, %v6694_v36  ;;  %v2033_v47 = vand.u32 2147483647, %v2029_v37 }
 0xa8e   :  { %v2052_v50 = vpop.permute.xlu1 %2051 }
 0xa8f   :  { %v2044_v53 = vadd.f32 1e-06, %v2042_v46  ;;  %v2041_v58 = vmax.f32 %v2033_v47, %v6696_v49 }
 0xa90   :  { %v2054_v33 = vpop.permute.xlu0 %2053 }
 0xa91   :  { %v2043_v13 = vadd.f32 1e-06, %v2041_v58  ;;  %6257 = vmatprep.subr.mxu1 %v2054_v33  ;;  %6697 = vrcp.f32 %v2044_v53 }
 0xa92   :  { %v2204_v8 = vpop.permute.xlu1 %2203  ;;  %6258 = vmatpush3.msra.mxu1 %v2054_v33 }
 0xa93   :  { %6699 = vrcp.f32 %v2043_v13  ;;  %6259 = vmatprep.subr.mxu1 %v2052_v50 }
 0xa94   :  { %6260 = vmatpush3.msra.mxu1 %v2052_v50  ;;  %v2198_v10 = vpop.permute.xlu0 %2197 }
 0xa95   :  { %6264 = vmatprep.subr.msk.mxu1 %vm264_vm4, %v2204_v8 }
 0xa96   :  { %v2202_v1 = vpop.permute.xlu1 %2201 }
 0xa9a   :  { %v2200_v12 = vpop.permute.xlu1 %2199 }
 0xa9c   :  { %v2171_v28 = vpop.permute.xlu0 %2170 }
 0xa9d   :  { %v2181_v32 = vadd.f32 %v2180_v14, %v2171_v28 }
 0xa9e   :  { %v2175_v7 = vpop.permute.xlu1 %2174  ;;  %v6698_v36 = vpop.eup %6697 }
 0xa9f   :  { %v2182_v37 = vadd.f32 %v2180_v14, %v2175_v7  ;;  %v2183_v46 = vadd.f32 %v2181_v32, %v7478_v9  ;;  %v2048_v58 = vmul.f32 %v6698_v36, %v2026_v26 }
 0xaa0   :  { %v6700_v47 = vpop.eup %6699 }
 0xaa1   :  { %v2185_v49 = vsel %vm264_vm4, %v2183_v46, -inf  ;;  %v2046_v53 = vmul.f32 %v6700_v47, %v2025_v57  ;;  %v2184_v50 = vadd.f32 %v2182_v37, %v7483_v54 }
 0xaa2   :  { %2186 = vmax.xlane.f32.xlu1 %v2185_v49 }
 0xaa3   :  { %6261 = vmatprep.mubr.msk.f32.mxu1 %vm264_vm4, %v2046_v53  ;;  %v2188_v33 = vsel %vm264_vm4, %v2184_v50, -inf }
 0xaa4   :  { %2189 = vmax.xlane.f32.xlu0 %v2188_v33  ;;  %6262 = vmatmul.mubr.msk.f32.vlgmr.msra.gmra.mxu1 %vm264_vm4, %v2048_v58 }
 0xaa5   :  { %6265 = vmatpush3.xpose.msk.msra.mxu1 %vm264_vm4, %v2204_v8  ;;  %6268 = vmatprep.mubr.msk.f32.mxu1 %vm264_vm4, %v2198_v10 }
 0xaa6   :  { %6266 = vmatprep.subr.msk.mxu1 %vm264_vm4, %v2202_v1 }
 0xaa9   :  { %6267 = vmatpush3.xpose.msk.msra.mxu1 %vm264_vm4, %v2202_v1 }
 0xaac   :  { %6269 = vmatmul.mubr.msk.f32.vlgmr.msra.gmra.mxu1 %vm264_vm4, %v2200_v12 }
 0xab3   :  { %2316 = vrot.lane.b32.xlu1 %v7348_v21, %s6875_s7 }
 0xab7   :  { %2466 = vrot.lane.b32.xlu1 %v7304_v52, %s6877_s15 }
 0xabb   :  { %2464 = vrot.lane.b32.xlu1 %v7300_v48, %s6877_s15  ;;  %v2443_v48 = vrot.slane %v7471_v56, %v7188_v20 }
 0xabf   :  { %2460 = vrot.lane.b32.xlu1 %v7298_v59, %s6877_s15 }
 0xac3   :  { %2433 = vperm.xlu1 %6559, %v7455_v34  }
 0xac7   :  { %6562 = vset.pattern.permute.xlu1 %v6871_v44 }
 0xb2b   :  { %v2187_v26 = vpop.xlane.xlu1 %2186 }
 0xb2c   :  { %v2191_v14 = vsub.f32 %v2183_v46, %v2187_v26 }
 0xb2d   :  { %v2190_v12 = vpop.xlane.xlu0 %2189 }
 0xb2e   :  { %v2192_v28 = vsub.f32 %v2184_v50, %v2190_v12  ;;  %v2193_v32 = vmul.f32 1.442695, %v2191_v14  ;;  %v2300_v50 = vsub.f32 0.0, %v2187_v26 }
 0xb2f   :  { %v2317_v57 = vpop.permute.xlu1 %2316 }
 0xb30   :  { %6271 = vmatprep.subr.mxu0 %v2317_v57  ;;  %v2195_v7 = vmul.f32 1.442695, %v2192_v28  ;;  %6701 = vpow2.f32 %v2193_v32 }
 0xb31   :  { %6272 = vmatpush3.msra.mxu0 %v2317_v57 }
 0xb32   :  { %6703 = vpow2.f32 %v2195_v7 }
 0xb33   :  { %v7564_v13 = vpop.permute.xlu1 %2466 }
 0xb37   :  { %v7566_v8 = vpop.permute.xlu1 %2464 }
 0xb3b   :  { %v7568_v1 = vpop.permute.xlu1 %2460 }
 0xb3d   :  { %v6702_v53 = vpop.eup %6701 }
 0xb3f   :  { %v2434_v52 = vpop.permute.xlu1 %2433  ;;  %v6704_v33 = vpop.eup %6703 }
 0xb40   :  { %v2444_v10 = vadd.f32 %v2443_v48, %v2434_v52 }
 0xb42   :  { %v7573_v59 = vadd.f32 %v2444_v10, %v7478_v9  ;;  %v2302_v10 = vmul.f32 1.442695, %v2300_v50 }
 0xb44   :  { %v2448_v34 = vsel %vm264_vm4, %v7573_v59, -inf  ;;  %6705 = vpow2.f32 %v2302_v10 }
 0xb45   :  { %2449 = vmax.xlane.f32.xlu1 %v2448_v34  ;;  %v2301_v34 = vsub.f32 0.0, %v2190_v12 }
 0xb47   :  { %v2304_v14 = vmul.f32 1.442695, %v2301_v34 }
 0xb49   :  { %6707 = vpow2.f32 %v2304_v14 }
 0xb51   :  { %v6706_v7 = vpop.eup %6705 }
 0xb64   :  { %v7577_v36 = vpop.f32.mrf.mxu1 }
 0xb66   :  { %v7579_v37 = vpop.f32.mrf.mxu1 }
 0xb6c   :  { %v6270_v56 = vpop.f32.mrf.mxu1 }
 0xb6d   :  { %v2289_v49 = vmul.f32 0.25, %v6270_v56 }
 0xb6e   :  { %v2279_v47 = vpop.f32.mrf.mxu1 }
 0xb6f   :  { %v2288_v9 = vmul.f32 0.25, %v2279_v47  ;;  %v2291_v52 = vmul.f32 %v6704_v33, %v2289_v49 }
 0xb71   :  { %v2290_v58 = vmul.f32 %v6702_v53, %v2288_v9  ;;  %v2295_v46 = vsel %vm264_vm4, %v2291_v52, 0.0  ;;  %v6708_v53 = vpop.eup %6707 }
 0xb73   :  { %v2292_v57 = vsel %vm264_vm4, %v2290_v58, 0.0 }
 0xb74   :  { %2293 = vadd.xlane.f32.xlu0 %v2292_v57 }
 0xb78   :  { %2296 = vadd.xlane.f32.xlu0 %v2295_v46 }
 0xb8e   :  { %2314 = vrot.lane.b32.xlu0 %v7338_v11, %s6875_s7 }
 0xb92   :  { %2462 = vrot.lane.b32.xlu0 %v7302_v51, %s6877_s15 }
 0xb96   :  { %2437 = vperm.xlu0 %6560, %v7450_v29  }
 0xb9a   :  { %6561 = vset.pattern.permute.xlu0 %v6871_v44 }
 0xbfd   :  { %v2294_v28 = vpop.xlane.xlu0 %2293 }
 0xbfe   :  { %v2298_v32 = vand.u32 2147483647, %v2294_v28 }
 0xc00   :  { %v2306_v56 = vmax.f32 %v2298_v32, %v6706_v7 }
 0xc01   :  { %v2297_v47 = vpop.xlane.xlu0 %2296 }
 0xc02   :  { %v2308_v49 = vadd.f32 1e-06, %v2306_v56  ;;  %v2299_v9 = vand.u32 2147483647, %v2297_v47 }
 0xc04   :  { %6709 = vrcp.f32 %v2308_v49  ;;  %v2307_v51 = vmax.f32 %v2299_v9, %v6708_v53 }
 0xc05   :  { %v2315_v33 = vpop.permute.xlu0 %2314 }
 0xc06   :  { %v2309_v29 = vadd.f32 1e-06, %v2307_v51  ;;  %6273 = vmatprep.subr.mxu0 %v2315_v33 }
 0xc07   :  { %6274 = vmatpush3.msra.mxu0 %v2315_v33 }
 0xc08   :  { %6711 = vrcp.f32 %v2309_v29  ;;  %6278 = vmatprep.subr.msk.mxu0 %vm264_vm4, %v7564_v13  ;;  %v2138_v29 = vsel %vm264_vm4, %v7579_v37, 0.0 }
 0xc09   :  { %v2463_v44 = vpop.permute.xlu0 %2462 }
 0xc11   :  { %v6710_v26 = vpop.eup %6709  ;;  %v2438_v12 = vpop.permute.xlu0 %2437 }
 0xc12   :  { %v2445_v57 = vadd.f32 %v2443_v48, %v2438_v12  ;;  %v2311_v46 = vmul.f32 %v6710_v26, %v2290_v58  ;;  %v2450_v48 = vpop.xlane.xlu1 %2449 }
 0xc14   :  { %6275 = vmatprep.mubr.msk.f32.mxu0 %vm264_vm4, %v2311_v46  ;;  %v2447_v50 = vadd.f32 %v2445_v57, %v7483_v54  ;;  %v2563_v57 = vsub.f32 0.0, %v2450_v48 }
 0xc15   :  { %v6712_v10 = vpop.eup %6711 }
 0xc16   :  { %v2451_v34 = vsel %vm264_vm4, %v2447_v50, -inf  ;;  %v2313_v14 = vmul.f32 %v6712_v10, %v2291_v52 }
 0xc17   :  { %2452 = vmax.xlane.f32.xlu0 %v2451_v34 }
 0xc18   :  { %6276 = vmatmul.mubr.msk.f32.vlgmr.msra.gmra.mxu0 %vm264_vm4, %v2313_v14 }
 0xc19   :  { %6279 = vmatpush3.xpose.msk.msra.mxu0 %vm264_vm4, %v7564_v13  ;;  %6282 = vmatprep.mubr.msk.f32.mxu0 %vm264_vm4, %v7568_v1  ;;  %v2454_v13 = vsub.f32 %v7573_v59, %v2450_v48 }
 0xc1a   :  { %6280 = vmatprep.subr.msk.mxu0 %vm264_vm4, %v7566_v8 }
 0xc1b   :  { %v2456_v1 = vmul.f32 1.442695, %v2454_v13 }
 0xc1d   :  { %6281 = vmatpush3.xpose.msk.msra.mxu0 %vm264_vm4, %v7566_v8 }
 0xc1e   :  { %6304 = vmatprep.subr.bf16.mxu0 %v6869_v19 }
 0xc20   :  { %6283 = vmatmul.mubr.msk.f32.vlgmr.msra.gmra.mxu0 %vm264_vm4, %v2463_v44  ;;  %v2141_v44 = vsel %vm264_vm4, %v7577_v36, 0.0 }
 0xc21   :  { %6308 = vmatprep.mubr.msk.bf16.mxu0 %vm6870_vm1, %v6869_v19 }
 0xca0   :  { %v2453_v54 = vpop.xlane.xlu0 %2452 }
 0xca1   :  { %v2455_v58 = vsub.f32 %v2447_v50, %v2453_v54 }
 0xca3   :  { %v2458_v52 = vmul.f32 1.442695, %v2455_v58 }
 0xca5   :  { %6713 = vpow2.f32 %v2458_v52 }
 0xca6   :  { %6715 = vpow2.f32 %v2456_v1 }
 0xcb2   :  { %v6714_v56 = vpop.eup %6713 }
 0xcb3   :  { %v6716_v53 = vpop.eup %6715 }
 0xcd8   :  { %v7608_v28 = vpop.f32.mrf.mxu0 }
 0xcd9   :  { %v2404_v26 = vsel %vm264_vm4, %v7608_v28, 0.0 }
 0xcda   :  { %v7610_v32 = vpop.f32.mrf.mxu0 }
 0xcdb   :  { %v2401_v12 = vsel %vm264_vm4, %v7610_v32, 0.0 }
 0xce0   :  { %v6284_v8 = vpop.f32.mrf.mxu0 }
 0xce1   :  { %v2552_v7 = vmul.f32 0.25, %v6284_v8 }
 0xce2   :  { %v2542_v47 = vpop.f32.mrf.mxu0 }
 0xce3   :  { %v2551_v49 = vmul.f32 0.25, %v2542_v47  ;;  %v2554_v9 = vmul.f32 %v6714_v56, %v2552_v7 }
 0xce5   :  { %v2558_v51 = vsel %vm264_vm4, %v2554_v9, 0.0  ;;  %v2553_v33 = vmul.f32 %v6716_v53, %v2551_v49 }
 0xce6   :  { %2559 = vadd.xlane.f32.xlu1 %v2558_v51 }
 0xce7   :  { %v2555_v59 = vsel %vm264_vm4, %v2553_v33, 0.0 }
 0xce8   :  { %2556 = vadd.xlane.f32.xlu0 %v2555_v59 }
 0xcf7   :  { %2577 = vrot.lane.b32.xlu1 %v7338_v11, %s6877_s15  ;;  %v2564_v11 = vsub.f32 0.0, %v2453_v54 }
 0xcf9   :  { %v2567_v46 = vmul.f32 1.442695, %v2564_v11 }
 0xcfb   :  { %6717 = vpow2.f32 %v2567_v46 }
 0xcfe   :  { %2579 = vrot.lane.b32.xlu0 %v7348_v21, %s6877_s15  ;;  %v2565_v21 = vmul.f32 1.442695, %v2563_v57 }
 0xd00   :  { %6719 = vpow2.f32 %v2565_v21 }
 0xd08   :  { %v6718_v34 = vpop.eup %6717 }
 0xd0d   :  { %v6720_v52 = vpop.eup %6719 }
 0xd1b   :  { %2139 = vadd.xlane.f32.xlu1 %v2138_v29 }
 0xd1d   :  { %2142 = vadd.xlane.f32.xlu0 %v2141_v44 }
 0xd1f   :  { %2405 = vadd.xlane.f32.xlu1 %v2404_v26 }
 0xd21   :  { %2402 = vadd.xlane.f32.xlu0 %v2401_v12 }
 0xd6f   :  { %v2560_v50 = vpop.xlane.xlu1 %2559 }
 0xd70   :  { %v2562_v10 = vand.u32 2147483647, %v2560_v50 }
 0xd71   :  { %v2557_v14 = vpop.xlane.xlu0 %2556 }
 0xd72   :  { %v2570_v58 = vmax.f32 %v2562_v10, %v6718_v34  ;;  %v2561_v13 = vand.u32 2147483647, %v2557_v14  ;;  %v1872_v14 = vsel %vm264_vm4, %v7518_v38, 0.0 }
 0xd73   :  { %v2578_v47 = vpop.permute.xlu1 %2577 }
 0xd74   :  { %v2572_v1 = vadd.f32 1e-06, %v2570_v58  ;;  %v2569_v8 = vmax.f32 %v2561_v13, %v6720_v52 }
 0xd75   :  { %v2580_v7 = vpop.permute.xlu0 %2579 }
 0xd76   :  { %v2571_v56 = vadd.f32 1e-06, %v2569_v8  ;;  %6285 = vmatprep.subr.mxu1 %v2580_v7  ;;  %6721 = vrcp.f32 %v2572_v1 }
 0xd77   :  { %6286 = vmatpush3.msra.mxu1 %v2580_v7 }
 0xd78   :  { %6723 = vrcp.f32 %v2571_v56  ;;  %6287 = vmatprep.subr.mxu1 %v2578_v47 }
 0xd79   :  { %6288 = vmatpush3.msra.mxu1 %v2578_v47 }
 0xd7a   :  { %6292 = vmatprep.subr.bf16.mxu1 %v6869_v19 }
 0xd83   :  { %v6722_v54 = vpop.eup %6721 }
 0xd84   :  { %v2576_v53 = vmul.f32 %v6722_v54, %v2554_v9 }
 0xd85   :  { %v6724_v48 = vpop.eup %6723 }
 0xd86   :  { %v2574_v49 = vmul.f32 %v6724_v48, %v2553_v33 }
 0xd88   :  { %6289 = vmatprep.mubr.msk.f32.mxu1 %vm264_vm4, %v2574_v49 }
 0xd89   :  { %6290 = vmatmul.mubr.msk.f32.vlgmr.msra.gmra.mxu1 %vm264_vm4, %v2576_v53 }
 0xd8a   :  { %6300 = vmatprep.mubr.msk.bf16.mxu1 %vm6870_vm1, %v6869_v19 }
 0xda4   :  { %v2140_v51 = vpop.xlane.xlu1 %2139 }
 0xda5   :  { %v2144_v26 = vmul.f32 0.0625, %v2140_v51 }
 0xda6   :  { %v2143_v59 = vpop.xlane.xlu0 %2142 }
 0xda7   :  { %v2145_v29 = vmul.f32 0.0625, %v2143_v59  ;;  %v7636_v21 = vsub.f32 %v7579_v37, %v2144_v26  ;;  %v1869_v37 = vsel %vm264_vm4, %v7520_v45, 0.0  ;;  %v7674_v26 = vld [vmem:[%s8379_s21] ss:$0 sm:$0xff] }
 0xda8   :  { %v2406_v44 = vpop.xlane.xlu1 %2405 }
 0xda9   :  { %v7632_v57 = vsub.f32 %v7577_v36, %v2145_v29  ;;  %v2408_v46 = vmul.f32 0.0625, %v2406_v44  ;;  %v2148_v13 = vmul.f32 %v7636_v21, %v7636_v21 }
 0xdaa   :  { %v2403_v12 = vpop.xlane.xlu0 %2402 }
 0xdab   :  { %v2407_v50 = vmul.f32 0.0625, %v2403_v12  ;;  %v7640_v34 = vsub.f32 %v7608_v28, %v2408_v46  ;;  %v2149_v36 = vmul.f32 %v7632_v57, %v7632_v57  ;;  %v2150_v1 = vsel %vm264_vm4, %v2148_v13, 0.0 }
 0xdad   :  { %v7647_v58 = vsub.f32 %v7610_v32, %v2407_v50  ;;  %v2153_v28 = vsel %vm264_vm4, %v2149_v36, 0.0  ;;  %v2412_v52 = vmul.f32 %v7640_v34, %v7640_v34 }
 0xdaf   :  { %v2411_v8 = vmul.f32 %v7647_v58, %v7647_v58  ;;  %v2416_v32 = vsel %vm264_vm4, %v2412_v52, 0.0 }
 0xdb1   :  { %v2413_v7 = vsel %vm264_vm4, %v2411_v8, 0.0 }
 0xe49   :  { %v6291_v11 = vpop.f32.mrf.mxu1 }
 0xe4a   :  { %v2667_v9 = vsel %vm264_vm4, %v6291_v11, 0.0 }
 0xe4b   :  { %2668 = vadd.xlane.f32.xlu1 %v2667_v9  ;;  %v2655_v33 = vpop.f32.mrf.mxu1 }
 0xe4c   :  { %v2664_v10 = vsel %vm264_vm4, %v2655_v33, 0.0 }
 0xe4d   :  { %2665 = vadd.xlane.f32.xlu0 %v2664_v10 }
 0xe4f   :  { %1873 = vadd.xlane.f32.xlu1 %v1872_v14 }
 0xe51   :  { %1870 = vadd.xlane.f32.xlu0 %v1869_v37 }
 0xe53   :  { %2154 = vadd.xlane.f32.xlu1 %v2153_v28 }
 0xe55   :  { %2151 = vadd.xlane.f32.xlu0 %v2150_v1 }
 0xe57   :  { %2417 = vadd.xlane.f32.xlu1 %v2416_v32 }
 0xe59   :  { %2414 = vadd.xlane.f32.xlu0 %v2413_v7 }
 0xed4   :  { %v2669_v56 = vpop.xlane.xlu1 %2668 }
 0xed5   :  { %v2671_v47 = vmul.f32 0.0625, %v2669_v56 }
 0xed6   :  { %v2666_v54 = vpop.xlane.xlu0 %2665 }
 0xed7   :  { %v7661_v48 = vsub.f32 %v6291_v11, %v2671_v47  ;;  %v2670_v49 = vmul.f32 0.0625, %v2666_v54 }
 0xed8   :  { %v1874_v12 = vpop.xlane.xlu1 %1873 }
 0xed9   :  { %v7663_v53 = vsub.f32 %v2655_v33, %v2670_v49  ;;  %v2675_v51 = vmul.f32 %v7661_v48, %v7661_v48  ;;  %v1877_v46 = vmul.f32 0.0625, %v1874_v12 }
 0xeda   :  { %v1871_v11 = vpop.xlane.xlu0 %1870 }
 0xedb   :  { %v2679_v59 = vsel %vm264_vm4, %v2675_v51, 0.0  ;;  %v2674_v29 = vmul.f32 %v7663_v53, %v7663_v53  ;;  %v1876_v9 = vmul.f32 0.0625, %v1871_v11  ;;  %v7683_v33 = vsub.f32 %v7518_v38, %v1877_v46  ;;  %v6609_v51 = vld [vmem:[%s8380_s22 + $0x18] sm:$0xff]   ;;  %v6610_v11 = vld [vmem:[%s8380_s22 + $0x10] sm:$0xff]  }
 0xedc   :  { %2680 = vadd.xlane.f32.xlu1 %v2679_v59  ;;  %v2155_v13 = vpop.xlane.xlu1 %2154  ;;  %6293 = vmatpush3.bf16.msra.mxu1 %v6609_v51 }
 0xedd   :  { %v2676_v44 = vsel %vm264_vm4, %v2674_v29, 0.0  ;;  %v7686_v50 = vsub.f32 %v7520_v45, %v1876_v9  ;;  %v1881_v10 = vmul.f32 %v7683_v33, %v7683_v33  ;;  %v2157_v52 = vmul.f32 0.0625, %v2155_v13  ;;  %6294 = vmatprep.subr.bf16.mxu1 %v6869_v19 }
 0xede   :  { %2677 = vadd.xlane.f32.xlu0 %v2676_v44  ;;  %v2152_v28 = vpop.xlane.xlu0 %2151 }
 0xedf   :  { %v1880_v14 = vmul.f32 %v7686_v50, %v7686_v50  ;;  %v1885_v36 = vsel %vm264_vm4, %v1881_v10, 0.0  ;;  %v2156_v38 = vmul.f32 0.0625, %v2152_v28  ;;  %v2159_v45 = vadd.f32 1e-05, %v2157_v52 }
 0xee0   :  { %v2418_v1 = vpop.xlane.xlu1 %2417  ;;  %6295 = vmatpush3.bf16.msra.mxu1 %v6610_v11 }
 0xee1   :  { %v1882_v37 = vsel %vm264_vm4, %v1880_v14, 0.0  ;;  %v2420_v32 = vmul.f32 0.0625, %v2418_v1  ;;  %v2158_v7 = vadd.f32 1e-05, %v2156_v38  ;;  %6725 = vrsqrt.f32 %v2159_v45  ;;  %6296 = vmatprep.subr.bf16.mxu1 %v6869_v19 }
 0xee2   :  { %v2415_v8 = vpop.xlane.xlu0 %2414 }
 0xee3   :  { %v2419_v56 = vmul.f32 0.0625, %v2415_v8  ;;  %v2422_v47 = vadd.f32 1e-05, %v2420_v32  ;;  %6727 = vrsqrt.f32 %v2158_v7 }
 0xee5   :  { %v2421_v54 = vadd.f32 1e-05, %v2419_v56  ;;  %6729 = vrsqrt.f32 %v2422_v47 }
 0xee7   :  { %6731 = vrsqrt.f32 %v2421_v54 }
 0xeed   :  { %2427 = vrot.lane.b32.xlu1 %v7674_v26, %s6875_s7 }
 0xeee   :  { %v6726_v59 = vpop.eup %6725 }
 0xef0   :  { %v6728_v44 = vpop.eup %6727 }
 0xef1   :  { %2690 = vrot.lane.b32.xlu1 %v7674_v26, %s6877_s15 }
 0xef2   :  { %v6730_v10 = vpop.eup %6729 }
 0xef3   :  { %v2426_v8 = vmul.f32 %v6730_v10, %v7640_v34  ;;  %v6612_v34 = vld [vmem:[%s8380_s22] sm:$0xff]  }
 0xef4   :  { %2164 = vrot.lane.b32.xlu0 %v7674_v26, %s6873_s4  ;;  %v6732_v13 = vpop.eup %6731 }
 0xef5   :  { %v2425_v45 = vmul.f32 %v6732_v13, %v7647_v58 }
 0xf13   :  { %1886 = vadd.xlane.f32.xlu0 %v1885_v36  ;;  %v2162_v36 = vmul.f32 %v6728_v44, %v7636_v21 }
 0xf15   :  { %1883 = vadd.xlane.f32.xlu1 %v1882_v37  ;;  %v2163_v37 = vmul.f32 %v6726_v59, %v7632_v57  ;;  %v6611_v57 = vld [vmem:[%s8380_s22 + $0x8] sm:$0xff]   ;;  %v5642_v59 = vmul.f32 -1.442695, %v7136_v4 }
 0xf16   :  { %6297 = vmatpush3.bf16.msra.mxu1 %v6611_v57  ;;  %v5640_v57 = vld [vmem:[%s8378_s20] ss:$0 sm:$0xff] }
 0xf17   :  { %6298 = vmatprep.subr.bf16.mxu1 %v6869_v19 }
 0xf1a   :  { %6299 = vmatpush3.bf16.msra.mxu1 %v6612_v34 }
 0xf65   :  { %v2681_v49 = vpop.xlane.xlu1 %2680 }
 0xf66   :  { %v2683_v29 = vmul.f32 0.0625, %v2681_v49 }
 0xf67   :  { %v2678_v12 = vpop.xlane.xlu0 %2677 }
 0xf68   :  { %v2685_v46 = vadd.f32 1e-05, %v2683_v29  ;;  %v2682_v9 = vmul.f32 0.0625, %v2678_v12  ;;  %v5641_v29 = vmul.f32 -1.442695, %v7118_v0 }
 0xf69   :  { %v2428_v1 = vpop.permute.xlu1 %2427 }
 0xf6a   :  { %6733 = vrsqrt.f32 %v2685_v46  ;;  %v2684_v14 = vadd.f32 1e-05, %v2682_v9  ;;  %v2430_v21 = vmul.f32 %v2428_v1, %v2425_v45  ;;  %v2431_v32 = vmul.f32 %v2428_v1, %v2426_v8 }
 0xf6b   :  { %v2165_v28 = vpop.permute.xlu0 %2164 }
 0xf6c   :  { %6735 = vrsqrt.f32 %v2684_v14  ;;  %v2167_v52 = vmul.f32 %v2165_v28, %v2162_v36  ;;  %v2168_v38 = vmul.f32 %v2165_v28, %v2163_v37 }
 0xf6d   :  { %v2691_v7 = vpop.permute.xlu1 %2690  ;;  %6737 = vpow2.f32 %v5642_v59 }
 0xf6e   :  { %2699 = vrot.lane.b32.xlu1 %v2168_v38, %s6878_s30  ;;  %2697 = vrot.lane.b32.xlu0 %v2167_v52, %s6878_s30  ;;  %6739 = vpow2.f32 %v5641_v29  ;;  %v2733_v29 = vmul.f32 %v5640_v57, %v7234_v31 }
 0xf72   :  { %2705 = vrot.lane.b32.xlu1 %v2430_v21, %s8395_s26  ;;  %2707 = vrot.lane.b32.xlu0 %v2431_v32, %s8395_s26  ;;  %s8417_s26 = smov 32  }
 0xf77   :  { %v6734_v58 = vpop.eup %6733 }
 0xf78   :  { %v2689_v56 = vmul.f32 %v6734_v58, %v7661_v48 }
 0xf79   :  { %v6736_v47 = vpop.eup %6735 }
 0xf7a   :  { %v2688_v54 = vmul.f32 %v6736_v47, %v7663_v53  ;;  %v2694_v49 = vmul.f32 %v2691_v7, %v2689_v56  ;;  %v6738_v53 = vpop.eup %6737 }
 0xf7b   :  { %v6740_v10 = vpop.eup %6739  ;;  %v2744_v14 = vadd.f32 1.0, %v6738_v53 }
 0xf7c   :  { %v2693_v51 = vmul.f32 %v2691_v7, %v2688_v54  ;;  %2715 = vrot.lane.b32.xlu0 %v2694_v49, %s8393_s25  ;;  %v2743_v36 = vadd.f32 1.0, %v6740_v10 }
 0xf7e   :  { %2713 = vrot.lane.b32.xlu1 %v2693_v51, %s8393_s25  ;;  %s6881_s25 = smov [#allocation2]  }
 0xf7f   :  { %s5527_s2 = sshll.u32 %s6881_s25, 4  ;;  %s5528_s2 = int_to_ptr.vmem [resolvable:$true] %s5527_s2 }
 0xf80   :  { %p6852_p1 = scmp.lt.s32.totalorder %s5528_s2, %s5528_s2 }
 0xf9c   :  { %v1887_v44 = vpop.xlane.xlu0 %1886 }
 0xf9d   :  { %v1889_v11 = vmul.f32 0.0625, %v1887_v44 }
 0xf9e   :  { %v1884_v12 = vpop.xlane.xlu1 %1883 }
 0xf9f   :  { %v1888_v48 = vmul.f32 0.0625, %v1884_v12  ;;  %v1891_v46 = vadd.f32 1e-05, %v1889_v11 }
 0xfa1   :  { %v1890_v9 = vadd.f32 1e-05, %v1888_v48  ;;  %6741 = vrsqrt.f32 %v1891_v46 }
 0xfa3   :  { %6743 = vrsqrt.f32 %v1890_v9 }
 0xfa4   :  { %6745 = vrcp.f32 %v2744_v14 }
 0xfa5   :  { %6747 = vrcp.f32 %v2743_v36 }
 0xfae   :  { %v6742_v37 = vpop.eup %6741 }
 0xfaf   :  { %v1895_v38 = vmul.f32 %v6742_v37, %v7683_v33  ;;  %v2734_v33 = vmul.f32 %v5640_v57, %v7232_v30  ;;  %v6614_v57 = vld [vmem:[%s8409_s3 + $0x10] sm:$0xff]  }
 0xfb0   :  { %v6744_v28 = vpop.eup %6743 }
 0xfb1   :  { %v1894_v1 = vmul.f32 %v6744_v28, %v7686_v50  ;;  %v1903_v45 = vmul.f32 %v7674_v26, %v1895_v38  ;;  %v6746_v32 = vpop.eup %6745 }
 0xfb2   :  { %v6748_v50 = vpop.eup %6747  ;;  %v2750_v49 = vmul.f32 %v6746_v32, %v7136_v4 }
 0xfb3   :  { %v1902_v58 = vmul.f32 %v7674_v26, %v1894_v1  ;;  %v2749_v12 = vmul.f32 %v6748_v50, %v7118_v0 }
 0xfe0   :  { %v2698_v13 = vpop.permute.xlu0 %2697  ;;  %v2700_v52 = vpop.permute.xlu1 %2699 }
 0xfe1   :  { %v2720_v34 = vsel %vm264_vm4, %v1903_v45, %v2700_v52  ;;  %v2719_v47 = vsel %vm264_vm4, %v1902_v58, %v2698_v13  ;;  %v6613_v45 = vld [vmem:[%s8409_s3 + $0x18] sm:$0xff]  }
 0xfe2   :  { %6305 = vmatpush3.bf16.msra.mxu0 %v6613_v45 }
 0xfe3   :  { %6306 = vmatprep.subr.bf16.mxu0 %v6869_v19 }
 0xfe4   :  { %v2708_v8 = vpop.permute.xlu0 %2707  ;;  %v2706_v21 = vpop.permute.xlu1 %2705 }
 0xfe5   :  { %v2722_v7 = vsel %vm89_vm0, %v2720_v34, %v2708_v8  ;;  %v2721_v51 = vsel %vm89_vm0, %v2719_v47, %v2706_v21 }
 0xfe6   :  { %6307 = vmatpush3.bf16.msra.mxu0 %v6614_v57 }
 0xfe7   :  { %6312 = vmatprep.subr.bf16.mxu0 %v6869_v19 }
 0xfee   :  { %v2716_v56 = vpop.permute.xlu0 %2715 }
 0xfef   :  { %v2725_v54 = vsel %vm2723_vm13, %v2722_v7, %v2716_v56 }
 0xff0   :  { %v2736_v59 = vadd.f32 %v2734_v33, %v2725_v54  ;;  %v2714_v44 = vpop.permute.xlu1 %2713  ;;  %v5649_v54 = vld [vmem:[%s8410_s5 + $0x1] ss:$0 sm:$0xff]  ;;  %s6847_s5 = scalar_lea.vmem %s5528_s2, 256 }
 0xff1   :  { %v2724_v26 = vsel %vm2723_vm13, %v2721_v51, %v2714_v44  ;;  %p6848_p0 = scmp.ne.s32.totalorder %s5528_s2, %s6847_s5  ;;  %p6853_p2 = scmp.lt.s32.totalorder %s6847_s5, %s6847_s5 }
 0xff2   :  { %v2752_v11 = vmul.f32 %v2750_v49, %v2736_v59  ;;  %v2735_v30 = vadd.f32 %v2733_v29, %v2724_v26  ;;  %v6615_v29 = vld [vmem:[%s8411_s28 + $0x18] sm:$0xff]   ;;  %v6616_v26 = vld [vmem:[%s8411_s28 + $0x10] sm:$0xff]  }
 0xff3   :  { %p6854_p3 = por %p6853_p2, %p6852_p1 }
 0xff4   :  { %v2751_v48 = vmul.f32 %v2749_v12, %v2735_v30 }
 0xff5   :  { %p6855_p4 = pnand %p6854_p3, %p6848_p0 }
 0xff6   :  { %v2753_v46 = vpack.c.bf16 %v2752_v11, %v2751_v48 }
 0xff8   :  { %6301 = vmatmul.mubr.msk.bf16.vlgmr.msra.gmra.mxu1 %vm642_vm10, %v2753_v46 }
 0xff9   :  { %6324 = vmatprep.mubr.msk.f32.mxu1 %vm264_vm4, %v7066_v41 }
0x10b8   :  { %v2823_v4 = vpop.f32.mrf.mxu1 }
0x10b9   :  { %v7744_v9 = vadd.f32 %v2823_v4, %v7018_v3 }
0x10ba   :  { %v6302_v53 = vpop.f32.mrf.mxu1 }
0x10bb   :  { %v2832_v31 = vsel %vm89_vm0, %v7744_v9, 0.0 }
0x10bc   :  { %2833 = vadd.xlane.f32.xlu1 %v2832_v31  ;;  %v2826_v10 = vpop.f32.mrf.mxu1 }
0x10bd   :  { %v7749_v0 = vadd.f32 %v2826_v10, %v7023_v5  ;;  %v6617_v10 = vld [vmem:[%s8367_s9 + $0x38] sm:$0xff]  }
0x10be   :  { %v6303_v14 = vpop.f32.mrf.mxu1 }
0x10bf   :  { %v2835_v36 = vsel %vm89_vm0, %v7749_v0, 0.0  ;;  %v6618_v14 = vld [vmem:[%s8368_s10 + $0x38] sm:$0xff]  }
0x10c0   :  { %2836 = vadd.xlane.f32.xlu0 %v2835_v36  ;;  %v6619_v36 = vld [vmem:[%s8367_s9 + $0x30] sm:$0xff]  }
0x1145   :  { %v2834_v37 = vpop.xlane.xlu1 %2833 }
0x1146   :  { %v2838_v41 = vmul.f32 0.03125, %v2834_v37  ;;  %v6620_v37 = vld [vmem:[%s8368_s10 + $0x30] sm:$0xff]  }
0x1148   :  { %v2840_v13 = vsub.f32 %v7744_v9, %v2838_v41  ;;  %v6621_v41 = vld [vmem:[%s8367_s9 + $0x28] sm:$0xff]  }
0x1149   :  { %v2837_v3 = vpop.xlane.xlu0 %2836 }
0x114a   :  { %v2839_v28 = vmul.f32 0.03125, %v2837_v3  ;;  %v2842_v52 = vmul.f32 %v2840_v13, %v2840_v13  ;;  %v6623_v3 = vld [vmem:[%s8367_s9 + $0x20] sm:$0xff]  }
0x114c   :  { %v2841_v38 = vsub.f32 %v7749_v0, %v2839_v28  ;;  %v2844_v1 = vsel %vm89_vm0, %v2842_v52, 0.0  ;;  %v6624_v28 = vld [vmem:[%s8368_s10 + $0x20] sm:$0xff]  }
0x114d   :  { %2845 = vadd.xlane.f32.xlu0 %v2844_v1  ;;  %v5664_v52 = vld [vmem:[%s8413_s27 + $0x4] sm:$0xf] }
0x114e   :  { %v2843_v8 = vmul.f32 %v2841_v38, %v2841_v38  ;;  %v2993_v1 = vrot.slane %v5664_v52, %v7188_v20  ;;  %v3161_v45 = vrot.slane %v5664_v52, %v7194_v22 }
0x1150   :  { %v2847_v5 = vsel %vm89_vm0, %v2843_v8, 0.0 }
0x1151   :  { %2848 = vadd.xlane.f32.xlu0 %v2847_v5 }
0x11d6   :  { %v2846_v21 = vpop.xlane.xlu0 %2845 }
0x11d7   :  { %v2850_v32 = vmul.f32 0.03125, %v2846_v21 }
0x11d9   :  { %v2852_v34 = vadd.f32 1e-05, %v2850_v32 }
0x11da   :  { %v2849_v58 = vpop.xlane.xlu0 %2848 }
0x11db   :  { %6749 = vrsqrt.f32 %v2852_v34  ;;  %v2851_v7 = vmul.f32 0.03125, %v2849_v58 }
0x11dd   :  { %v2853_v33 = vadd.f32 1e-05, %v2851_v7 }
0x11df   :  { %6751 = vrsqrt.f32 %v2853_v33 }
0x11e8   :  { %v6750_v56 = vpop.eup %6749 }
0x11e9   :  { %v2856_v50 = vmul.f32 %v6750_v56, %v2840_v13  ;;  %v6622_v13 = vld [vmem:[%s8368_s10 + $0x28] sm:$0xff]  }
0x11eb   :  { %v2866_v51 = vmul.f32 %v5649_v54, %v2856_v50  ;;  %v3246_v50 = vrot.slane %v5664_v52, %v7203_v27 }
0x11ec   :  { %v6752_v47 = vpop.eup %6751 }
0x11ed   :  { %v2857_v49 = vmul.f32 %v6752_v47, %v2841_v38  ;;  %v3076_v38 = vrot.slane %v5664_v52, %v7185_v18 }
0x11ef   :  { %v2867_v59 = vmul.f32 %v5649_v54, %v2857_v49 }
0x11f1   :  { %v2868_v44 = vpack.c.bf16 %v2867_v59, %v2866_v51 }
0x11f3   :  { %6309 = vmatmul.mubr.msk.bf16.vlgmr.msra.gmra.mxu0 %vm89_vm0, %v2868_v44 }
0x11f4   :  { %6313 = vmatpush3.bf16.msra.mxu0 %v6615_v29  ;;  %6316 = vmatprep.mubr.msk.bf16.mxu0 %vm6870_vm1, %v6869_v19 }
0x11f5   :  { %6314 = vmatprep.subr.bf16.mxu0 %v6869_v19 }
0x11f8   :  { %6315 = vmatpush3.bf16.msra.mxu0 %v6616_v26 }
0x11fb   :  { %6317 = vmatmul.mubr.msk.bf16.vlgmr.msra.gmra.mxu0 %vm89_vm0, %v2868_v44 }
0x11fc   :  { %6331 = vmatprep.mubr.msk.f32.mxu0 %vm264_vm4, %v7069_v42 }
0x12b3   :  { %v7781_v12 = vpop.f32.mrf.mxu0 }
0x12b4   :  { %v2994_v15 = vmul.f32 %v2993_v1, %v7781_v12 }
0x12b5   :  { %v6310_v11 = vpop.f32.mrf.mxu0 }
0x12b7   :  { %v7783_v30 = vpop.f32.mrf.mxu0 }
0x12b8   :  { %6320 = vmatprep.subr.mxu1 %v7783_v30  ;;  %6327 = vmatprep.subr.mxu0 %v7783_v30  ;;  %v3427_v48 = vpack.c.bf16 %v7783_v30, %v7781_v12  ;;  %v2995_v32 = vmul.f32 %v2993_v1, %v7783_v30 }
0x12b9   :  { %v6311_v46 = vpop.f32.mrf.mxu0  ;;  %6321 = vmatpush3.msra.mxu1 %v7783_v30  ;;  %6328 = vmatpush3.msra.mxu0 %v7783_v30 }
0x12ba   :  { %6322 = vmatprep.subr.mxu1 %v7781_v12  ;;  %6329 = vmatprep.subr.mxu0 %v7781_v12 }
0x12bb   :  { %v7793_v4 = vpop.f32.mrf.mxu0  ;;  %6323 = vmatpush3.msra.mxu1 %v7781_v12  ;;  %6330 = vmatpush3.msra.mxu0 %v7781_v12 }
0x12bc   :  { %6325 = vmatmul.mubr.msk.f32.vlgmr.msra.gmra.mxu1 %vm264_vm4, %v7108_v61  ;;  %6332 = vmatmul.mubr.msk.f32.vlgmr.msra.gmra.mxu0 %vm264_vm4, %v7111_v62 }
0x12bd   :  { %6334 = vmatprep.subr.mxu1 %v7783_v30  ;;  %v6318_v53 = vpop.f32.mrf.mxu0  ;;  %6338 = vmatprep.mubr.msk.f32.mxu1 %vm264_vm4, %v7116_v63 }
0x12be   :  { %6335 = vmatpush3.msra.mxu1 %v7783_v30  ;;  %6341 = vmatprep.subr.bf16.mxu0 %v6869_v19  ;;  %v5672_v53 = vld [vmem:[%s8414_s29 + $0x1] ss:$0 sm:$0xff] }
0x12bf   :  { %6336 = vmatprep.subr.mxu1 %v7781_v12  ;;  %v7807_v31 = vpop.f32.mrf.mxu0  ;;  %6349 = vmatprep.mubr.msk.bf16.mxu0 %vm6870_vm1, %v6869_v19  ;;  %v6636_v30 = vld [vmem:[%s8370_s12 + $0x20] sm:$0xff]  }
0x12c0   :  { %6337 = vmatpush3.msra.mxu1 %v7781_v12  ;;  %6342 = vmatpush3.bf16.msra.mxu0 %v6617_v10  ;;  %v6635_v12 = vld [vmem:[%s8371_s13 + $0x20] sm:$0xff]  }
0x12c1   :  { %6339 = vmatmul.mubr.msk.f32.vlgmr.msra.gmra.mxu1 %vm264_vm4, %v7132_v2  ;;  %v6319_v61 = vpop.f32.mrf.mxu0  ;;  %6353 = vmatprep.subr.bf16.mxu1 %v6869_v19 }
0x12c2   :  { %6361 = vmatprep.mubr.msk.bf16.mxu1 %vm6870_vm1, %v6869_v19  ;;  %6354 = vmatpush3.bf16.msra.mxu1 %v6618_v14 }
0x12c3   :  { %6343 = vmatprep.subr.bf16.mxu0 %v6869_v19  ;;  %6355 = vmatprep.subr.bf16.mxu1 %v6869_v19 }
0x12c4   :  { %6344 = vmatpush3.bf16.msra.mxu0 %v6619_v36 }
0x12c5   :  { %6345 = vmatprep.subr.bf16.mxu0 %v6869_v19 }
0x12c6   :  { %6356 = vmatpush3.bf16.msra.mxu1 %v6620_v37 }
0x12c7   :  { %6357 = vmatprep.subr.bf16.mxu1 %v6869_v19 }
0x12c8   :  { %6346 = vmatpush3.bf16.msra.mxu0 %v6621_v41 }
0x12c9   :  { %6347 = vmatprep.subr.bf16.mxu0 %v6869_v19 }
0x12ca   :  { %6358 = vmatpush3.bf16.msra.mxu1 %v6622_v13 }
0x12cb   :  { %6359 = vmatprep.subr.bf16.mxu1 %v6869_v19 }
0x12cc   :  { %6348 = vmatpush3.bf16.msra.mxu0 %v6623_v3 }
0x12cd   :  { %6365 = vmatprep.subr.bf16.mxu0 %v6869_v19 }
0x12ce   :  { %6360 = vmatpush3.bf16.msra.mxu1 %v6624_v28 }
0x12cf   :  { %6377 = vmatprep.subr.bf16.mxu1 %v6869_v19 }
0x137c   :  { %v6326_v8 = vpop.f32.mrf.mxu1  ;;  %v6333_v5 = vpop.f32.mrf.mxu0 }
0x137d   :  { %v3072_v57 = vsel %vm357_vm5, %v6326_v8, 0.0  ;;  %v3157_v21 = vsel %vm466_vm3, %v6333_v5, 0.0 }
0x137e   :  { %v3078_v34 = vmul.f32 %v3076_v38, %v3072_v57  ;;  %v3062_v58 = vpop.f32.mrf.mxu1  ;;  %v3147_v7 = vpop.f32.mrf.mxu0  ;;  %v3163_v54 = vmul.f32 %v3161_v45, %v3157_v21  ;;  %v6625_v21 = vld [vmem:[%s8369_s11 + $0x38] sm:$0xff]  }
0x137f   :  { %v3071_v33 = vsel %vm356_vm6, %v3062_v58, 0.0  ;;  %v3156_v56 = vsel %vm465_vm7, %v3147_v7, 0.0  ;;  %v6626_v58 = vld [vmem:[%s8369_s11 + $0x30] sm:$0xff]  }
0x1380   :  { %v3080_v47 = vadd.f32 %v3078_v34, %v2995_v32  ;;  %v3077_v49 = vmul.f32 %v3076_v38, %v3071_v33  ;;  %v3162_v44 = vmul.f32 %v3161_v45, %v3156_v56  ;;  %v6629_v34 = vld [vmem:[%s8371_s13 + $0x38] sm:$0xff]   ;;  %v6631_v7 = vld [vmem:[%s8371_s13 + $0x30] sm:$0xff]   ;;  %v6627_v33 = vld [vmem:[%s8369_s11 + $0x28] sm:$0xff]  }
0x1381   :  { %v6340_v51 = vpop.f32.mrf.mxu1  ;;  %v6633_v56 = vld [vmem:[%s8371_s13 + $0x28] sm:$0xff]  }
0x1382   :  { %v3165_v59 = vadd.f32 %v3163_v54, %v3080_v47  ;;  %v3079_v29 = vadd.f32 %v3077_v49, %v2994_v15  ;;  %v3242_v26 = vsel %vm575_vm8, %v6340_v51, 0.0  ;;  %v6630_v47 = vld [vmem:[%s8370_s12 + $0x38] sm:$0xff]   ;;  %v6632_v54 = vld [vmem:[%s8370_s12 + $0x30] sm:$0xff]   ;;  %v6634_v15 = vld [vmem:[%s8370_s12 + $0x28] sm:$0xff]  }
0x1383   :  { %v3248_v11 = vmul.f32 %v3246_v50, %v3242_v26  ;;  %v3232_v23 = vpop.f32.mrf.mxu1  ;;  %v6637_v26 = vld [vmem:[%s8372_s14 + $0x38] sm:$0xff]  }
0x1384   :  { %v3164_v46 = vadd.f32 %v3162_v44, %v3079_v29  ;;  %v3241_v61 = vsel %vm574_vm9, %v3232_v23, 0.0 }
0x1385   :  { %v3250_v10 = vadd.f32 %v3248_v11, %v3165_v59  ;;  %v3247_v14 = vmul.f32 %v3246_v50, %v3241_v61  ;;  %v6628_v50 = vld [vmem:[%s8369_s11 + $0x20] sm:$0xff]   ;;  %v6638_v11 = vld [vmem:[%s8375_s17 + $0x38] sm:$0xff]  }
0x1387   :  { %v3260_v36 = vadd.f32 %v5672_v53, %v3250_v10  ;;  %v3249_v37 = vadd.f32 %v3247_v14, %v3164_v46  ;;  %v6639_v10 = vld [vmem:[%s8372_s14 + $0x30] sm:$0xff]  }
0x1388   :  { %v6640_v14 = vld [vmem:[%s8375_s17 + $0x30] sm:$0xff]  }
0x1389   :  { %v5674_v41 = vmul.f32 -1.442695, %v3260_v36  ;;  %v3259_v13 = vadd.f32 %v5672_v53, %v3249_v37  ;;  %v6642_v37 = vld [vmem:[%s8375_s17 + $0x28] sm:$0xff]  }
0x138b   :  { %6753 = vpow2.f32 %v5674_v41  ;;  %v5673_v3 = vmul.f32 -1.442695, %v3259_v13 }
0x138d   :  { %6755 = vpow2.f32 %v5673_v3  ;;  %v6644_v3 = vld [vmem:[%s8375_s17 + $0x20] sm:$0xff]  }
0x1398   :  { %v6754_v28 = vpop.eup %6753 }
0x1399   :  { %v3268_v52 = vadd.f32 1.0, %v6754_v28 }
0x139a   :  { %v6756_v38 = vpop.eup %6755 }
0x139b   :  { %6757 = vrcp.f32 %v3268_v52  ;;  %v3267_v1 = vadd.f32 1.0, %v6756_v38  ;;  %v6645_v38 = vld [vmem:[%s8374_s16 + $0x38] sm:$0xff]  }
0x139d   :  { %6759 = vrcp.f32 %v3267_v1  ;;  %v6646_v1 = vld [vmem:[%s8376_s18 + $0x38] sm:$0xff]  }
0x13a8   :  { %v6758_v8 = vpop.eup %6757 }
0x13a9   :  { %v7873_v45 = vmul.f32 %v6758_v8, %v3260_v36  ;;  %v6641_v36 = vld [vmem:[%s8372_s14 + $0x28] sm:$0xff]  }
0x13aa   :  { %v6760_v5 = vpop.eup %6759 }
0x13ab   :  { %v7875_v57 = vmul.f32 %v6760_v5, %v3259_v13  ;;  %v6643_v13 = vld [vmem:[%s8372_s14 + $0x20] sm:$0xff]  }
0x13ad   :  { %v3275_v32 = vpack.c.bf16 %v7873_v45, %v7875_v57 }
0x13af   :  { %6350 = vmatmul.mubr.msk.bf16.vlgmr.msra.gmra.mxu0 %vm642_vm10, %v3275_v32  ;;  %6362 = vmatmul.mubr.msk.bf16.vlgmr.msra.gmra.mxu1 %vm642_vm10, %v3275_v32  ;;  %v6648_v32 = vld [vmem:[%s8376_s18 + $0x30] sm:$0xff]  }
0x13b0   :  { %6366 = vmatpush3.bf16.msra.mxu0 %v6625_v21  ;;  %6373 = vmatprep.mubr.msk.bf16.mxu0 %vm6870_vm1, %v6869_v19  ;;  %v6647_v21 = vld [vmem:[%s8374_s16 + $0x30] sm:$0xff]  }
0x13b1   :  { %6367 = vmatprep.subr.bf16.mxu0 %v6869_v19  ;;  %6378 = vmatpush3.bf16.msra.mxu1 %v6629_v34  ;;  %v6649_v34 = vld [vmem:[%s8374_s16 + $0x28] sm:$0xff]  }
0x13b2   :  { %6379 = vmatprep.subr.bf16.mxu1 %v6869_v19  ;;  %6385 = vmatprep.mubr.msk.bf16.mxu1 %vm6870_vm1, %v6869_v19 }
0x13b4   :  { %6368 = vmatpush3.bf16.msra.mxu0 %v6626_v58  ;;  %v6650_v58 = vld [vmem:[%s8376_s18 + $0x28] sm:$0xff]  }
0x13b5   :  { %6369 = vmatprep.subr.bf16.mxu0 %v6869_v19  ;;  %6380 = vmatpush3.bf16.msra.mxu1 %v6631_v7  ;;  %v6651_v7 = vld [vmem:[%s8374_s16 + $0x20] sm:$0xff]  }
0x13b6   :  { %6381 = vmatprep.subr.bf16.mxu1 %v6869_v19 }
0x13b8   :  { %6370 = vmatpush3.bf16.msra.mxu0 %v6627_v33  ;;  %v6652_v33 = vld [vmem:[%s8376_s18 + $0x20] sm:$0xff]  }
0x13b9   :  { %6371 = vmatprep.subr.bf16.mxu0 %v6869_v19  ;;  %6382 = vmatpush3.bf16.msra.mxu1 %v6633_v56 }
0x13ba   :  { %6383 = vmatprep.subr.bf16.mxu1 %v6869_v19 }
0x13bc   :  { %6372 = vmatpush3.bf16.msra.mxu0 %v6628_v50 }
0x13bd   :  { %6389 = vmatprep.subr.bf16.mxu0 %v6869_v19  ;;  %6384 = vmatpush3.bf16.msra.mxu1 %v6635_v12 }
0x13be   :  { %6401 = vmatprep.subr.bf16.mxu1 %v6869_v19 }
0x13bf   :  { %6374 = vmatmul.mubr.msk.bf16.vlgmr.msra.gmra.mxu0 %vm642_vm10, %v3427_v48 }
0x13c0   :  { %6390 = vmatpush3.bf16.msra.mxu0 %v6630_v47  ;;  %6397 = vmatprep.mubr.msk.bf16.mxu0 %vm6870_vm1, %v6869_v19 }
0x13c1   :  { %6391 = vmatprep.subr.bf16.mxu0 %v6869_v19 }
0x13c4   :  { %6392 = vmatpush3.bf16.msra.mxu0 %v6632_v54 }
0x13c5   :  { %6393 = vmatprep.subr.bf16.mxu0 %v6869_v19 }
0x13c8   :  { %6394 = vmatpush3.bf16.msra.mxu0 %v6634_v15 }
0x13c9   :  { %6395 = vmatprep.subr.bf16.mxu0 %v6869_v19 }
0x13cc   :  { %6396 = vmatpush3.bf16.msra.mxu0 %v6636_v30 }
0x13cd   :  { %6413 = vmatprep.subr.bf16.mxu0 %v6869_v19 }
0x146f   :  { %v7939_v48 = vpop.f32.mrf.mxu0  ;;  %v7941_v49 = vpop.f32.mrf.mxu1 }
0x1471   :  { %v6351_v51 = vpop.f32.mrf.mxu0  ;;  %v6363_v59 = vpop.f32.mrf.mxu1 }
0x1473   :  { %v7943_v29 = vpop.f32.mrf.mxu0  ;;  %v7945_v44 = vpop.f32.mrf.mxu1 }
0x1474   :  { %v3505_v23 = vpack.c.bf16 %v7943_v29, %v7939_v48  ;;  %v3506_v46 = vpack.c.bf16 %v7945_v44, %v7941_v49 }
0x1475   :  { %v6352_v53 = vpop.f32.mrf.mxu0  ;;  %v6364_v61 = vpop.f32.mrf.mxu1 }
0x1476   :  { %6386 = vmatmul.mubr.msk.bf16.vlgmr.msra.gmra.mxu1 %vm642_vm10, %v3506_v46  ;;  %6398 = vmatmul.mubr.msk.bf16.vlgmr.msra.gmra.mxu0 %vm642_vm10, %v3505_v23 }
0x1477   :  { %6402 = vmatpush3.bf16.msra.mxu1 %v6637_v26  ;;  %6414 = vmatpush3.bf16.msra.mxu0 %v6638_v11 }
0x1478   :  { %6403 = vmatprep.subr.bf16.mxu1 %v6869_v19  ;;  %6415 = vmatprep.subr.bf16.mxu0 %v6869_v19 }
0x1479   :  { %6409 = vmatprep.mubr.msk.bf16.mxu1 %vm6870_vm1, %v6869_v19  ;;  %6421 = vmatprep.mubr.msk.bf16.mxu0 %vm6870_vm1, %v6869_v19 }
0x147b   :  { %6404 = vmatpush3.bf16.msra.mxu1 %v6639_v10  ;;  %6416 = vmatpush3.bf16.msra.mxu0 %v6640_v14 }
0x147c   :  { %6405 = vmatprep.subr.bf16.mxu1 %v6869_v19  ;;  %6417 = vmatprep.subr.bf16.mxu0 %v6869_v19 }
0x147f   :  { %v7979_v41 = vpop.f32.mrf.mxu0  ;;  %6406 = vmatpush3.bf16.msra.mxu1 %v6641_v36  ;;  %6418 = vmatpush3.bf16.msra.mxu0 %v6642_v37 }
0x1480   :  { %6407 = vmatprep.subr.bf16.mxu1 %v6869_v19  ;;  %6419 = vmatprep.subr.bf16.mxu0 %v6869_v19 }
0x1481   :  { %v6375_v28 = vpop.f32.mrf.mxu0 }
0x1483   :  { %v7989_v52 = vpop.f32.mrf.mxu0  ;;  %6408 = vmatpush3.bf16.msra.mxu1 %v6643_v13  ;;  %6420 = vmatpush3.bf16.msra.mxu0 %v6644_v3 }
0x1484   :  { %v3507_v8 = vpack.c.bf16 %v7989_v52, %v7979_v41  ;;  %6425 = vmatprep.subr.bf16.mxu1 %v6869_v19  ;;  %6437 = vmatprep.subr.bf16.mxu0 %v6869_v19 }
0x1485   :  { %v6376_v5 = vpop.f32.mrf.mxu0 }
0x1486   :  { %6410 = vmatmul.mubr.msk.bf16.vlgmr.msra.gmra.mxu1 %vm642_vm10, %v3507_v8  ;;  %6422 = vmatmul.mubr.msk.bf16.vlgmr.msra.gmra.mxu0 %vm642_vm10, %v3506_v46 }
0x1487   :  { %6426 = vmatpush3.bf16.msra.mxu1 %v6645_v38  ;;  %6438 = vmatpush3.bf16.msra.mxu0 %v6646_v1  ;;  %v5795_v38 = vld [vmem:[%s8377_s19 + $0x1] ss:$0 sm:$0xff] }
0x1488   :  { %6427 = vmatprep.subr.bf16.mxu1 %v6869_v19  ;;  %6439 = vmatprep.subr.bf16.mxu0 %v6869_v19 }
0x1489   :  { %6433 = vmatprep.mubr.msk.bf16.mxu1 %vm6870_vm1, %v6869_v19  ;;  %6445 = vmatprep.mubr.msk.bf16.mxu0 %vm6870_vm1, %v6869_v19 }
0x148b   :  { %6428 = vmatpush3.bf16.msra.mxu1 %v6647_v21  ;;  %6440 = vmatpush3.bf16.msra.mxu0 %v6648_v32 }
0x148c   :  { %6429 = vmatprep.subr.bf16.mxu1 %v6869_v19  ;;  %6441 = vmatprep.subr.bf16.mxu0 %v6869_v19 }
0x148f   :  { %6430 = vmatpush3.bf16.msra.mxu1 %v6649_v34  ;;  %6442 = vmatpush3.bf16.msra.mxu0 %v6650_v58 }
0x1490   :  { %6431 = vmatprep.subr.bf16.mxu1 %v6869_v19  ;;  %6443 = vmatprep.subr.bf16.mxu0 %v6869_v19 }
0x1493   :  { %6432 = vmatpush3.bf16.msra.mxu1 %v6651_v7  ;;  %6444 = vmatpush3.bf16.msra.mxu0 %v6652_v33 }
0x1494   :  { %6470 = vmatprep.subr.msk.mxu0 %vm264_vm4, %v7945_v44 }
0x1496   :  { %6434 = vmatmul.mubr.msk.bf16.vlgmr.msra.gmra.mxu1 %vm642_vm10, %v3505_v23  ;;  %6446 = vmatmul.mubr.msk.bf16.vlgmr.msra.gmra.mxu0 %vm642_vm10, %v3507_v8 }
0x1497   :  { %6471 = vmatpush3.xpose.msk.msra.mxu0 %vm264_vm4, %v7945_v44  ;;  %6474 = vmatprep.mubr.msk.f32.mxu0 %vm264_vm4, %v7939_v48 }
0x1498   :  { %6472 = vmatprep.subr.msk.mxu0 %vm264_vm4, %v7941_v49  ;;  %6453 = vmatprep.mubr.msk.f32.mxu1 %vm264_vm4, %v7116_v63 }
0x149b   :  { %6473 = vmatpush3.xpose.msk.msra.mxu0 %vm264_vm4, %v7941_v49 }
0x149e   :  { %6475 = vmatmul.mubr.msk.f32.vlgmr.msra.gmra.mxu0 %vm264_vm4, %v7943_v29 }
0x1536   :  { %v3587_v56 = vpop.f32.mrf.mxu1  ;;  %v3655_v50 = vpop.f32.mrf.mxu0 }
0x1537   :  { %v3656_v47 = vadd.f32 %v3655_v50, %v3587_v56 }
0x1538   :  { %v6387_v54 = vpop.f32.mrf.mxu1  ;;  %v6399_v15 = vpop.f32.mrf.mxu0 }
0x153a   :  { %v3590_v12 = vpop.f32.mrf.mxu1  ;;  %v3658_v30 = vpop.f32.mrf.mxu0 }
0x153b   :  { %v3659_v51 = vadd.f32 %v3658_v30, %v3590_v12 }
0x153c   :  { %v6388_v59 = vpop.f32.mrf.mxu1  ;;  %v6400_v26 = vpop.f32.mrf.mxu0 }
0x1546   :  { %v3732_v11 = vpop.f32.mrf.mxu1  ;;  %v3827_v23 = vpop.f32.mrf.mxu0 }
0x1547   :  { %v8047_v46 = vadd.f32 %v3732_v11, %v3656_v47 }
0x1548   :  { %v6411_v63 = vpop.f32.mrf.mxu1  ;;  %v6423_v53 = vpop.f32.mrf.mxu0 }
0x154a   :  { %v3735_v61 = vpop.f32.mrf.mxu1  ;;  %v3830_v10 = vpop.f32.mrf.mxu0 }
0x154b   :  { %v8049_v14 = vadd.f32 %v3735_v61, %v3659_v51 }
0x154c   :  { %v6412_v36 = vpop.f32.mrf.mxu1  ;;  %v6424_v37 = vpop.f32.mrf.mxu0 }
0x1556   :  { %v3892_v13 = vpop.f32.mrf.mxu1  ;;  %v3966_v3 = vpop.f32.mrf.mxu0 }
0x1557   :  { %v3893_v28 = vadd.f32 %v3892_v13, %v3827_v23 }
0x1558   :  { %v6435_v1 = vpop.f32.mrf.mxu1  ;;  %v6447_v8 = vpop.f32.mrf.mxu0 }
0x1559   :  { %v3973_v5 = vadd.f32 %v3966_v3, %v3893_v28 }
0x155a   :  { %v3895_v21 = vpop.f32.mrf.mxu1  ;;  %v3969_v32 = vpop.f32.mrf.mxu0 }
0x155b   :  { %v3983_v34 = vadd.f32 %v5795_v38, %v3973_v5  ;;  %v3896_v58 = vadd.f32 %v3895_v21, %v3830_v10 }
0x155c   :  { %v6436_v7 = vpop.f32.mrf.mxu1  ;;  %v6448_v33 = vpop.f32.mrf.mxu0 }
0x155d   :  { %v3985_v56 = vsub.f32 0.0, %v3983_v34  ;;  %v3974_v50 = vadd.f32 %v3969_v32, %v3896_v58 }
0x155f   :  { %v3993_v47 = vand.u32 2147483647, %v3985_v56  ;;  %v3984_v54 = vadd.f32 %v5795_v38, %v3974_v50  ;;  %v3987_v21 = vmax.f32 %v3985_v56, 0.0  ;;  %vm3989_vm15 = vcmp.ne.f32.partialorder %v3985_v56, %v3985_v56 }
0x1561   :  { %v3995_v15 = vsub.f32 0.0, %v3993_v47  ;;  %v3986_v12 = vsub.f32 0.0, %v3984_v54 }
0x1563   :  { %v3997_v30 = vmul.f32 1.442695, %v3995_v15  ;;  %v3994_v51 = vand.u32 2147483647, %v3986_v12  ;;  %v3988_v58 = vmax.f32 %v3986_v12, 0.0  ;;  %vm3990_vm14 = vcmp.ne.f32.partialorder %v3986_v12, %v3986_v12 }
0x1565   :  { %6761 = vpow2.f32 %v3997_v30  ;;  %v3996_v59 = vsub.f32 0.0, %v3994_v51 }
0x1567   :  { %v3999_v26 = vmul.f32 1.442695, %v3996_v59 }
0x1569   :  { %6763 = vpow2.f32 %v3999_v26 }
0x1572   :  { %v6762_v11 = vpop.eup %6761 }
0x1573   :  { %v4001_v23 = vadd.f32 1.0, %v6762_v11  ;;  %v4004_v61 = vmul.f32 -0.5, %v6762_v11  ;;  %v4007_v37 = vand.u32 2147483647, %v6762_v11 }
0x1575   :  { %6765 = vlog2.f32 %v4001_v23  ;;  %v4005_v36 = vadd.f32 1.0, %v4004_v61  ;;  %vm4008_vm5 = vcmp.lt.f32.partialorder %v4007_v37, 0.0004427343 }
0x1576   :  { %v6764_v63 = vpop.eup %6763 }
0x1577   :  { %v4010_v53 = vadd.f32 1.0, %v6764_v63  ;;  %v4013_v10 = vmul.f32 -0.5, %v6764_v63  ;;  %v4006_v38 = vmul.f32 %v6762_v11, %v4005_v36  ;;  %v4016_v1 = vand.u32 2147483647, %v6764_v63 }
0x1579   :  { %6767 = vlog2.f32 %v4010_v53  ;;  %v4014_v3 = vadd.f32 1.0, %v4013_v10  ;;  %vm4017_vm6 = vcmp.lt.f32.partialorder %v4016_v1, 0.0004427343 }
0x157b   :  { %v4015_v34 = vmul.f32 %v6764_v63, %v4014_v3 }
0x1582   :  { %v6766_v13 = vpop.eup %6765 }
0x1583   :  { %v4003_v28 = vmul.f32 0.6931472, %v6766_v13 }
0x1585   :  { %v4009_v8 = vsel %vm4008_vm5, %v4006_v38, %v4003_v28 }
0x1586   :  { %v6768_v5 = vpop.eup %6767  ;;  %v4019_v7 = vadd.f32 %v4009_v8, %v3987_v21 }
0x1587   :  { %v4012_v32 = vmul.f32 0.6931472, %v6768_v5 }
0x1588   :  { %v4021_v54 = vsel %vm3989_vm15, %v3985_v56, %v4019_v7 }
0x1589   :  { %v4018_v33 = vsel %vm4017_vm6, %v4015_v34, %v4012_v32  ;;  %v4023_v30 = vsub.f32 0.0, %v4021_v54 }
0x158a   :  { %v4020_v50 = vadd.f32 %v4018_v33, %v3988_v58 }
0x158c   :  { %v4022_v47 = vsel %vm3990_vm14, %v3986_v12, %v4020_v50  ;;  %v6476_v50 = vpop.f32.mrf.mxu0 }
0x158d   :  { %v4024_v15 = vsub.f32 0.0, %v4022_v47 }
0x158e   :  { %v4406_v47 = vpop.f32.mrf.mxu0 }
0x158f   :  { %6449 = vmatprep.subr.mxu1 %v4024_v15 }
0x1590   :  { %6450 = vmatpush3.msra.mxu1 %v4024_v15 }
0x1591   :  { %6451 = vmatprep.subr.mxu1 %v4023_v30 }
0x1592   :  { %6452 = vmatpush3.msra.mxu1 %v4023_v30 }
0x1593   :  { %6454 = vmatmul.mubr.msk.f32.vlgmr.msra.gmra.mxu1 %vm264_vm4, %v7132_v2 }
0x1594   :  { %6460 = vmatprep.mubr.msk.f32.mxu1 %vm264_vm4, %v7069_v42 }
0x1653   :  { %v6455_v51 = vpop.f32.mrf.mxu1 }
0x1654   :  { %v4101_v59 = vsel %vm575_vm8, %v6455_v51, 0.0  ;;  %v4416_v51 = vmul.f32 0.25, %v6476_v50 }
0x1655   :  { %v4103_v26 = vadd.f32 %v4101_v59, %v4024_v15  ;;  %v4091_v11 = vpop.f32.mrf.mxu1  ;;  %v4415_v15 = vmul.f32 0.25, %v4406_v47 }
0x1656   :  { %v4100_v56 = vsel %vm574_vm9, %v4091_v11, 0.0 }
0x1657   :  { %v4102_v12 = vadd.f32 %v4100_v56, %v4023_v30  ;;  %6456 = vmatprep.subr.mxu1 %v4103_v26 }
0x1658   :  { %6457 = vmatpush3.msra.mxu1 %v4103_v26 }
0x1659   :  { %6458 = vmatprep.subr.mxu1 %v4102_v12 }
0x165a   :  { %6459 = vmatpush3.msra.mxu1 %v4102_v12 }
0x165b   :  { %6461 = vmatmul.mubr.msk.f32.vlgmr.msra.gmra.mxu1 %vm264_vm4, %v7111_v62 }
0x165c   :  { %6467 = vmatprep.mubr.msk.f32.mxu1 %vm264_vm4, %v7425_v6 }
0x171b   :  { %v6462_v42 = vpop.f32.mrf.mxu1 }
0x171c   :  { %v4180_v2 = vsel %vm466_vm3, %v6462_v42, 0.0 }
0x171d   :  { %v4182_v43 = vadd.f32 %v4180_v2, %v4103_v26  ;;  %v4170_v23 = vpop.f32.mrf.mxu1 }
0x171e   :  { %v4179_v24 = vsel %vm465_vm7, %v4170_v23, 0.0 }
0x171f   :  { %v4181_v63 = vadd.f32 %v4179_v24, %v4102_v12  ;;  %6463 = vmatprep.subr.mxu1 %v4182_v43 }
0x1720   :  { %6464 = vmatpush3.msra.mxu1 %v4182_v43 }
0x1721   :  { %6465 = vmatprep.subr.mxu1 %v4181_v63 }
0x1722   :  { %6466 = vmatpush3.msra.mxu1 %v4181_v63 }
0x1723   :  { %6468 = vmatmul.mubr.msk.f32.vlgmr.msra.gmra.mxu1 %vm264_vm4, %v7435_v40  ;;  %6477 = vmatprep.subr.mxu1 %v7989_v52  ;;  %v5754_v40 = vld [vmem:[%s8415_s8 + $0x1] ss:$0 sm:$0xff] }
0x1724   :  { %6478 = vmatpush3.msra.mxu1 %v7989_v52  ;;  %v3749_v25 = vadd.f32 %v5754_v40, %v8047_v46  ;;  %v3750_v36 = vadd.f32 %v5754_v40, %v8049_v14  ;;  %v8102_v46 = vld [vmem:[%s8416_s6 + $0x8] sm:$0xff] }
0x1725   :  { %6479 = vmatprep.subr.mxu1 %v7979_v41 }
0x1726   :  { %6480 = vmatpush3.msra.mxu1 %v7979_v41 }
0x17e3   :  { %v6469_v62 = vpop.f32.mrf.mxu1 }
0x17e4   :  { %v4259_v16 = vsel %vm1605_vm11, %v6469_v62, 0.0 }
0x17e5   :  { %v8078_v17 = vadd.f32 %v4259_v16, %v4182_v43  ;;  %v4249_v6 = vpop.f32.mrf.mxu1 }
0x17e6   :  { %v4258_v53 = vsel %vm1604_vm12, %v4249_v6, 0.0 }
0x17e7   :  { %v8082_v61 = vadd.f32 %v4258_v53, %v4181_v63  ;;  %4305 = vperm.xlu0 %6561, %v8078_v17   ;;  %v4263_v55 = vsub.f32 %v3750_v36, %v8078_v17 }
0x17e9   :  { %4300 = vperm.xlu1 %6562, %v8082_v61   ;;  %v4262_v10 = vsub.f32 %v3749_v25, %v8082_v61 }
0x17eb   :  { %6563 = vset.pattern.permute.xlu0 %v6872_v35 }
0x1812   :  { %4264 = vxpose.xlu1.b32.start [1/2] (short) (narrow) %v4262_v10, 8 }
0x1816   :  { %4265 = vxpose.xlu1.b32.end [2/2] (short) (narrow) %v4263_v55, 8 }
0x1834   :  { %6564 = vset.pattern.permute.xlu1 %v6872_v35  ;;  %v8108_v35 = vld [vmem:[%s8416_s6] sm:$0xff] }
0x1862   :  { %v4306_v28 = vpop.permute.xlu0 %4305 }
0x1864   :  { %v4301_v37 = vpop.permute.xlu1 %4300 }
0x188e   :  { %v8095_v13 = vpop.trf.xlu1 }
0x188f   :  { %v4311_v3 = vrot.slane %v8095_v13, %v7185_v18  ;;  %v4567_v2 = vrot.slane %v8095_v13, %v7194_v22 }
0x1891   :  { %v4313_v38 = vadd.f32 %v4311_v3, %v4306_v28  ;;  %v4312_v1 = vadd.f32 %v4311_v3, %v4301_v37 }
0x1893   :  { %v4315_v14 = vadd.f32 %v8102_v46, %v4313_v38  ;;  %v4314_v8 = vadd.f32 %v8108_v35, %v4312_v1 }
0x1895   :  { %v4319_v5 = vsel %vm264_vm4, %v4315_v14, -inf  ;;  %v4316_v18 = vsel %vm264_vm4, %v4314_v8, -inf }
0x1896   :  { %4320 = vmax.xlane.f32.xlu1 %v4319_v5  ;;  %4317 = vmax.xlane.f32.xlu0 %v4316_v18 }
0x18a7   :  { %4588 = vrot.lane.b32.xlu1 %v7941_v49, %s6873_s4 }
0x18ab   :  { %4561 = vperm.xlu1 %6564, %v8078_v17  }
0x18af   :  { %6565 = vset.pattern.permute.xlu1 %v6874_v60 }
0x191f   :  { %v4321_v21 = vpop.xlane.xlu1 %4320  ;;  %v4318_v32 = vpop.xlane.xlu0 %4317 }
0x1920   :  { %v4323_v34 = vsub.f32 %v4315_v14, %v4321_v21  ;;  %v4322_v58 = vsub.f32 %v4314_v8, %v4318_v32  ;;  %v4427_v63 = vsub.f32 0.0, %v4318_v32  ;;  %v4428_v62 = vsub.f32 0.0, %v4321_v21 }
0x1922   :  { %v4326_v7 = vmul.f32 1.442695, %v4323_v34  ;;  %v4324_v33 = vmul.f32 1.442695, %v4322_v58  ;;  %v4429_v16 = vmul.f32 1.442695, %v4427_v63 }
0x1923   :  { %v4589_v12 = vpop.permute.xlu1 %4588  ;;  %v4431_v6 = vmul.f32 1.442695, %v4428_v62 }
0x1924   :  { %6769 = vpow2.f32 %v4326_v7 }
0x1925   :  { %6771 = vpow2.f32 %v4324_v33 }
0x1926   :  { %6773 = vpow2.f32 %v4429_v16 }
0x1927   :  { %v4562_v42 = vpop.permute.xlu1 %4561  ;;  %6775 = vpow2.f32 %v4431_v6 }
0x1928   :  { %v4569_v43 = vadd.f32 %v4567_v2, %v4562_v42 }
0x192a   :  { %v4571_v23 = vadd.f32 %v8102_v46, %v4569_v43 }
0x192c   :  { %v4575_v24 = vsel %vm264_vm4, %v4571_v23, -inf }
0x1931   :  { %v6770_v54 = vpop.eup %6769 }
0x1932   :  { %v6772_v30 = vpop.eup %6771  ;;  %v4418_v11 = vmul.f32 %v6770_v54, %v4416_v51 }
0x1933   :  { %v4417_v59 = vmul.f32 %v6772_v30, %v4415_v15 }
0x1934   :  { %v4422_v56 = vsel %vm264_vm4, %v4418_v11, 0.0 }
0x1935   :  { %v4419_v26 = vsel %vm264_vm4, %v4417_v59, 0.0 }
0x1936   :  { %4420 = vadd.xlane.f32.xlu0 %v4419_v26 }
0x193a   :  { %4423 = vadd.xlane.f32.xlu0 %v4422_v56 }
0x1950   :  { %4590 = vrot.lane.b32.xlu0 %v7945_v44, %s6873_s4 }
0x1954   :  { %4584 = vrot.lane.b32.xlu0 %v7939_v48, %s6873_s4 }
0x1958   :  { %4586 = vrot.lane.b32.xlu0 %v7943_v29, %s6873_s4 }
0x195c   :  { %4557 = vperm.xlu0 %6563, %v8082_v61  }
0x1960   :  { %6566 = vset.pattern.permute.xlu0 %v6874_v60  ;;  %v6774_v60 = vpop.eup %6773 }
0x1961   :  { %v6776_v22 = vpop.eup %6775 }
0x197b   :  { %4576 = vmax.xlane.f32.xlu0 %v4575_v24 }
0x19bf   :  { %v4421_v53 = vpop.xlane.xlu0 %4420 }
0x19c0   :  { %v4425_v40 = vand.u32 2147483647, %v4421_v53 }
0x19c2   :  { %v4433_v25 = vmax.f32 %v4425_v40, %v6774_v60 }
0x19c3   :  { %v4424_v10 = vpop.xlane.xlu0 %4423 }
0x19c4   :  { %v4435_v36 = vadd.f32 1e-06, %v4433_v25  ;;  %v4426_v55 = vand.u32 2147483647, %v4424_v10 }
0x19c6   :  { %6777 = vrcp.f32 %v4435_v36  ;;  %v4434_v37 = vmax.f32 %v4426_v55, %v6776_v22 }
0x19c7   :  { %v4591_v3 = vpop.permute.xlu0 %4590 }
0x19c8   :  { %v4436_v28 = vadd.f32 1e-06, %v4434_v37  ;;  %6484 = vmatprep.subr.msk.mxu1 %vm264_vm4, %v4591_v3 }
0x19ca   :  { %6779 = vrcp.f32 %v4436_v28 }
0x19cb   :  { %v4585_v38 = vpop.permute.xlu0 %4584 }
0x19cf   :  { %v4587_v14 = vpop.permute.xlu0 %4586 }
0x19d3   :  { %v6778_v1 = vpop.eup %6777 }
0x19d4   :  { %v4438_v8 = vmul.f32 %v6778_v1, %v4417_v59 }
0x19d6   :  { %6481 = vmatprep.mubr.msk.f32.mxu1 %vm264_vm4, %v4438_v8  ;;  %v4832_v8 = vrot.slane %v8095_v13, %v7203_v27 }
0x19d7   :  { %v6780_v5 = vpop.eup %6779  ;;  %v4558_v18 = vpop.permute.xlu0 %4557 }
0x19d8   :  { %v4568_v21 = vadd.f32 %v4567_v2, %v4558_v18  ;;  %v4440_v32 = vmul.f32 %v6780_v5, %v4418_v11 }
0x19da   :  { %6482 = vmatmul.mubr.msk.f32.vlgmr.msra.gmra.mxu1 %vm264_vm4, %v4440_v32  ;;  %v4570_v34 = vadd.f32 %v8108_v35, %v4568_v21 }
0x19db   :  { %6485 = vmatpush3.xpose.msk.msra.mxu1 %vm264_vm4, %v4591_v3  ;;  %6488 = vmatprep.mubr.msk.f32.mxu1 %vm264_vm4, %v4585_v38 }
0x19dc   :  { %6486 = vmatprep.subr.msk.mxu1 %vm264_vm4, %v4589_v12  ;;  %v4572_v58 = vsel %vm264_vm4, %v4570_v34, -inf }
0x19dd   :  { %4573 = vmax.xlane.f32.xlu1 %v4572_v58 }
0x19df   :  { %6487 = vmatpush3.xpose.msk.msra.mxu1 %vm264_vm4, %v4589_v12 }
0x19e2   :  { %6489 = vmatmul.mubr.msk.f32.vlgmr.msra.gmra.mxu1 %vm264_vm4, %v4587_v14 }
0x1a04   :  { %v4577_v7 = vpop.xlane.xlu0 %4576 }
0x1a05   :  { %v4579_v50 = vsub.f32 %v4571_v23, %v4577_v7  ;;  %v4688_v63 = vsub.f32 0.0, %v4577_v7 }
0x1a07   :  { %v4582_v54 = vmul.f32 1.442695, %v4579_v50  ;;  %v4691_v16 = vmul.f32 1.442695, %v4688_v63 }
0x1a09   :  { %6781 = vpow2.f32 %v4582_v54 }
0x1a16   :  { %v6782_v11 = vpop.eup %6781 }
0x1a66   :  { %v4574_v33 = vpop.xlane.xlu1 %4573 }
0x1a67   :  { %v4578_v47 = vsub.f32 %v4570_v34, %v4574_v33  ;;  %v4687_v62 = vsub.f32 0.0, %v4574_v33 }
0x1a69   :  { %v4580_v15 = vmul.f32 1.442695, %v4578_v47  ;;  %v4689_v6 = vmul.f32 1.442695, %v4687_v62 }
0x1a6b   :  { %6783 = vpow2.f32 %v4580_v15 }
0x1a6c   :  { %6785 = vpow2.f32 %v4691_v16 }
0x1a6d   :  { %6787 = vpow2.f32 %v4689_v6 }
0x1a78   :  { %v6784_v2 = vpop.eup %6783 }
0x1a79   :  { %v6786_v60 = vpop.eup %6785 }
0x1a7a   :  { %v6788_v55 = vpop.eup %6787 }
0x1a9a   :  { %v8141_v30 = vpop.f32.mrf.mxu1 }
0x1a9c   :  { %v8143_v51 = vpop.f32.mrf.mxu1 }
0x1aa2   :  { %v6490_v59 = vpop.f32.mrf.mxu1 }
0x1aa3   :  { %v4676_v26 = vmul.f32 0.25, %v6490_v59 }
0x1aa4   :  { %v4666_v56 = vpop.f32.mrf.mxu1 }
0x1aa5   :  { %v4678_v42 = vmul.f32 %v6782_v11, %v4676_v26  ;;  %v4675_v12 = vmul.f32 0.25, %v4666_v56 }
0x1aa7   :  { %v4677_v43 = vmul.f32 %v6784_v2, %v4675_v12  ;;  %v4682_v24 = vsel %vm264_vm4, %v4678_v42, 0.0 }
0x1aa8   :  { %4683 = vadd.xlane.f32.xlu1 %v4682_v24 }
0x1aa9   :  { %v4679_v23 = vsel %vm264_vm4, %v4677_v43, 0.0 }
0x1aaa   :  { %4680 = vadd.xlane.f32.xlu0 %v4679_v23 }
0x1ab9   :  { %4703 = vrot.lane.b32.xlu1 %v7979_v41, %s6873_s4 }
0x1abd   :  { %4855 = vrot.lane.b32.xlu1 %v7945_v44, %s6875_s7 }
0x1ac0   :  { %4705 = vrot.lane.b32.xlu0 %v7989_v52, %s6873_s4 }
0x1ac1   :  { %4849 = vrot.lane.b32.xlu1 %v7939_v48, %s6875_s7 }
0x1ac4   :  { %4853 = vrot.lane.b32.xlu0 %v7941_v49, %s6875_s7 }
0x1ac5   :  { %4822 = vperm.xlu1 %6565, %v8082_v61  }
0x1ac8   :  { %4851 = vrot.lane.b32.xlu0 %v7943_v29, %s6875_s7 }
0x1ac9   :  { %6568 = vset.pattern.permute.xlu1 %v6876_v39 }
0x1acc   :  { %4826 = vperm.xlu0 %6566, %v8078_v17  }
0x1ad0   :  { %6567 = vset.pattern.permute.xlu0 %v6876_v39 }
0x1b31   :  { %v4684_v53 = vpop.xlane.xlu1 %4683 }
0x1b32   :  { %v4686_v40 = vand.u32 2147483647, %v4684_v53 }
0x1b33   :  { %v4681_v25 = vpop.xlane.xlu0 %4680 }
0x1b34   :  { %v4694_v10 = vmax.f32 %v4686_v40, %v6786_v60  ;;  %v4685_v36 = vand.u32 2147483647, %v4681_v25 }
0x1b35   :  { %v4704_v22 = vpop.permute.xlu1 %4703 }
0x1b36   :  { %v4696_v37 = vadd.f32 1e-06, %v4694_v10  ;;  %v4693_v3 = vmax.f32 %v4685_v36, %v6788_v55 }
0x1b37   :  { %v4706_v28 = vpop.permute.xlu0 %4705 }
0x1b38   :  { %v4695_v38 = vadd.f32 1e-06, %v4693_v3  ;;  %6491 = vmatprep.subr.mxu0 %v4706_v28  ;;  %6789 = vrcp.f32 %v4696_v37 }
0x1b39   :  { %v4856_v39 = vpop.permute.xlu1 %4855  ;;  %6492 = vmatpush3.msra.mxu0 %v4706_v28 }
0x1b3a   :  { %6791 = vrcp.f32 %v4695_v38  ;;  %6493 = vmatprep.subr.mxu0 %v4704_v22 }
0x1b3b   :  { %6494 = vmatpush3.msra.mxu0 %v4704_v22  ;;  %v4854_v1 = vpop.permute.xlu0 %4853 }
0x1b3c   :  { %6498 = vmatprep.subr.msk.mxu0 %vm264_vm4, %v4856_v39 }
0x1b3d   :  { %v4850_v14 = vpop.permute.xlu1 %4849 }
0x1b3f   :  { %v4852_v21 = vpop.permute.xlu0 %4851 }
0x1b41   :  { %v4823_v5 = vpop.permute.xlu1 %4822 }
0x1b42   :  { %v4833_v18 = vadd.f32 %v4832_v8, %v4823_v5 }
0x1b44   :  { %v4835_v32 = vadd.f32 %v8108_v35, %v4833_v18 }
0x1b45   :  { %v6790_v34 = vpop.eup %6789 }
0x1b46   :  { %v4837_v58 = vsel %vm264_vm4, %v4835_v32, -inf  ;;  %v4700_v54 = vmul.f32 %v6790_v34, %v4678_v42 }
0x1b47   :  { %v6792_v7 = vpop.eup %6791  ;;  %4838 = vmax.xlane.f32.xlu1 %v4837_v58  ;;  %v4827_v33 = vpop.permute.xlu0 %4826 }
0x1b48   :  { %v4834_v50 = vadd.f32 %v4832_v8, %v4827_v33  ;;  %v4698_v47 = vmul.f32 %v6792_v7, %v4677_v43 }
0x1b4a   :  { %v4836_v15 = vadd.f32 %v8102_v46, %v4834_v50  ;;  %6495 = vmatprep.mubr.msk.f32.mxu0 %vm264_vm4, %v4698_v47 }
0x1b4b   :  { %6496 = vmatmul.mubr.msk.f32.vlgmr.msra.gmra.mxu0 %vm264_vm4, %v4700_v54 }
0x1b4c   :  { %6499 = vmatpush3.xpose.msk.msra.mxu0 %vm264_vm4, %v4856_v39  ;;  %6502 = vmatprep.mubr.msk.f32.mxu0 %vm264_vm4, %v4850_v14  ;;  %v4840_v27 = vsel %vm264_vm4, %v4836_v15, -inf }
0x1b4d   :  { %6500 = vmatprep.subr.msk.mxu0 %vm264_vm4, %v4854_v1  ;;  %4841 = vmax.xlane.f32.xlu0 %v4840_v27 }
0x1b50   :  { %6501 = vmatpush3.xpose.msk.msra.mxu0 %vm264_vm4, %v4854_v1 }
0x1b53   :  { %6503 = vmatmul.mubr.msk.f32.vlgmr.msra.gmra.mxu0 %vm264_vm4, %v4852_v21  ;;  %v5095_v21 = vrot.slane %v8095_v13, %v7188_v20 }
0x1b58   :  { %4968 = vrot.lane.b32.xlu1 %v7989_v52, %s6875_s7 }
0x1bd0   :  { %v4839_v59 = vpop.xlane.xlu1 %4838 }
0x1bd1   :  { %v4843_v42 = vsub.f32 %v4835_v32, %v4839_v59  ;;  %v4952_v55 = vsub.f32 0.0, %v4839_v59 }
0x1bd3   :  { %v4845_v2 = vmul.f32 1.442695, %v4843_v42 }
0x1bd4   :  { %v4969_v26 = vpop.permute.xlu1 %4968 }
0x1bd5   :  { %6505 = vmatprep.subr.mxu1 %v4969_v26 }
0x1bd6   :  { %6506 = vmatpush3.msra.mxu1 %v4969_v26  ;;  %v4842_v11 = vpop.xlane.xlu0 %4841 }
0x1bd7   :  { %v4844_v56 = vsub.f32 %v4836_v15, %v4842_v11  ;;  %v4953_v36 = vsub.f32 0.0, %v4842_v11 }
0x1bd9   :  { %v4847_v12 = vmul.f32 1.442695, %v4844_v56  ;;  %v4956_v22 = vmul.f32 1.442695, %v4953_v36 }
0x1bdb   :  { %6793 = vpow2.f32 %v4847_v12 }
0x1bdc   :  { %6795 = vpow2.f32 %v4845_v2 }
0x1bdd   :  { %6797 = vpow2.f32 %v4956_v22 }
0x1be8   :  { %v6794_v62 = vpop.eup %6793 }
0x1be9   :  { %v6796_v40 = vpop.eup %6795 }
0x1bea   :  { %v6798_v28 = vpop.eup %6797 }
0x1c0b   :  { %v8179_v43 = vpop.f32.mrf.mxu0 }
0x1c0c   :  { %v4793_v36 = vsel %vm264_vm4, %v8179_v43, 0.0 }
0x1c0d   :  { %v8181_v24 = vpop.f32.mrf.mxu0 }
0x1c13   :  { %v6504_v23 = vpop.f32.mrf.mxu0 }
0x1c14   :  { %v4941_v63 = vmul.f32 0.25, %v6504_v23 }
0x1c15   :  { %v4931_v16 = vpop.f32.mrf.mxu0 }
0x1c16   :  { %v4943_v6 = vmul.f32 %v6794_v62, %v4941_v63  ;;  %v4940_v53 = vmul.f32 0.25, %v4931_v16 }
0x1c18   :  { %v4942_v60 = vmul.f32 %v6796_v40, %v4940_v53  ;;  %v4947_v25 = vsel %vm264_vm4, %v4943_v6, 0.0 }
0x1c19   :  { %4948 = vadd.xlane.f32.xlu0 %v4947_v25 }
0x1c1a   :  { %v4944_v10 = vsel %vm264_vm4, %v4942_v60, 0.0 }
0x1c1b   :  { %4945 = vadd.xlane.f32.xlu1 %v4944_v10  ;;  %v4790_v10 = vsel %vm264_vm4, %v8181_v24, 0.0 }
0x1c2c   :  { %5118 = vrot.lane.b32.xlu1 %v7945_v44, %s6877_s15  ;;  %v4954_v44 = vmul.f32 1.442695, %v4952_v55 }
0x1c2e   :  { %6799 = vpow2.f32 %v4954_v44 }
0x1c2f   :  { %4966 = vrot.lane.b32.xlu0 %v7979_v41, %s6875_s7 }
0x1c30   :  { %5116 = vrot.lane.b32.xlu1 %v7941_v49, %s6877_s15 }
0x1c33   :  { %5112 = vrot.lane.b32.xlu0 %v7939_v48, %s6877_s15 }
0x1c34   :  { %5114 = vrot.lane.b32.xlu1 %v7943_v29, %s6877_s15 }
0x1c37   :  { %5085 = vperm.xlu0 %6567, %v8082_v61  }
0x1c38   :  { %5089 = vperm.xlu1 %6568, %v8078_v17  }
0x1c3b   :  { %v6800_v48 = vpop.eup %6799 }
0x1ca2   :  { %v4949_v37 = vpop.xlane.xlu0 %4948 }
0x1ca3   :  { %v4951_v3 = vand.u32 2147483647, %v4949_v37 }
0x1ca4   :  { %v4946_v49 = vpop.xlane.xlu1 %4945 }
0x1ca5   :  { %v4959_v38 = vmax.f32 %v4951_v3, %v6798_v28  ;;  %v4950_v39 = vand.u32 2147483647, %v4946_v49 }
0x1ca6   :  { %v4967_v1 = vpop.permute.xlu0 %4966 }
0x1ca7   :  { %v4961_v14 = vadd.f32 1e-06, %v4959_v38  ;;  %v4958_v29 = vmax.f32 %v4950_v39, %v6800_v48  ;;  %6507 = vmatprep.subr.mxu1 %v4967_v1 }
0x1ca8   :  { %v5119_v61 = vpop.permute.xlu1 %5118  ;;  %6508 = vmatpush3.msra.mxu1 %v4967_v1 }
0x1ca9   :  { %v4960_v17 = vadd.f32 1e-06, %v4958_v29  ;;  %6512 = vmatprep.subr.msk.mxu1 %vm264_vm4, %v5119_v61  ;;  %6801 = vrcp.f32 %v4961_v14 }
0x1caa   :  { %v5113_v5 = vpop.permute.xlu0 %5112 }
0x1cab   :  { %6803 = vrcp.f32 %v4960_v17 }
0x1cac   :  { %v5117_v8 = vpop.permute.xlu1 %5116 }
0x1cb0   :  { %v5115_v18 = vpop.permute.xlu1 %5114 }
0x1cb2   :  { %v5086_v32 = vpop.permute.xlu0 %5085 }
0x1cb3   :  { %v5096_v34 = vadd.f32 %v5095_v21, %v5086_v32 }
0x1cb4   :  { %v5090_v58 = vpop.permute.xlu1 %5089 }
0x1cb5   :  { %v5098_v7 = vadd.f32 %v8108_v35, %v5096_v34  ;;  %v5097_v33 = vadd.f32 %v5095_v21, %v5090_v58 }
0x1cb6   :  { %v6802_v50 = vpop.eup %6801 }
0x1cb7   :  { %v5099_v47 = vadd.f32 %v8102_v46, %v5097_v33  ;;  %v5100_v54 = vsel %vm264_vm4, %v5098_v7, -inf  ;;  %v4965_v26 = vmul.f32 %v6802_v50, %v4943_v6 }
0x1cb8   :  { %v6804_v15 = vpop.eup %6803  ;;  %5101 = vmax.xlane.f32.xlu1 %v5100_v54 }
0x1cb9   :  { %v5103_v27 = vsel %vm264_vm4, %v5099_v47, -inf  ;;  %v4963_v59 = vmul.f32 %v6804_v15, %v4942_v60 }
0x1cba   :  { %5104 = vmax.xlane.f32.xlu0 %v5103_v27 }
0x1cbb   :  { %6509 = vmatprep.mubr.msk.f32.mxu1 %vm264_vm4, %v4963_v59 }
0x1cbc   :  { %6510 = vmatmul.mubr.msk.f32.vlgmr.msra.gmra.mxu1 %vm264_vm4, %v4965_v26 }
0x1cbd   :  { %6513 = vmatpush3.xpose.msk.msra.mxu1 %vm264_vm4, %v5119_v61  ;;  %6516 = vmatprep.mubr.msk.f32.mxu1 %vm264_vm4, %v5113_v5 }
0x1cbe   :  { %6514 = vmatprep.subr.msk.mxu1 %vm264_vm4, %v5117_v8 }
0x1cc1   :  { %6515 = vmatpush3.xpose.msk.msra.mxu1 %vm264_vm4, %v5117_v8 }
0x1cc4   :  { %6517 = vmatmul.mubr.msk.f32.vlgmr.msra.gmra.mxu1 %vm264_vm4, %v5115_v18 }
0x1d41   :  { %v5102_v13 = vpop.xlane.xlu1 %5101 }
0x1d42   :  { %v5106_v35 = vsub.f32 %v5098_v7, %v5102_v13  ;;  %v5215_v44 = vsub.f32 0.0, %v5102_v13 }
0x1d43   :  { %v5105_v20 = vpop.xlane.xlu0 %5104 }
0x1d44   :  { %v5107_v46 = vsub.f32 %v5099_v47, %v5105_v20  ;;  %v5108_v56 = vmul.f32 1.442695, %v5106_v35 }
0x1d46   :  { %v5110_v11 = vmul.f32 1.442695, %v5107_v46 }
0x1d48   :  { %6805 = vpow2.f32 %v5110_v11  ;;  %v4525_v11 = vsel %vm264_vm4, %v8141_v30, 0.0 }
0x1d49   :  { %6807 = vpow2.f32 %v5108_v56 }
0x1d55   :  { %v6806_v63 = vpop.eup %6805 }
0x1d56   :  { %v6808_v53 = vpop.eup %6807 }
0x1d7c   :  { %v8211_v42 = vpop.f32.mrf.mxu1 }
0x1d7d   :  { %v5056_v55 = vsel %vm264_vm4, %v8211_v42, 0.0 }
0x1d7e   :  { %v8213_v12 = vpop.f32.mrf.mxu1 }
0x1d7f   :  { %v5053_v22 = vsel %vm264_vm4, %v8213_v12, 0.0 }
0x1d84   :  { %v6518_v2 = vpop.f32.mrf.mxu1 }
0x1d85   :  { %v5204_v23 = vmul.f32 0.25, %v6518_v2 }
0x1d86   :  { %v5194_v62 = vpop.f32.mrf.mxu1 }
0x1d87   :  { %v5206_v16 = vmul.f32 %v6806_v63, %v5204_v23  ;;  %v5203_v6 = vmul.f32 0.25, %v5194_v62 }
0x1d89   :  { %v5205_v40 = vmul.f32 %v6808_v53, %v5203_v6  ;;  %v5210_v60 = vsel %vm264_vm4, %v5206_v16, 0.0 }
0x1d8a   :  { %5211 = vadd.xlane.f32.xlu1 %v5210_v60 }
0x1d8b   :  { %v5207_v25 = vsel %vm264_vm4, %v5205_v40, 0.0 }
0x1d8c   :  { %5208 = vadd.xlane.f32.xlu0 %v5207_v25 }
0x1d9b   :  { %5229 = vrot.lane.b32.xlu1 %v7979_v41, %s6877_s15  ;;  %v5216_v41 = vsub.f32 0.0, %v5105_v20 }
0x1d9d   :  { %v5219_v37 = vmul.f32 1.442695, %v5216_v41 }
0x1d9f   :  { %6809 = vpow2.f32 %v5219_v37 }
0x1da2   :  { %5231 = vrot.lane.b32.xlu0 %v7989_v52, %s6877_s15  ;;  %v5217_v52 = vmul.f32 1.442695, %v5215_v44  ;;  %v8277_v44 = vld [vmem:[%s8379_s21 + $0x1] ss:$0 sm:$0xff] }
0x1da4   :  { %6811 = vpow2.f32 %v5217_v52 }
0x1dac   :  { %v6810_v49 = vpop.eup %6809 }
0x1db1   :  { %v6812_v1 = vpop.eup %6811 }
0x1dbf   :  { %4791 = vadd.xlane.f32.xlu1 %v4790_v10 }
0x1dc1   :  { %4794 = vadd.xlane.f32.xlu0 %v4793_v36 }
0x1dc3   :  { %5057 = vadd.xlane.f32.xlu1 %v5056_v55 }
0x1dc5   :  { %5054 = vadd.xlane.f32.xlu0 %v5053_v22 }
0x1e13   :  { %v5212_v3 = vpop.xlane.xlu1 %5211 }
0x1e14   :  { %v5214_v28 = vand.u32 2147483647, %v5212_v3 }
0x1e15   :  { %v5209_v38 = vpop.xlane.xlu0 %5208 }
0x1e16   :  { %v5222_v39 = vmax.f32 %v5214_v28, %v6810_v49  ;;  %v5213_v48 = vand.u32 2147483647, %v5209_v38 }
0x1e17   :  { %v5230_v8 = vpop.permute.xlu1 %5229 }
0x1e18   :  { %v5224_v14 = vadd.f32 1e-06, %v5222_v39  ;;  %v5221_v29 = vmax.f32 %v5213_v48, %v6812_v1 }
0x1e19   :  { %v5232_v61 = vpop.permute.xlu0 %5231 }
0x1e1a   :  { %v5223_v17 = vadd.f32 1e-06, %v5221_v29  ;;  %6519 = vmatprep.subr.mxu0 %v5232_v61  ;;  %6813 = vrcp.f32 %v5224_v14 }
0x1e1b   :  { %6520 = vmatpush3.msra.mxu0 %v5232_v61 }
0x1e1c   :  { %6815 = vrcp.f32 %v5223_v17  ;;  %6521 = vmatprep.subr.mxu0 %v5230_v8 }
0x1e1d   :  { %6522 = vmatpush3.msra.mxu0 %v5230_v8 }
0x1e1e   :  { %6526 = vmatprep.subr.bf16.mxu0 %v6869_v19 }
0x1e27   :  { %v6814_v5 = vpop.eup %6813 }
0x1e28   :  { %v5228_v32 = vmul.f32 %v6814_v5, %v5206_v16 }
0x1e29   :  { %v6816_v18 = vpop.eup %6815 }
0x1e2a   :  { %v5226_v21 = vmul.f32 %v6816_v18, %v5205_v40 }
0x1e2c   :  { %6523 = vmatprep.mubr.msk.f32.mxu0 %vm264_vm4, %v5226_v21 }
0x1e2d   :  { %6524 = vmatmul.mubr.msk.f32.vlgmr.msra.gmra.mxu0 %vm264_vm4, %v5228_v32 }
0x1e2e   :  { %6534 = vmatprep.mubr.msk.bf16.mxu0 %vm6870_vm1, %v6869_v19 }
0x1e48   :  { %v4792_v34 = vpop.xlane.xlu1 %4791 }
0x1e49   :  { %v4796_v50 = vmul.f32 0.0625, %v4792_v34 }
0x1e4a   :  { %v4795_v58 = vpop.xlane.xlu0 %4794 }
0x1e4b   :  { %v4797_v7 = vmul.f32 0.0625, %v4795_v58  ;;  %v8239_v20 = vsub.f32 %v8181_v24, %v4796_v50  ;;  %v4522_v24 = vsel %vm264_vm4, %v8143_v51, 0.0 }
0x1e4c   :  { %v5058_v33 = vpop.xlane.xlu1 %5057 }
0x1e4d   :  { %v8235_v15 = vsub.f32 %v8179_v43, %v4797_v7  ;;  %v5060_v27 = vmul.f32 0.0625, %v5058_v33  ;;  %v4800_v2 = vmul.f32 %v8239_v20, %v8239_v20  ;;  %v6653_v33 = vld [vmem:[%s8380_s22 + $0x38] sm:$0xff]  }
0x1e4e   :  { %v5055_v47 = vpop.xlane.xlu0 %5054  ;;  %6527 = vmatpush3.bf16.msra.mxu0 %v6653_v33 }
0x1e4f   :  { %v5059_v13 = vmul.f32 0.0625, %v5055_v47  ;;  %v8243_v35 = vsub.f32 %v8211_v42, %v5060_v27  ;;  %v4801_v43 = vmul.f32 %v8235_v15, %v8235_v15  ;;  %v4802_v63 = vsel %vm264_vm4, %v4800_v2, 0.0  ;;  %6528 = vmatprep.subr.bf16.mxu0 %v6869_v19 }
0x1e51   :  { %v8250_v56 = vsub.f32 %v8213_v12, %v5059_v13  ;;  %v4805_v42 = vsel %vm264_vm4, %v4801_v43, 0.0  ;;  %v5064_v23 = vmul.f32 %v8243_v35, %v8243_v35 }
0x1e53   :  { %v5063_v62 = vmul.f32 %v8250_v56, %v8250_v56  ;;  %v5068_v12 = vsel %vm264_vm4, %v5064_v23, 0.0 }
0x1e55   :  { %v5065_v16 = vsel %vm264_vm4, %v5063_v62, 0.0 }
0x1eed   :  { %v6525_v54 = vpop.f32.mrf.mxu0 }
0x1eee   :  { %v5319_v59 = vsel %vm264_vm4, %v6525_v54, 0.0 }
0x1eef   :  { %5320 = vadd.xlane.f32.xlu1 %v5319_v59  ;;  %v5307_v26 = vpop.f32.mrf.mxu0  ;;  %v6654_v59 = vld [vmem:[%s8380_s22 + $0x30] sm:$0xff]  }
0x1ef0   :  { %v5316_v46 = vsel %vm264_vm4, %v5307_v26, 0.0  ;;  %6529 = vmatpush3.bf16.msra.mxu0 %v6654_v59 }
0x1ef1   :  { %5317 = vadd.xlane.f32.xlu0 %v5316_v46  ;;  %6530 = vmatprep.subr.bf16.mxu0 %v6869_v19 }
0x1ef3   :  { %4526 = vadd.xlane.f32.xlu1 %v4525_v11 }
0x1ef5   :  { %4523 = vadd.xlane.f32.xlu0 %v4522_v24 }
0x1ef7   :  { %4806 = vadd.xlane.f32.xlu1 %v4805_v42 }
0x1ef9   :  { %4803 = vadd.xlane.f32.xlu0 %v4802_v63 }
0x1efb   :  { %5069 = vadd.xlane.f32.xlu1 %v5068_v12 }
0x1efd   :  { %5066 = vadd.xlane.f32.xlu0 %v5065_v16 }
0x1f78   :  { %v5321_v6 = vpop.xlane.xlu1 %5320 }
0x1f79   :  { %v5323_v53 = vmul.f32 0.0625, %v5321_v6 }
0x1f7a   :  { %v5318_v40 = vpop.xlane.xlu0 %5317 }
0x1f7b   :  { %v8264_v60 = vsub.f32 %v6525_v54, %v5323_v53  ;;  %v5322_v25 = vmul.f32 0.0625, %v5318_v40 }
0x1f7c   :  { %v4527_v52 = vpop.xlane.xlu1 %4526 }
0x1f7d   :  { %v8266_v10 = vsub.f32 %v5307_v26, %v5322_v25  ;;  %v5327_v36 = vmul.f32 %v8264_v60, %v8264_v60  ;;  %v4529_v28 = vmul.f32 0.0625, %v4527_v52 }
0x1f7e   :  { %v4524_v37 = vpop.xlane.xlu0 %4523 }
0x1f7f   :  { %v5331_v55 = vsel %vm264_vm4, %v5327_v36, 0.0  ;;  %v5326_v22 = vmul.f32 %v8266_v10, %v8266_v10  ;;  %v4528_v3 = vmul.f32 0.0625, %v4524_v37  ;;  %v8289_v38 = vsub.f32 %v8141_v30, %v4529_v28 }
0x1f80   :  { %5332 = vadd.xlane.f32.xlu1 %v5331_v55  ;;  %v4807_v29 = vpop.xlane.xlu1 %4806 }
0x1f81   :  { %v5328_v41 = vsel %vm264_vm4, %v5326_v22, 0.0  ;;  %v8286_v49 = vsub.f32 %v8143_v51, %v4528_v3  ;;  %v4533_v48 = vmul.f32 %v8289_v38, %v8289_v38  ;;  %v4809_v17 = vmul.f32 0.0625, %v4807_v29 }
0x1f82   :  { %5329 = vadd.xlane.f32.xlu0 %v5328_v41  ;;  %v4804_v61 = vpop.xlane.xlu0 %4803  ;;  %v5830_v41 = vmul.f32 -1.442695, %v7793_v4 }
0x1f83   :  { %v4532_v39 = vmul.f32 %v8286_v49, %v8286_v49  ;;  %v4537_v14 = vsel %vm264_vm4, %v4533_v48, 0.0  ;;  %v4808_v51 = vmul.f32 0.0625, %v4804_v61  ;;  %v4811_v30 = vadd.f32 1e-05, %v4809_v17 }
0x1f84   :  { %v5070_v8 = vpop.xlane.xlu1 %5069 }
0x1f85   :  { %v4534_v1 = vsel %vm264_vm4, %v4532_v39, 0.0  ;;  %v5072_v18 = vmul.f32 0.0625, %v5070_v8  ;;  %v4810_v21 = vadd.f32 1e-05, %v4808_v51  ;;  %6817 = vrsqrt.f32 %v4811_v30 }
0x1f86   :  { %v5067_v5 = vpop.xlane.xlu0 %5066 }
0x1f87   :  { %v5071_v32 = vmul.f32 0.0625, %v5067_v5  ;;  %v5074_v34 = vadd.f32 1e-05, %v5072_v18  ;;  %6819 = vrsqrt.f32 %v4810_v21  ;;  %v5829_v21 = vld [vmem:[%s8378_s20 + $0x1] ss:$0 sm:$0xff] }
0x1f89   :  { %v5073_v58 = vadd.f32 1e-05, %v5071_v32  ;;  %6821 = vrsqrt.f32 %v5074_v34 }
0x1f8b   :  { %6823 = vrsqrt.f32 %v5073_v58 }
0x1f91   :  { %5079 = vrot.lane.b32.xlu1 %v8277_v44, %s6875_s7 }
0x1f92   :  { %v6818_v50 = vpop.eup %6817 }
0x1f93   :  { %v4815_v24 = vmul.f32 %v6818_v50, %v8235_v15  ;;  %v6655_v15 = vld [vmem:[%s8380_s22 + $0x28] sm:$0xff]   ;;  %v5386_v50 = vmul.f32 %v5829_v21, %v7873_v45 }
0x1f94   :  { %v6820_v54 = vpop.eup %6819  ;;  %6531 = vmatpush3.bf16.msra.mxu0 %v6655_v15 }
0x1f95   :  { %5342 = vrot.lane.b32.xlu1 %v8277_v44, %s6877_s15  ;;  %v4814_v43 = vmul.f32 %v6820_v54, %v8239_v20  ;;  %6532 = vmatprep.subr.bf16.mxu0 %v6869_v19  ;;  %v5831_v19 = vmul.f32 -1.442695, %v7807_v31 }
0x1f96   :  { %v6822_v46 = vpop.eup %6821 }
0x1f97   :  { %v5078_v12 = vmul.f32 %v6822_v46, %v8243_v35  ;;  %v6656_v35 = vld [vmem:[%s8380_s22 + $0x20] sm:$0xff]  }
0x1f98   :  { %4816 = vrot.lane.b32.xlu0 %v8277_v44, %s6873_s4  ;;  %v6824_v2 = vpop.eup %6823  ;;  %6533 = vmatpush3.bf16.msra.mxu0 %v6656_v35 }
0x1f99   :  { %v5077_v16 = vmul.f32 %v6824_v2, %v8250_v56 }
0x1fb7   :  { %4535 = vadd.xlane.f32.xlu0 %v4534_v1 }
0x1fb9   :  { %4538 = vadd.xlane.f32.xlu1 %v4537_v14 }
0x2009   :  { %v5333_v7 = vpop.xlane.xlu1 %5332 }
0x200a   :  { %v5335_v47 = vmul.f32 0.0625, %v5333_v7 }
0x200b   :  { %v5330_v27 = vpop.xlane.xlu0 %5329 }
0x200c   :  { %v5337_v26 = vadd.f32 1e-05, %v5335_v47  ;;  %v5334_v13 = vmul.f32 0.0625, %v5330_v27 }
0x200d   :  { %v5080_v62 = vpop.permute.xlu1 %5079 }
0x200e   :  { %6825 = vrsqrt.f32 %v5337_v26  ;;  %v5336_v11 = vadd.f32 1e-05, %v5334_v13  ;;  %v5082_v20 = vmul.f32 %v5080_v62, %v5077_v16  ;;  %v5083_v6 = vmul.f32 %v5080_v62, %v5078_v12 }
0x200f   :  { %v4817_v42 = vpop.permute.xlu0 %4816  ;;  %v5385_v13 = vmul.f32 %v5829_v21, %v7875_v57 }
0x2010   :  { %6827 = vrsqrt.f32 %v5336_v11  ;;  %v4819_v23 = vmul.f32 %v4817_v42, %v4814_v43  ;;  %v4820_v63 = vmul.f32 %v4817_v42, %v4815_v24 }
0x2011   :  { %v5343_v53 = vpop.permute.xlu1 %5342  ;;  %6829 = vpow2.f32 %v5831_v19 }
0x2012   :  { %5351 = vrot.lane.b32.xlu1 %v4820_v63, %s6878_s30  ;;  %5349 = vrot.lane.b32.xlu0 %v4819_v23, %s6878_s30  ;;  %s8418_s30 = smov 48   ;;  %6831 = vpow2.f32 %v5830_v41 }
0x2016   :  { %5359 = vrot.lane.b32.xlu1 %v5083_v6, %s8417_s26  ;;  %5357 = vrot.lane.b32.xlu0 %v5082_v20, %s8417_s26 }
0x201b   :  { %v6826_v56 = vpop.eup %6825 }
0x201c   :  { %v5341_v40 = vmul.f32 %v6826_v56, %v8264_v60 }
0x201d   :  { %v6828_v25 = vpop.eup %6827 }
0x201e   :  { %v5340_v36 = vmul.f32 %v6828_v25, %v8266_v10  ;;  %v5346_v55 = vmul.f32 %v5343_v53, %v5341_v40  ;;  %v6830_v10 = vpop.eup %6829 }
0x201f   :  { %v6832_v48 = vpop.eup %6831  ;;  %v5396_v1 = vadd.f32 1.0, %v6830_v10 }
0x2020   :  { %v5345_v22 = vmul.f32 %v5343_v53, %v5340_v36  ;;  %5367 = vrot.lane.b32.xlu1 %v5346_v55, %s8418_s30  ;;  %v5395_v14 = vadd.f32 1.0, %v6832_v48 }
0x2022   :  { %5365 = vrot.lane.b32.xlu0 %v5345_v22, %s8418_s30 }
0x2040   :  { %v4536_v52 = vpop.xlane.xlu0 %4535 }
0x2041   :  { %v4540_v28 = vmul.f32 0.0625, %v4536_v52  ;;  %v5845_v52 = vld [vmem:[%s8381_s23] ss:$0 sm:$0xff] }
0x2042   :  { %v4539_v37 = vpop.xlane.xlu1 %4538 }
0x2043   :  { %v4541_v3 = vmul.f32 0.0625, %v4539_v37  ;;  %v4542_v39 = vadd.f32 1e-05, %v4540_v28 }
0x2045   :  { %v4543_v60 = vadd.f32 1e-05, %v4541_v3 }
0x2047   :  { %6833 = vrsqrt.f32 %v4543_v60 }
0x2048   :  { %6835 = vrsqrt.f32 %v4542_v39 }
0x2049   :  { %6837 = vrcp.f32 %v5396_v1 }
0x204a   :  { %6839 = vrcp.f32 %v5395_v14 }
0x2054   :  { %v6834_v29 = vpop.eup %6833 }
0x2055   :  { %v6836_v17 = vpop.eup %6835  ;;  %v4547_v8 = vmul.f32 %v6834_v29, %v8289_v38 }
0x2056   :  { %v4546_v5 = vmul.f32 %v6836_v17, %v8286_v49  ;;  %v6838_v34 = vpop.eup %6837 }
0x2057   :  { %v4555_v18 = vmul.f32 %v8277_v44, %v4547_v8  ;;  %v6840_v47 = vpop.eup %6839  ;;  %v5402_v27 = vmul.f32 %v6838_v34, %v7807_v31 }
0x2058   :  { %v4554_v7 = vmul.f32 %v8277_v44, %v4546_v5  ;;  %v5401_v11 = vmul.f32 %v6840_v47, %v7793_v4 }
0x2084   :  { %v5352_v61 = vpop.permute.xlu1 %5351  ;;  %v5350_v51 = vpop.permute.xlu0 %5349 }
0x2085   :  { %v5372_v58 = vsel %vm264_vm4, %v4555_v18, %v5352_v61  ;;  %v5371_v49 = vsel %vm264_vm4, %v4554_v7, %v5350_v51 }
0x2088   :  { %v5360_v30 = vpop.permute.xlu1 %5359  ;;  %v5358_v32 = vpop.permute.xlu0 %5357 }
0x2089   :  { %v5374_v33 = vsel %vm89_vm0, %v5372_v58, %v5360_v30  ;;  %v5373_v59 = vsel %vm89_vm0, %v5371_v49, %v5358_v32 }
0x2092   :  { %v5368_v38 = vpop.permute.xlu1 %5367 }
0x2093   :  { %v5376_v54 = vsel %vm2723_vm13, %v5374_v33, %v5368_v38 }
0x2094   :  { %v5388_v26 = vadd.f32 %v5386_v50, %v5376_v54  ;;  %v5366_v46 = vpop.permute.xlu0 %5365 }
0x2095   :  { %v5375_v44 = vsel %vm2723_vm13, %v5373_v59, %v5366_v46 }
0x2096   :  { %v5404_v43 = vmul.f32 %v5402_v27, %v5388_v26  ;;  %v5387_v45 = vadd.f32 %v5385_v13, %v5375_v44 }
0x2098   :  { %v5403_v24 = vmul.f32 %v5401_v11, %v5387_v45 }
0x209a   :  { %v5405_v2 = vpack.c.bf16 %v5404_v43, %v5403_v24 }
0x209c   :  { %6535 = vmatmul.mubr.msk.bf16.vlgmr.msra.gmra.mxu0 %vm642_vm10, %v5405_v2 }
0x215c   :  { %v5476_v42 = vpop.f32.mrf.mxu0 }
0x215d   :  { %v5483_v23 = vadd.f32 %v5476_v42, %v7744_v9 }
0x215e   :  { %v6536_v31 = vpop.f32.mrf.mxu0 }
0x215f   :  { %v5485_v63 = vsel %vm89_vm0, %v5483_v23, 0.0 }
0x2160   :  { %5486 = vadd.xlane.f32.xlu0 %v5485_v63  ;;  %v5479_v62 = vpop.f32.mrf.mxu0 }
0x2161   :  { %v5484_v57 = vadd.f32 %v5479_v62, %v7749_v0 }
0x2162   :  { %v6537_v12 = vpop.f32.mrf.mxu0 }
0x2163   :  { %v5488_v16 = vsel %vm89_vm0, %v5484_v57, 0.0 }
0x2164   :  { %5489 = vadd.xlane.f32.xlu1 %v5488_v16 }
0x21e9   :  { %v5487_v4 = vpop.xlane.xlu0 %5486 }
0x21ea   :  { %v5491_v15 = vmul.f32 0.03125, %v5487_v4 }
0x21ec   :  { %v5493_v20 = vsub.f32 %v5483_v23, %v5491_v15 }
0x21ed   :  { %v5490_v6 = vpop.xlane.xlu1 %5489 }
0x21ee   :  { %v5492_v35 = vmul.f32 0.03125, %v5490_v6  ;;  %v5495_v56 = vmul.f32 %v5493_v20, %v5493_v20 }
0x21f0   :  { %v5494_v53 = vsub.f32 %v5484_v57, %v5492_v35  ;;  %v5497_v9 = vsel %vm89_vm0, %v5495_v56, 0.0 }
0x21f1   :  { %5498 = vadd.xlane.f32.xlu0 %v5497_v9 }
0x21f2   :  { %v5496_v40 = vmul.f32 %v5494_v53, %v5494_v53 }
0x21f4   :  { %v5500_v25 = vsel %vm89_vm0, %v5496_v40, 0.0 }
0x21f5   :  { %5501 = vadd.xlane.f32.xlu0 %v5500_v25 }
0x227a   :  { %v5499_v36 = vpop.xlane.xlu0 %5498 }
0x227b   :  { %v5503_v0 = vmul.f32 0.03125, %v5499_v36 }
0x227d   :  { %v5505_v55 = vadd.f32 1e-05, %v5503_v0 }
0x227e   :  { %v5502_v22 = vpop.xlane.xlu0 %5501 }
0x227f   :  { %6841 = vrsqrt.f32 %v5505_v55  ;;  %v5504_v19 = vmul.f32 0.03125, %v5502_v22 }
0x2281   :  { %v5506_v41 = vadd.f32 1e-05, %v5504_v19 }
0x2283   :  { %6843 = vrsqrt.f32 %v5506_v41 }
0x228c   :  { %v6842_v37 = vpop.eup %6841 }
0x228d   :  { %v5509_v3 = vmul.f32 %v6842_v37, %v5493_v20 }
0x228f   :  { %v5518_v28 = vmul.f32 %v5845_v52, %v5509_v3 }
0x2290   :  { %v6844_v60 = vpop.eup %6843 }
0x2291   :  { %v5510_v39 = vmul.f32 %v6844_v60, %v5494_v53  ;;  %5520 = vst.msk [vmem:[#allocation2] sm:$0xff] %vm89_vm0, %v5518_v28 }
0x2293   :  { %v5519_v10 = vmul.f32 %v5845_v52, %v5510_v39 }
0x2295   :  { %5521 = vst.msk [vmem:[#allocation2 + $0x8] sm:$0xff] %vm89_vm0, %v5519_v10 }
0x2296   :  { %6858 = shalt.err (!%p6855_p4)
}
0x2297   :  { %s6882_s23 = smov 128   ;;  %s6883_s28 = smov 8  }
0x2298   :  { %5533 = dma.vmem_to_hbm [thread:$0]  %s5528_s2, 256, %s8382_s24, [#allocation3], %s6882_s23, %s6882_s23, %s6883_s28  }
0x2299   :  { %6867 = dma.done.wait [#allocation3], 256  }
0x229a   :  { %6868 = vsyncadd [#allocation3], 4294967040 }
0x229b   :  { %5537 = vsyncpa [#allocation3], 1 }

</bundles_post_ra>
